<compile_context>
chip_gen: v5e
topology: v5e:2x2
jax: 0.10.0
libtpu: 0.0.40
codegen_flags: <defaults>
</compile_context>

<pallas_src>
import jax
import jax.numpy as jnp
from jax.experimental import pallas as pl
from jax.experimental.pallas import tpu as pltpu  # noqa: F401

# wrapper / base_model hyper-parameters (inf_mode='fus' exercises both heads)
SCALE = 10.0
INF_MODE = "fus"
USE_SOFTMAX = True
NORMALIZE = True

B, C, H, W = 2, 3, 16, 16
KH = KW = 3
CP = 8                 # input-channel dim zero-padded 3 -> 8 (layout friendly)
F_CH = 32              # conv output channels
E = 32                 # embedding dim
NUM_CLASSES = 10
HW = H * W

CIFAR_MEAN = jnp.array([125.3, 123.0, 113.9], jnp.float32) / 255.0
CIFAR_STD = jnp.array([63.0, 62.1, 66.7], jnp.float32) / 255.0


# ---------------- single fused kernel: conv+ReLU+GAP+FC+heads+softmax ----------
def fused_forward_kernel(x_ref, w1_ref, b1_ref, w2_ref, b2_ref,
                         proto_ref, wo_ref, bo_ref, pool_ref, out_ref):
    # x_ref: (B, H+2, W+2, CP) mean-subtracted, zero-padded NHWC input
    # w1_ref: (KH*KW, CP, F) conv taps with 1/std folded per input channel
    w1 = w1_ref[...]
    acc = jnp.zeros((B * HW, F_CH), jnp.float32)
    for dy in range(KH):
        for dx in range(KW):
            xt = x_ref[:, dy:dy + H, dx:dx + W, :]            # (B, H, W, CP)
            xt = xt.reshape(B * HW, CP)                       # rows = (b, y, x)
            acc = acc + jnp.dot(xt, w1[dy * KW + dx],
                                preferred_element_type=jnp.float32)
    h = jnp.maximum(acc + b1_ref[...], 0.0)                   # conv bias + ReLU

    # global average pool per batch row-group, as an MXU matmul: (B, B*HW)@(B*HW, F)
    pooled = jnp.dot(pool_ref[...], h, preferred_element_type=jnp.float32)

    # FC -> embeddings  (B, E)
    emb = jnp.dot(pooled, w2_ref[...],
                  preferred_element_type=jnp.float32) + b2_ref[...]

    # 'sim' head: cosine similarity; prototypes are pre-normalized & pre-scaled
    e_n = emb * jax.lax.rsqrt(jnp.sum(emb * emb, axis=1, keepdims=True) + 1e-12)
    logits_sim = jnp.dot(e_n, proto_ref[...], preferred_element_type=jnp.float32)
    # 'ce' head: out_proj linear
    logits_ce = jnp.dot(emb, wo_ref[...],
                        preferred_element_type=jnp.float32) + bo_ref[...]
    # inf_mode == 'fus'
    logits = 0.5 * (logits_sim + logits_ce)

    # softmax over dim=1 (classes)
    m = jnp.max(logits, axis=1, keepdims=True)
    z = jnp.exp(logits - m)
    out_ref[...] = z / jnp.sum(z, axis=1, keepdims=True)


def wrapper_forward(x, params):
    # Tiny input prep (fuses into one XLA op under jit): NCHW -> NHWC,
    # subtract mean (keeps zero padding exact in normalized space),
    # spatial pad for SAME conv, channel pad 3 -> CP.
    xn = x.transpose(0, 2, 3, 1) - CIFAR_MEAN.reshape(1, 1, 1, C)
    xpad = jnp.pad(xn, ((0, 0), (1, 1), (1, 1), (0, CP - C)))
    return pl.pallas_call(
        fused_forward_kernel,
        out_shape=jax.ShapeDtypeStruct((B, NUM_CLASSES), jnp.float32),
    )(xpad, params["w1"], params["b1"], params["w2"], params["b2"],
      params["proto_t"], params["w_out_t"], params["b_out"], params["pool"])


# ---------------- pure-JAX reference (for a sanity check) -----------------------
def reference_forward(x, params_raw):
    mean = CIFAR_MEAN.reshape(1, C, 1, 1)
    std = CIFAR_STD.reshape(1, C, 1, 1)
    xn = (x - mean) / std
    h = jax.lax.conv_general_dilated(
        xn, params_raw["w_conv"], (1, 1), "SAME",
        dimension_numbers=("NCHW", "OIHW", "NCHW"),
        precision=jax.lax.Precision.HIGHEST)
    h = jax.nn.relu(h + params_raw["b_conv"].reshape(1, F_CH, 1, 1))
    pooled = h.mean(axis=(2, 3))
    emb = pooled @ params_raw["w_fc"] + params_raw["b_fc"]
    e_n = emb / jnp.linalg.norm(emb, axis=1, keepdims=True)
    p_n = params_raw["prototypes"] / jnp.linalg.norm(params_raw["prototypes"],
                                                     axis=1, keepdims=True)
    logits_sim = SCALE * (e_n @ p_n.T)
    logits_ce = emb @ params_raw["w_out"].T + params_raw["b_out"]
    logits = 0.5 * (logits_sim + logits_ce)
    return jax.nn.softmax(logits, axis=1)


# ---------------- param prep: fold normalize / pre-normalize prototypes ---------
def prepare_params(raw):
    inv_std = (1.0 / CIFAR_STD).reshape(1, 1, C, 1)
    # OIHW (F,C,KH,KW) -> (KH,KW,C,F), scale by 1/std per input channel,
    # flatten taps, zero-pad channel dim to CP.
    w1_taps = raw["w_conv"].transpose(2, 3, 1, 0) * inv_std          # (KH,KW,C,F)
    w1_taps = w1_taps.reshape(KH * KW, C, F_CH)
    w1_taps = jnp.pad(w1_taps, ((0, 0), (0, CP - C), (0, 0)))        # (9, CP, F)

    proto = raw["prototypes"]
    proto_n = proto / jnp.linalg.norm(proto, axis=1, keepdims=True)
    proto_t = (SCALE * proto_n).T                                    # (E, NC)

    pool = jnp.repeat(jnp.eye(B, dtype=jnp.float32), HW, axis=1) / HW  # (B, B*HW)

    return {
        "w1": w1_taps,
        "b1": raw["b_conv"].reshape(1, F_CH),
        "w2": raw["w_fc"],                                           # (F, E)
        "b2": raw["b_fc"].reshape(1, E),
        "proto_t": proto_t,
        "w_out_t": raw["w_out"].T,                                   # (E, NC)
        "b_out": raw["b_out"].reshape(1, NUM_CLASSES),
        "pool": pool,
    }


if __name__ == "__main__":
    key = jax.random.PRNGKey(0)
    kx, k1, k2, k3, k4, k5, k6, k7 = jax.random.split(key, 8)

    x = jax.random.uniform(kx, (B, C, H, W), jnp.float32)   # CIFAR-like in [0,1]

    raw = {
        "w_conv": 0.1 * jax.random.normal(k1, (F_CH, C, KH, KW), jnp.float32),
        "b_conv": 0.05 * jax.random.normal(k2, (F_CH,), jnp.float32),
        "w_fc": 0.1 * jax.random.normal(k3, (F_CH, E), jnp.float32),
        "b_fc": 0.05 * jax.random.normal(k4, (E,), jnp.float32),
        "prototypes": jax.random.normal(k5, (NUM_CLASSES, E), jnp.float32),
        "w_out": 0.1 * jax.random.normal(k6, (NUM_CLASSES, E), jnp.float32),
        "b_out": 0.05 * jax.random.normal(k7, (NUM_CLASSES,), jnp.float32),
    }

    params = prepare_params(raw)

    fwd = jax.jit(wrapper_forward)
    probs = fwd(x, params)
    probs = jax.block_until_ready(probs)

    ref = reference_forward(x, raw)
    assert probs.shape == (B, NUM_CLASSES)
    assert jnp.allclose(jnp.sum(probs, axis=1), 1.0, atol=1e-4)
    assert jnp.allclose(probs, ref, atol=1e-2), "mismatch vs reference"

    print("KERNEL_OK")
</pallas_src>

<mosaic_0001>
module attributes {stable_mosaic.version = 11 : i64} {
  func.func @fused_forward_kernel(%arg0: memref<2x18x18x8xf32, #tpu.memory_space<vmem>>, %arg1: memref<9x8x32xf32, #tpu.memory_space<vmem>>, %arg2: memref<1x32xf32, #tpu.memory_space<vmem>>, %arg3: memref<32x32xf32, #tpu.memory_space<vmem>>, %arg4: memref<1x32xf32, #tpu.memory_space<vmem>>, %arg5: memref<32x10xf32, #tpu.memory_space<vmem>>, %arg6: memref<32x10xf32, #tpu.memory_space<vmem>>, %arg7: memref<1x10xf32, #tpu.memory_space<vmem>>, %arg8: memref<2x512xf32, #tpu.memory_space<vmem>>, %arg9: memref<2x10xf32, #tpu.memory_space<vmem>>) attributes {dimension_semantics = [], scalar_prefetch = 0 : i64, scratch_operands = 0 : i64, tpu.core_type = #tpu.core_type<tc>} {
    %c0 = arith.constant 0 : index
    %c0_0 = arith.constant 0 : index
    %c0_1 = arith.constant 0 : index
    %0 = vector.load %arg1[%c0, %c0_0, %c0_1] : memref<9x8x32xf32, #tpu.memory_space<vmem>>, vector<9x8x32xf32>
    %cst = arith.constant 0.000000e+00 : f32
    %1 = vector.broadcast %cst : f32 to vector<512x32xf32>
    %c0_2 = arith.constant 0 : index
    %c0_3 = arith.constant 0 : index
    %c0_4 = arith.constant 0 : index
    %c0_5 = arith.constant 0 : index
    %2 = vector.load %arg0[%c0_2, %c0_3, %c0_4, %c0_5] : memref<2x18x18x8xf32, #tpu.memory_space<vmem>>, vector<2x16x16x8xf32>
    %3 = vector.shape_cast %2 : vector<2x16x16x8xf32> to vector<512x8xf32>
    %4 = vector.extract_strided_slice %0 {offsets = [0, 0, 0], sizes = [1, 8, 32], strides = [1, 1, 1]} : vector<9x8x32xf32> to vector<1x8x32xf32>
    %5 = vector.shape_cast %4 : vector<1x8x32xf32> to vector<8x32xf32>
    %cst_6 = arith.constant dense<0.000000e+00> : vector<512x32xf32>
    %6 = tpu.matmul %3, %5, %cst_6 {dimension_numbers = #tpu.dot_dimension_numbers<[1], [0], [0], [1], [0, 0, 1, 1], [], []>} : vector<512x8xf32>, vector<8x32xf32>, vector<512x32xf32> -> vector<512x32xf32>
    %7 = arith.addf %1, %6 : vector<512x32xf32>
    %c0_7 = arith.constant 0 : index
    %c0_8 = arith.constant 0 : index
    %c1 = arith.constant 1 : index
    %c0_9 = arith.constant 0 : index
    %8 = vector.load %arg0[%c0_7, %c0_8, %c1, %c0_9] : memref<2x18x18x8xf32, #tpu.memory_space<vmem>>, vector<2x16x16x8xf32>
    %9 = vector.shape_cast %8 : vector<2x16x16x8xf32> to vector<512x8xf32>
    %10 = vector.extract_strided_slice %0 {offsets = [1, 0, 0], sizes = [1, 8, 32], strides = [1, 1, 1]} : vector<9x8x32xf32> to vector<1x8x32xf32>
    %11 = vector.shape_cast %10 : vector<1x8x32xf32> to vector<8x32xf32>
    %cst_10 = arith.constant dense<0.000000e+00> : vector<512x32xf32>
    %12 = tpu.matmul %9, %11, %cst_10 {dimension_numbers = #tpu.dot_dimension_numbers<[1], [0], [0], [1], [0, 0, 1, 1], [], []>} : vector<512x8xf32>, vector<8x32xf32>, vector<512x32xf32> -> vector<512x32xf32>
    %13 = arith.addf %7, %12 : vector<512x32xf32>
    %c0_11 = arith.constant 0 : index
    %c0_12 = arith.constant 0 : index
    %c2 = arith.constant 2 : index
    %c0_13 = arith.constant 0 : index
    %14 = vector.load %arg0[%c0_11, %c0_12, %c2, %c0_13] : memref<2x18x18x8xf32, #tpu.memory_space<vmem>>, vector<2x16x16x8xf32>
    %15 = vector.shape_cast %14 : vector<2x16x16x8xf32> to vector<512x8xf32>
    %16 = vector.extract_strided_slice %0 {offsets = [2, 0, 0], sizes = [1, 8, 32], strides = [1, 1, 1]} : vector<9x8x32xf32> to vector<1x8x32xf32>
    %17 = vector.shape_cast %16 : vector<1x8x32xf32> to vector<8x32xf32>
    %cst_14 = arith.constant dense<0.000000e+00> : vector<512x32xf32>
    %18 = tpu.matmul %15, %17, %cst_14 {dimension_numbers = #tpu.dot_dimension_numbers<[1], [0], [0], [1], [0, 0, 1, 1], [], []>} : vector<512x8xf32>, vector<8x32xf32>, vector<512x32xf32> -> vector<512x32xf32>
    %19 = arith.addf %13, %18 : vector<512x32xf32>
    %c0_15 = arith.constant 0 : index
    %c1_16 = arith.constant 1 : index
    %c0_17 = arith.constant 0 : index
    %c0_18 = arith.constant 0 : index
    %20 = vector.load %arg0[%c0_15, %c1_16, %c0_17, %c0_18] : memref<2x18x18x8xf32, #tpu.memory_space<vmem>>, vector<2x16x16x8xf32>
    %21 = vector.shape_cast %20 : vector<2x16x16x8xf32> to vector<512x8xf32>
    %22 = vector.extract_strided_slice %0 {offsets = [3, 0, 0], sizes = [1, 8, 32], strides = [1, 1, 1]} : vector<9x8x32xf32> to vector<1x8x32xf32>
    %23 = vector.shape_cast %22 : vector<1x8x32xf32> to vector<8x32xf32>
    %cst_19 = arith.constant dense<0.000000e+00> : vector<512x32xf32>
    %24 = tpu.matmul %21, %23, %cst_19 {dimension_numbers = #tpu.dot_dimension_numbers<[1], [0], [0], [1], [0, 0, 1, 1], [], []>} : vector<512x8xf32>, vector<8x32xf32>, vector<512x32xf32> -> vector<512x32xf32>
    %25 = arith.addf %19, %24 : vector<512x32xf32>
    %c0_20 = arith.constant 0 : index
    %c1_21 = arith.constant 1 : index
    %c1_22 = arith.constant 1 : index
    %c0_23 = arith.constant 0 : index
    %26 = vector.load %arg0[%c0_20, %c1_21, %c1_22, %c0_23] : memref<2x18x18x8xf32, #tpu.memory_space<vmem>>, vector<2x16x16x8xf32>
    %27 = vector.shape_cast %26 : vector<2x16x16x8xf32> to vector<512x8xf32>
    %28 = vector.extract_strided_slice %0 {offsets = [4, 0, 0], sizes = [1, 8, 32], strides = [1, 1, 1]} : vector<9x8x32xf32> to vector<1x8x32xf32>
    %29 = vector.shape_cast %28 : vector<1x8x32xf32> to vector<8x32xf32>
    %cst_24 = arith.constant dense<0.000000e+00> : vector<512x32xf32>
    %30 = tpu.matmul %27, %29, %cst_24 {dimension_numbers = #tpu.dot_dimension_numbers<[1], [0], [0], [1], [0, 0, 1, 1], [], []>} : vector<512x8xf32>, vector<8x32xf32>, vector<512x32xf32> -> vector<512x32xf32>
    %31 = arith.addf %25, %30 : vector<512x32xf32>
    %c0_25 = arith.constant 0 : index
    %c1_26 = arith.constant 1 : index
    %c2_27 = arith.constant 2 : index
    %c0_28 = arith.constant 0 : index
    %32 = vector.load %arg0[%c0_25, %c1_26, %c2_27, %c0_28] : memref<2x18x18x8xf32, #tpu.memory_space<vmem>>, vector<2x16x16x8xf32>
    %33 = vector.shape_cast %32 : vector<2x16x16x8xf32> to vector<512x8xf32>
    %34 = vector.extract_strided_slice %0 {offsets = [5, 0, 0], sizes = [1, 8, 32], strides = [1, 1, 1]} : vector<9x8x32xf32> to vector<1x8x32xf32>
    %35 = vector.shape_cast %34 : vector<1x8x32xf32> to vector<8x32xf32>
    %cst_29 = arith.constant dense<0.000000e+00> : vector<512x32xf32>
    %36 = tpu.matmul %33, %35, %cst_29 {dimension_numbers = #tpu.dot_dimension_numbers<[1], [0], [0], [1], [0, 0, 1, 1], [], []>} : vector<512x8xf32>, vector<8x32xf32>, vector<512x32xf32> -> vector<512x32xf32>
    %37 = arith.addf %31, %36 : vector<512x32xf32>
    %c0_30 = arith.constant 0 : index
    %c2_31 = arith.constant 2 : index
    %c0_32 = arith.constant 0 : index
    %c0_33 = arith.constant 0 : index
    %38 = vector.load %arg0[%c0_30, %c2_31, %c0_32, %c0_33] : memref<2x18x18x8xf32, #tpu.memory_space<vmem>>, vector<2x16x16x8xf32>
    %39 = vector.shape_cast %38 : vector<2x16x16x8xf32> to vector<512x8xf32>
    %40 = vector.extract_strided_slice %0 {offsets = [6, 0, 0], sizes = [1, 8, 32], strides = [1, 1, 1]} : vector<9x8x32xf32> to vector<1x8x32xf32>
    %41 = vector.shape_cast %40 : vector<1x8x32xf32> to vector<8x32xf32>
    %cst_34 = arith.constant dense<0.000000e+00> : vector<512x32xf32>
    %42 = tpu.matmul %39, %41, %cst_34 {dimension_numbers = #tpu.dot_dimension_numbers<[1], [0], [0], [1], [0, 0, 1, 1], [], []>} : vector<512x8xf32>, vector<8x32xf32>, vector<512x32xf32> -> vector<512x32xf32>
    %43 = arith.addf %37, %42 : vector<512x32xf32>
    %c0_35 = arith.constant 0 : index
    %c2_36 = arith.constant 2 : index
    %c1_37 = arith.constant 1 : index
    %c0_38 = arith.constant 0 : index
    %44 = vector.load %arg0[%c0_35, %c2_36, %c1_37, %c0_38] : memref<2x18x18x8xf32, #tpu.memory_space<vmem>>, vector<2x16x16x8xf32>
    %45 = vector.shape_cast %44 : vector<2x16x16x8xf32> to vector<512x8xf32>
    %46 = vector.extract_strided_slice %0 {offsets = [7, 0, 0], sizes = [1, 8, 32], strides = [1, 1, 1]} : vector<9x8x32xf32> to vector<1x8x32xf32>
    %47 = vector.shape_cast %46 : vector<1x8x32xf32> to vector<8x32xf32>
    %cst_39 = arith.constant dense<0.000000e+00> : vector<512x32xf32>
    %48 = tpu.matmul %45, %47, %cst_39 {dimension_numbers = #tpu.dot_dimension_numbers<[1], [0], [0], [1], [0, 0, 1, 1], [], []>} : vector<512x8xf32>, vector<8x32xf32>, vector<512x32xf32> -> vector<512x32xf32>
    %49 = arith.addf %43, %48 : vector<512x32xf32>
    %c0_40 = arith.constant 0 : index
    %c2_41 = arith.constant 2 : index
    %c2_42 = arith.constant 2 : index
    %c0_43 = arith.constant 0 : index
    %50 = vector.load %arg0[%c0_40, %c2_41, %c2_42, %c0_43] : memref<2x18x18x8xf32, #tpu.memory_space<vmem>>, vector<2x16x16x8xf32>
    %51 = vector.shape_cast %50 : vector<2x16x16x8xf32> to vector<512x8xf32>
    %52 = vector.extract_strided_slice %0 {offsets = [8, 0, 0], sizes = [1, 8, 32], strides = [1, 1, 1]} : vector<9x8x32xf32> to vector<1x8x32xf32>
    %53 = vector.shape_cast %52 : vector<1x8x32xf32> to vector<8x32xf32>
    %cst_44 = arith.constant dense<0.000000e+00> : vector<512x32xf32>
    %54 = tpu.matmul %51, %53, %cst_44 {dimension_numbers = #tpu.dot_dimension_numbers<[1], [0], [0], [1], [0, 0, 1, 1], [], []>} : vector<512x8xf32>, vector<8x32xf32>, vector<512x32xf32> -> vector<512x32xf32>
    %55 = arith.addf %49, %54 : vector<512x32xf32>
    %c0_45 = arith.constant 0 : index
    %c0_46 = arith.constant 0 : index
    %56 = vector.load %arg2[%c0_45, %c0_46] : memref<1x32xf32, #tpu.memory_space<vmem>>, vector<1x32xf32>
    %57 = vector.broadcast %56 : vector<1x32xf32> to vector<512x32xf32>
    %58 = arith.addf %55, %57 : vector<512x32xf32>
    %cst_47 = arith.constant 0.000000e+00 : f32
    %59 = vector.broadcast %cst_47 : f32 to vector<512x32xf32>
    %60 = arith.maximumf %58, %59 : vector<512x32xf32>
    %c0_48 = arith.constant 0 : index
    %c0_49 = arith.constant 0 : index
    %61 = vector.load %arg8[%c0_48, %c0_49] : memref<2x512xf32, #tpu.memory_space<vmem>>, vector<2x512xf32>
    %cst_50 = arith.constant dense<0.000000e+00> : vector<2x32xf32>
    %62 = tpu.matmul %61, %60, %cst_50 {dimension_numbers = #tpu.dot_dimension_numbers<[1], [0], [0], [1], [0, 0, 1, 1], [], []>} : vector<2x512xf32>, vector<512x32xf32>, vector<2x32xf32> -> vector<2x32xf32>
    %c0_51 = arith.constant 0 : index
    %c0_52 = arith.constant 0 : index
    %63 = vector.load %arg3[%c0_51, %c0_52] : memref<32x32xf32, #tpu.memory_space<vmem>>, vector<32x32xf32>
    %cst_53 = arith.constant dense<0.000000e+00> : vector<2x32xf32>
    %64 = tpu.matmul %62, %63, %cst_53 {dimension_numbers = #tpu.dot_dimension_numbers<[1], [0], [0], [1], [0, 0, 1, 1], [], []>} : vector<2x32xf32>, vector<32x32xf32>, vector<2x32xf32> -> vector<2x32xf32>
    %c0_54 = arith.constant 0 : index
    %c0_55 = arith.constant 0 : index
    %65 = vector.load %arg4[%c0_54, %c0_55] : memref<1x32xf32, #tpu.memory_space<vmem>>, vector<1x32xf32>
    %66 = vector.broadcast %65 : vector<1x32xf32> to vector<2x32xf32>
    %67 = arith.addf %64, %66 : vector<2x32xf32>
    %68 = arith.mulf %67, %67 : vector<2x32xf32>
    %cst_56 = arith.constant dense<0.000000e+00> : vector<2xf32>
    %69 = vector.multi_reduction <add>, %68, %cst_56 [1] : vector<2x32xf32> to vector<2xf32>
    %70 = vector.shape_cast %69 : vector<2xf32> to vector<2x1xf32>
    %cst_57 = arith.constant 9.99999996E-13 : f32
    %71 = vector.broadcast %cst_57 : f32 to vector<2x1xf32>
    %72 = arith.addf %70, %71 : vector<2x1xf32>
    %73 = math.rsqrt %72 : vector<2x1xf32>
    %74 = vector.broadcast %73 : vector<2x1xf32> to vector<2x32xf32>
    %75 = arith.mulf %67, %74 : vector<2x32xf32>
    %c0_58 = arith.constant 0 : index
    %c0_59 = arith.constant 0 : index
    %76 = vector.load %arg5[%c0_58, %c0_59] : memref<32x10xf32, #tpu.memory_space<vmem>>, vector<32x10xf32>
    %cst_60 = arith.constant dense<0.000000e+00> : vector<2x10xf32>
    %77 = tpu.matmul %75, %76, %cst_60 {dimension_numbers = #tpu.dot_dimension_numbers<[1], [0], [0], [1], [0, 0, 1, 1], [], []>} : vector<2x32xf32>, vector<32x10xf32>, vector<2x10xf32> -> vector<2x10xf32>
    %c0_61 = arith.constant 0 : index
    %c0_62 = arith.constant 0 : index
    %78 = vector.load %arg6[%c0_61, %c0_62] : memref<32x10xf32, #tpu.memory_space<vmem>>, vector<32x10xf32>
    %cst_63 = arith.constant dense<0.000000e+00> : vector<2x10xf32>
    %79 = tpu.matmul %67, %78, %cst_63 {dimension_numbers = #tpu.dot_dimension_numbers<[1], [0], [0], [1], [0, 0, 1, 1], [], []>} : vector<2x32xf32>, vector<32x10xf32>, vector<2x10xf32> -> vector<2x10xf32>
    %c0_64 = arith.constant 0 : index
    %c0_65 = arith.constant 0 : index
    %80 = vector.load %arg7[%c0_64, %c0_65] : memref<1x10xf32, #tpu.memory_space<vmem>>, vector<1x10xf32>
    %81 = vector.broadcast %80 : vector<1x10xf32> to vector<2x10xf32>
    %82 = arith.addf %79, %81 : vector<2x10xf32>
    %83 = arith.addf %77, %82 : vector<2x10xf32>
    %cst_66 = arith.constant 5.000000e-01 : f32
    %84 = vector.broadcast %cst_66 : f32 to vector<2x10xf32>
    %85 = arith.mulf %84, %83 : vector<2x10xf32>
    %cst_67 = arith.constant dense<0xFF800000> : vector<2xf32>
    %86 = vector.multi_reduction <maximumf>, %85, %cst_67 [1] : vector<2x10xf32> to vector<2xf32>
    %87 = vector.shape_cast %86 : vector<2xf32> to vector<2x1xf32>
    %88 = vector.broadcast %87 : vector<2x1xf32> to vector<2x10xf32>
    %89 = arith.subf %85, %88 : vector<2x10xf32>
    %90 = math.exp %89 : vector<2x10xf32>
    %cst_68 = arith.constant dense<0.000000e+00> : vector<2xf32>
    %91 = vector.multi_reduction <add>, %90, %cst_68 [1] : vector<2x10xf32> to vector<2xf32>
    %92 = vector.shape_cast %91 : vector<2xf32> to vector<2x1xf32>
    %93 = vector.broadcast %92 : vector<2x1xf32> to vector<2x10xf32>
    %94 = arith.divf %90, %93 : vector<2x10xf32>
    %c0_69 = arith.constant 0 : index
    %c0_70 = arith.constant 0 : index
    %95 = vector.load %arg9[%c0_69, %c0_70] : memref<2x10xf32, #tpu.memory_space<vmem>>, vector<2x10xf32>
    tpu.vector_store %arg9[%c0_69, %c0_70], %94 {strides = array<i32>} : memref<2x10xf32, #tpu.memory_space<vmem>>, vector<2x10xf32>,
    return
  }
}

</mosaic_0001>

<bundles_post_ra>
// kernel: wrapper_forward.1
= control target key start
LH: loop header
LB: loop body
LE: loop exit
PB: predicated region body
PF: predicated region fallthrough
CT: control target
= control target key end

     0   :  { %vm170_vm0 = vcmask 64512   ;;  %s9671_s0 = inlined_call_operand.vmem [shape: f32[2,18,18,8], index: 0, kind: input, shape index: {}]   ;;  %s9672_s1 = inlined_call_operand.vmem [shape: f32[9,8,32], index: 1, kind: input, shape index: {}]   ;;  %s9673_s2 = inlined_call_operand.vmem [shape: f32[1,32], index: 2, kind: input, shape index: {}]   ;;  %s9674_s3 = inlined_call_operand.vmem [shape: f32[32,32], index: 3, kind: input, shape index: {}]   ;;  %s9675_s4 = inlined_call_operand.vmem [shape: f32[1,32], index: 4, kind: input, shape index: {}]   ;;  %s9676_s5 = inlined_call_operand.vmem [shape: f32[32,10], index: 5, kind: input, shape index: {}]   ;;  %s9677_s6 = inlined_call_operand.vmem [shape: f32[32,10], index: 6, kind: input, shape index: {}]   ;;  %s9678_s7 = inlined_call_operand.vmem [shape: f32[1,10], index: 7, kind: input, shape index: {}]   ;;  %s9679_s8 = inlined_call_operand.vmem [shape: f32[2,512], index: 8, kind: input, shape index: {}]   ;;  %s9680_s9 = inlined_call_operand.hbm [shape: f32[2,10], index: 9, kind: output, shape index: {}]  }
   0x1   :  { %v34_v0 = vld [vmem:[%s9672_s1 + $0x8] sm:$0xff]  ;;  %v137_v3 = vld [vmem:[%s9671_s0 + $0x171] sm:$0xff] }
   0x2   :  { %v106_v1 = vld [vmem:[%s9671_s0 + $0x1] sm:$0xff]  ;;  %378 = vmatpush.msra.mxu0 %v34_v0  ;;  %6014 = vmatpush.msra.mxu1 %v34_v0  ;;  %v107_v5 = vld [vmem:[%s9671_s0 + $0x9] sm:$0xff]  ;;  %v6133_v6 = vld [vmem:[%s9671_s0 + $0xf1] sm:$0xff] }
   0x3   :  { %v6114_v2 = vld [vmem:[%s9671_s0 + $0xe1] sm:$0xff]  ;;  %6015 = vmatpush.msra.mxu2 %v34_v0  ;;  %6016 = vmatpush.msra.mxu3 %v34_v0 }
   0x4   :  { %v153_v4 = vld [vmem:[%s9671_s0 + $0x261] sm:$0xff]  ;;  %5051 = vmatmul.msk.f32.vlgmr.msra.gmra.mxu0 %vm170_vm0, %v106_v1  ;;  %5070 = vmatmul.msk.f32.vlgmr.msra.gmra.mxu1 %vm170_vm0, %v6114_v2 }
   0x5   :  { %5082 = vmatmul.msk.f32.vlgmr.msra.gmra.mxu2 %vm170_vm0, %v137_v3  ;;  %5098 = vmatmul.msk.f32.vlgmr.msra.gmra.mxu3 %vm170_vm0, %v153_v4 }
   0x6   :  { %14 = vsyncpa [#allocation3], 0  ;;  %v138_v7 = vld [vmem:[%s9671_s0 + $0x1b1] sm:$0xff]  ;;  %v6149_v9 = vld [vmem:[%s9671_s0 + $0x19] sm:$0xff]  ;;  %vm4909_vm1 = vcmask 261120   ;;  %vm4934_vm2 = vcmask 254976  }
   0x7   :  { %v154_v8 = vld [vmem:[%s9671_s0 + $0x271] sm:$0xff]  ;;  %v6154_v10 = vld [vmem:[%s9671_s0 + $0xf9] sm:$0xff]  ;;  %v6171_v13 = vld [vmem:[%s9671_s0 + $0x21] sm:$0xff]  ;;  %vm5009_vm6 = vcmask 74752   ;;  %s5042_s22 = sshll.u32 %s9680_s9, 4  ;;  %s5043_s22 = int_to_ptr.hbm [resolvable:$true] %s5042_s22 }
   0x8   :  { %v139_v11 = vld [vmem:[%s9671_s0 + $0x1b9] sm:$0xff]  ;;  %v6176_v14 = vld [vmem:[%s9671_s0 + $0x109] sm:$0xff]  ;;  %v6193_v17 = vld [vmem:[%s9671_s0 + $0x31] sm:$0xff] }
   0x9   :  { %v155_v12 = vld [vmem:[%s9671_s0 + $0x279] sm:$0xff]  ;;  %v140_v15 = vld [vmem:[%s9671_s0 + $0x1c9] sm:$0xff]  ;;  %v6198_v18 = vld [vmem:[%s9671_s0 + $0x111] sm:$0xff] }
   0xa   :  { %v156_v16 = vld [vmem:[%s9671_s0 + $0x289] sm:$0xff]  ;;  %v141_v19 = vld [vmem:[%s9671_s0 + $0x1d1] sm:$0xff]  ;;  %v6215_v21 = vld [vmem:[%s9671_s0 + $0x39] sm:$0xff] }
   0xb   :  { %v157_v20 = vld [vmem:[%s9671_s0 + $0x291] sm:$0xff]  ;;  %v6220_v22 = vld [vmem:[%s9671_s0 + $0x121] sm:$0xff]  ;;  %v6237_v25 = vld [vmem:[%s9671_s0 + $0x49] sm:$0xff] }
   0xc   :  { %5052 = vmatmul.msk.f32.gmra.mxu0 %vm170_vm0, %v107_v5  ;;  %5071 = vmatmul.msk.f32.gmra.mxu1 %vm170_vm0, %v6133_v6  ;;  %v142_v23 = vld [vmem:[%s9671_s0 + $0x1e1] sm:$0xff]  ;;  %v6242_v26 = vld [vmem:[%s9671_s0 + $0x129] sm:$0xff]  ;;  %v6259_v29 = vld [vmem:[%s9671_s0 + $0x51] sm:$0xff] }
   0xd   :  { %5083 = vmatmul.msk.f32.gmra.mxu2 %vm170_vm0, %v138_v7  ;;  %5099 = vmatmul.msk.f32.gmra.mxu3 %vm170_vm0, %v154_v8  ;;  %v158_v24 = vld [vmem:[%s9671_s0 + $0x2a1] sm:$0xff]  ;;  %v143_v27 = vld [vmem:[%s9671_s0 + $0x1e9] sm:$0xff]  ;;  %v6264_v30 = vld [vmem:[%s9671_s0 + $0x139] sm:$0xff] }
   0xe   :  { %v159_v28 = vld [vmem:[%s9671_s0 + $0x2a9] sm:$0xff]  ;;  %v144_v31 = vld [vmem:[%s9671_s0 + $0x1f9] sm:$0xff]  ;;  %v6284_v34 = vld [vmem:[%s9671_s0 + $0x61] sm:$0xff] }
   0xf   :  { %v160_v32 = vld [vmem:[%s9671_s0 + $0x2b9] sm:$0xff]  ;;  %v6289_v35 = vld [vmem:[%s9671_s0 + $0x141] sm:$0xff]  ;;  %v6306_v38 = vld [vmem:[%s9671_s0 + $0x69] sm:$0xff] }
  0x10   :  { %v33_v33 = vld [vmem:[%s9672_s1] sm:$0xff]  ;;  %v6311_v39 = vld [vmem:[%s9671_s0 + $0x151] sm:$0xff]  ;;  %v6355_v47 = vld [vmem:[%s9671_s0 + $0x169] sm:$0xff] }
  0x11   :  { %779 = vmatpush.msrb.mxu1 %v33_v33  ;;  %v145_v36 = vld [vmem:[%s9671_s0 + $0x201] sm:$0xff]  ;;  %v146_v40 = vld [vmem:[%s9671_s0 + $0x211] sm:$0xff]  ;;  %v6328_v42 = vld [vmem:[%s9671_s0 + $0x79] sm:$0xff] }
  0x12   :  { %v161_v37 = vld [vmem:[%s9671_s0 + $0x2c1] sm:$0xff]  ;;  %v162_v41 = vld [vmem:[%s9671_s0 + $0x2d1] sm:$0xff]  ;;  %v6333_v43 = vld [vmem:[%s9671_s0 + $0x159] sm:$0xff] }
  0x13   :  { %v147_v44 = vld [vmem:[%s9671_s0 + $0x219] sm:$0xff]  ;;  %v6350_v46 = vld [vmem:[%s9671_s0 + $0x81] sm:$0xff]  ;;  %v148_v48 = vld [vmem:[%s9671_s0 + $0x229] sm:$0xff] }
  0x14   :  { %5053 = vmatmul.msk.f32.gmra.mxu0 %vm170_vm0, %v6149_v9  ;;  %5072 = vmatmul.msk.f32.gmra.mxu1 %vm170_vm0, %v6154_v10  ;;  %v163_v45 = vld [vmem:[%s9671_s0 + $0x2d9] sm:$0xff]  ;;  %v164_v49 = vld [vmem:[%s9671_s0 + $0x2e9] sm:$0xff]  ;;  %v6372_v50 = vld [vmem:[%s9671_s0 + $0x91] sm:$0xff] }
  0x15   :  { %5084 = vmatmul.msk.f32.gmra.mxu2 %vm170_vm0, %v139_v11  ;;  %5100 = vmatmul.msk.f32.gmra.mxu3 %vm170_vm0, %v155_v12  ;;  %v42_v51 = vld [vmem:[%s9671_s0] sm:$0xff]  ;;  %v35_v52 = vld [vmem:[%s9672_s1 + $0x10] sm:$0xff]  ;;  %v43_v56 = vld [vmem:[%s9671_s0 + $0x8] sm:$0xff] }
  0x16   :  { %v149_v53 = vld [vmem:[%s9671_s0 + $0x231] sm:$0xff]  ;;  %1244 = vmatpush.msrb.mxu2 %v35_v52  ;;  %v6394_v55 = vld [vmem:[%s9671_s0 + $0x99] sm:$0xff]  ;;  %v150_v58 = vld [vmem:[%s9671_s0 + $0x241] sm:$0xff] }
  0x17   :  { %v165_v54 = vld [vmem:[%s9671_s0 + $0x2f1] sm:$0xff]  ;;  %v166_v59 = vld [vmem:[%s9671_s0 + $0x301] sm:$0xff]  ;;  %v6416_v60 = vld [vmem:[%s9671_s0 + $0xa9] sm:$0xff] }
  0x18   :  { %v36_v57 = vld [vmem:[%s9672_s1 + $0x18] sm:$0xff]  ;;  %v151_v62 = vld [vmem:[%s9671_s0 + $0x249] sm:$0xff]  ;;  %v45_v1 = vld [vmem:[%s9671_s0 + $0x20] sm:$0xff] }
  0x19   :  { %1774 = vmatpush.msrb.mxu3 %v36_v57  ;;  %v44_v61 = vld [vmem:[%s9671_s0 + $0x18] sm:$0xff]  ;;  %v167_v63 = vld [vmem:[%s9671_s0 + $0x309] sm:$0xff]  ;;  %v37_v3 = vld [vmem:[%s9672_s1 + $0x20] sm:$0xff] }
  0x1a   :  { %v6435_v0 = vld [vmem:[%s9671_s0 + $0xb1] sm:$0xff]  ;;  %v152_v4 = vld [vmem:[%s9671_s0 + $0x259] sm:$0xff]  ;;  %2303 = vmatpush.msrb.mxu0 %v37_v3  ;;  %v6461_v11 = vld [vmem:[%s9671_s0 + $0xc1] sm:$0xff] }
  0x1b   :  { %v168_v5 = vld [vmem:[%s9671_s0 + $0x319] sm:$0xff]  ;;  %v46_v12 = vld [vmem:[%s9671_s0 + $0x30] sm:$0xff]  ;;  %v51_v3 = vld [vmem:[%s9671_s0 + $0x68] sm:$0xff] }
  0x1c   :  { %5054 = vmatmul.msk.f32.gmra.mxu0 %vm170_vm0, %v6171_v13  ;;  %5073 = vmatmul.msk.f32.gmra.mxu1 %vm170_vm0, %v6176_v14  ;;  %v49_v52 = vld [vmem:[%s9671_s0 + $0x50] sm:$0xff] }
  0x1d   :  { %5085 = vmatmul.msk.f32.gmra.mxu2 %vm170_vm0, %v140_v15  ;;  %5101 = vmatmul.msk.f32.gmra.mxu3 %vm170_vm0, %v156_v16  ;;  %v169_v15 = vld [vmem:[%s9671_s0 + $0x321] sm:$0xff] }
  0x1e   :  { %v973_v16 = vld [vmem:[%s9671_s0 + $0x2] sm:$0xff] }
  0x24   :  { %5055 = vmatmul.msk.f32.gmra.mxu0 %vm170_vm0, %v6193_v17  ;;  %5074 = vmatmul.msk.f32.gmra.mxu1 %vm170_vm0, %v6198_v18 }
  0x25   :  { %5086 = vmatmul.msk.f32.gmra.mxu2 %vm170_vm0, %v141_v19  ;;  %5102 = vmatmul.msk.f32.gmra.mxu3 %vm170_vm0, %v157_v20 }
  0x2c   :  { %5056 = vmatmul.msk.f32.gmra.mxu0 %vm170_vm0, %v6215_v21  ;;  %5075 = vmatmul.msk.f32.gmra.mxu1 %vm170_vm0, %v6220_v22 }
  0x2d   :  { %5087 = vmatmul.msk.f32.gmra.mxu2 %vm170_vm0, %v142_v23  ;;  %5103 = vmatmul.msk.f32.gmra.mxu3 %vm170_vm0, %v158_v24 }
  0x34   :  { %5057 = vmatmul.msk.f32.gmra.mxu0 %vm170_vm0, %v6237_v25  ;;  %5076 = vmatmul.msk.f32.gmra.mxu1 %vm170_vm0, %v6242_v26 }
  0x35   :  { %5088 = vmatmul.msk.f32.gmra.mxu2 %vm170_vm0, %v143_v27  ;;  %5104 = vmatmul.msk.f32.gmra.mxu3 %vm170_vm0, %v159_v28  ;;  %v6488_v27 = vld [vmem:[%s9671_s0 + $0xc9] sm:$0xff]  ;;  %v47_v28 = vld [vmem:[%s9671_s0 + $0x38] sm:$0xff] }
  0x3c   :  { %5058 = vmatmul.msk.f32.gmra.mxu0 %vm170_vm0, %v6259_v29  ;;  %5077 = vmatmul.msk.f32.gmra.mxu1 %vm170_vm0, %v6264_v30 }
  0x3d   :  { %5089 = vmatmul.msk.f32.gmra.mxu2 %vm170_vm0, %v144_v31  ;;  %5105 = vmatmul.msk.f32.gmra.mxu3 %vm170_vm0, %v160_v32  ;;  %v974_v31 = vld [vmem:[%s9671_s0 + $0xa] sm:$0xff] }
  0x44   :  { %5059 = vmatmul.msk.f32.gmra.mxu0 %vm170_vm0, %v6284_v34  ;;  %5078 = vmatmul.msk.f32.gmra.mxu1 %vm170_vm0, %v6289_v35 }
  0x45   :  { %5090 = vmatmul.msk.f32.gmra.mxu2 %vm170_vm0, %v145_v36  ;;  %5106 = vmatmul.msk.f32.gmra.mxu3 %vm170_vm0, %v161_v37 }
  0x4c   :  { %5060 = vmatmul.msk.f32.gmra.mxu0 %vm170_vm0, %v6306_v38  ;;  %5079 = vmatmul.msk.f32.gmra.mxu1 %vm170_vm0, %v6311_v39 }
  0x4d   :  { %5091 = vmatmul.msk.f32.gmra.mxu2 %vm170_vm0, %v146_v40  ;;  %5107 = vmatmul.msk.f32.gmra.mxu3 %vm170_vm0, %v162_v41  ;;  %v6512_v40 = vld [vmem:[%s9671_s0 + $0xd9] sm:$0xff]  ;;  %v48_v41 = vld [vmem:[%s9671_s0 + $0x48] sm:$0xff] }
  0x54   :  { %5061 = vmatmul.msk.f32.gmra.mxu0 %vm170_vm0, %v6328_v42  ;;  %5080 = vmatmul.msk.f32.gmra.mxu1 %vm170_vm0, %v6333_v43 }
  0x55   :  { %5092 = vmatmul.msk.f32.gmra.mxu2 %vm170_vm0, %v147_v44  ;;  %5108 = vmatmul.msk.f32.gmra.mxu3 %vm170_vm0, %v163_v45  ;;  %v975_v44 = vld [vmem:[%s9671_s0 + $0x1a] sm:$0xff] }
  0x5c   :  { %5062 = vmatmul.msk.f32.gmra.mxu0 %vm170_vm0, %v6350_v46  ;;  %5081 = vmatmul.msk.f32.gmra.mxu1 %vm170_vm0, %v6355_v47 }
  0x5d   :  { %5093 = vmatmul.msk.f32.gmra.mxu2 %vm170_vm0, %v148_v48  ;;  %5109 = vmatmul.msk.f32.gmra.mxu3 %vm170_vm0, %v164_v49 }
  0x64   :  { %5063 = vmatmul.msk.f32.gmra.mxu0 %vm170_vm0, %v6372_v50  ;;  %5115 = vmatmul.msk.f32.vlgmr.msrb.gmra.mxu1 %vm170_vm0, %v42_v51 }
  0x65   :  { %5094 = vmatmul.msk.f32.gmra.mxu2 %vm170_vm0, %v149_v53  ;;  %5110 = vmatmul.msk.f32.gmra.mxu3 %vm170_vm0, %v165_v54  ;;  %v976_v53 = vld [vmem:[%s9671_s0 + $0x22] sm:$0xff] }
  0x6c   :  { %5064 = vmatmul.msk.f32.gmra.mxu0 %vm170_vm0, %v6394_v55  ;;  %5116 = vmatmul.msk.f32.gmra.mxu1 %vm170_vm0, %v43_v56 }
  0x6d   :  { %5095 = vmatmul.msk.f32.gmra.mxu2 %vm170_vm0, %v150_v58  ;;  %5111 = vmatmul.msk.f32.gmra.mxu3 %vm170_vm0, %v166_v59  ;;  %v50_v59 = vld [vmem:[%s9671_s0 + $0x60] sm:$0xff] }
  0x74   :  { %5065 = vmatmul.msk.f32.gmra.mxu0 %vm170_vm0, %v6416_v60  ;;  %5117 = vmatmul.msk.f32.gmra.mxu1 %vm170_vm0, %v44_v61 }
  0x75   :  { %5096 = vmatmul.msk.f32.gmra.mxu2 %vm170_vm0, %v151_v62  ;;  %5112 = vmatmul.msk.f32.gmra.mxu3 %vm170_vm0, %v167_v63 }
  0x7c   :  { %5066 = vmatmul.msk.f32.gmra.mxu0 %vm170_vm0, %v6435_v0  ;;  %5118 = vmatmul.msk.f32.gmra.mxu1 %vm170_vm0, %v45_v1 }
  0x7d   :  { %5097 = vmatmul.msk.f32.gmra.mxu2 %vm170_vm0, %v152_v4  ;;  %5113 = vmatmul.msk.f32.gmra.mxu3 %vm170_vm0, %v168_v5 }
  0x81   :  { %v6454_v7 = vpop.f32.mrf.mxu0  ;;  %v6456_v8 = vpop.f32.mrf.mxu1 }
  0x84   :  { %5067 = vmatmul.msk.f32.gmra.mxu0 %vm170_vm0, %v6461_v11  ;;  %5119 = vmatmul.msk.f32.gmra.mxu1 %vm170_vm0, %v46_v12 }
  0x85   :  { %5114 = vmatmul.msk.f32.gmra.mxu3 %vm170_vm0, %v169_v15  ;;  %5179 = vmatmul.msk.f32.vlgmr.msrb.gmra.mxu2 %vm170_vm0, %v973_v16  ;;  %v52_v16 = vld [vmem:[%s9671_s0 + $0x78] sm:$0xff] }
  0x88   :  { %v6477_v19 = vpop.f32.mrf.mxu2  ;;  %v6479_v20 = vpop.f32.mrf.mxu3 }
  0x89   :  { %9684 = vst [vmem:[#allocation5_spill] sm:$0xff] %v6477_v19  ;;  %v6481_v23 = vpop.f32.mrf.mxu0  ;;  %v6483_v24 = vpop.f32.mrf.mxu1 }
  0x8a   :  { %9685 = vst [vmem:[#allocation6_spill] sm:$0xff] %v6479_v20  ;;  %v57_v20 = vld [vmem:[%s9671_s0 + $0xb0] sm:$0xff] }
  0x8c   :  { %5068 = vmatmul.msk.f32.gmra.mxu0 %vm170_vm0, %v6488_v27  ;;  %5120 = vmatmul.msk.f32.gmra.mxu1 %vm170_vm0, %v47_v28 }
  0x8d   :  { %5180 = vmatmul.msk.f32.gmra.mxu2 %vm170_vm0, %v974_v31  ;;  %5307 = vmatmul.msk.f32.vlgmr.msrb.gmra.mxu3 %vm170_vm0, %v44_v61 }
  0x90   :  { %v6501_v32 = vpop.f32.mrf.mxu2  ;;  %v6503_v33 = vpop.f32.mrf.mxu3 }
  0x91   :  { %9686 = vst [vmem:[#allocation7_spill] sm:$0xff] %v6501_v32  ;;  %v6505_v36 = vpop.f32.mrf.mxu0  ;;  %v6507_v37 = vpop.f32.mrf.mxu1 }
  0x92   :  { %9687 = vst [vmem:[#allocation8_spill] sm:$0xff] %v6503_v33 }
  0x94   :  { %5069 = vmatmul.msk.f32.gmra.mxu0 %vm170_vm0, %v6512_v40  ;;  %5121 = vmatmul.msk.f32.gmra.mxu1 %vm170_vm0, %v48_v41 }
  0x95   :  { %5181 = vmatmul.msk.f32.gmra.mxu2 %vm170_vm0, %v975_v44  ;;  %5308 = vmatmul.msk.f32.gmra.mxu3 %vm170_vm0, %v45_v1 }
  0x98   :  { %v6525_v45 = vpop.f32.mrf.mxu2  ;;  %v6527_v48 = vpop.f32.mrf.mxu3 }
  0x99   :  { %9688 = vst [vmem:[#allocation9_spill] sm:$0xff] %v6525_v45  ;;  %v6529_v49 = vpop.f32.mrf.mxu0  ;;  %v6531_v51 = vpop.f32.mrf.mxu1 }
  0x9a   :  { %9689 = vst [vmem:[#allocation10_spill] sm:$0xff] %v6527_v48  ;;  %v56_v48 = vld [vmem:[%s9671_s0 + $0xa8] sm:$0xff] }
  0x9c   :  { %5122 = vmatmul.msk.f32.gmra.mxu1 %vm170_vm0, %v49_v52  ;;  %5435 = vmatmul.msk.f32.vlgmr.msrb.gmra.mxu0 %vm170_vm0, %v6149_v9  ;;  %v977_v9 = vld [vmem:[%s9671_s0 + $0x32] sm:$0xff] }
  0x9d   :  { %5182 = vmatmul.msk.f32.gmra.mxu2 %vm170_vm0, %v976_v53  ;;  %5309 = vmatmul.msk.f32.gmra.mxu3 %vm170_vm0, %v46_v12  ;;  %v53_v53 = vld [vmem:[%s9671_s0 + $0x80] sm:$0xff] }
  0xa0   :  { %v6544_v54 = vpop.f32.mrf.mxu2  ;;  %v6546_v56 = vpop.f32.mrf.mxu3 }
  0xa1   :  { %9690 = vst [vmem:[#allocation11_spill] sm:$0xff] %v6544_v54  ;;  %v6548_v57 = vpop.f32.mrf.mxu0  ;;  %v6550_v58 = vpop.f32.mrf.mxu1  ;;  %v990_v54 = vld [vmem:[%s9671_s0 + $0xca] sm:$0xff] }
  0xa2   :  { %9691 = vst [vmem:[#allocation12_spill] sm:$0xff] %v6546_v56 }
  0xa4   :  { %5123 = vmatmul.msk.f32.gmra.mxu1 %vm170_vm0, %v50_v59  ;;  %5436 = vmatmul.msk.f32.gmra.mxu0 %vm170_vm0, %v6171_v13  ;;  %v978_v13 = vld [vmem:[%s9671_s0 + $0x3a] sm:$0xff] }
  0xa5   :  { %5183 = vmatmul.msk.f32.gmra.mxu2 %vm170_vm0, %v977_v9  ;;  %5310 = vmatmul.msk.f32.gmra.mxu3 %vm170_vm0, %v47_v28 }
  0xa8   :  { %v6563_v61 = vpop.f32.mrf.mxu2  ;;  %v6565_v62 = vpop.f32.mrf.mxu3 }
  0xa9   :  { %9692 = vst [vmem:[#allocation13_spill] sm:$0xff] %v6563_v61  ;;  %v6567_v63 = vpop.f32.mrf.mxu0  ;;  %v6569_v1 = vpop.f32.mrf.mxu1  ;;  %v63_v61 = vld [vmem:[%s9671_s0 + $0xf8] sm:$0xff] }
  0xaa   :  { %9693 = vst [vmem:[#allocation14_spill] sm:$0xff] %v6565_v62  ;;  %v55_v62 = vld [vmem:[%s9671_s0 + $0x98] sm:$0xff] }
  0xac   :  { %5124 = vmatmul.msk.f32.gmra.mxu1 %vm170_vm0, %v51_v3  ;;  %5437 = vmatmul.msk.f32.gmra.mxu0 %vm170_vm0, %v6193_v17  ;;  %v979_v17 = vld [vmem:[%s9671_s0 + $0x4a] sm:$0xff] }
  0xad   :  { %5184 = vmatmul.msk.f32.gmra.mxu2 %vm170_vm0, %v978_v13  ;;  %5311 = vmatmul.msk.f32.gmra.mxu3 %vm170_vm0, %v48_v41 }
  0xb0   :  { %v6582_v4 = vpop.f32.mrf.mxu2  ;;  %v6584_v5 = vpop.f32.mrf.mxu3 }
  0xb1   :  { %9694 = vst [vmem:[#allocation15_spill] sm:$0xff] %v6582_v4  ;;  %v6586_v12 = vpop.f32.mrf.mxu0  ;;  %v6588_v15 = vpop.f32.mrf.mxu1  ;;  %v62_v4 = vld [vmem:[%s9671_s0 + $0xf0] sm:$0xff] }
  0xb2   :  { %9695 = vst [vmem:[#allocation16_spill] sm:$0xff] %v6584_v5 }
  0xb4   :  { %5125 = vmatmul.msk.f32.gmra.mxu1 %vm170_vm0, %v52_v16  ;;  %5438 = vmatmul.msk.f32.gmra.mxu0 %vm170_vm0, %v6215_v21  ;;  %v980_v21 = vld [vmem:[%s9671_s0 + $0x52] sm:$0xff] }
  0xb5   :  { %5185 = vmatmul.msk.f32.gmra.mxu2 %vm170_vm0, %v979_v17  ;;  %5312 = vmatmul.msk.f32.gmra.mxu3 %vm170_vm0, %v49_v52 }
  0xb8   :  { %v6601_v28 = vpop.f32.mrf.mxu2  ;;  %v6603_v31 = vpop.f32.mrf.mxu3 }
  0xb9   :  { %9696 = vst [vmem:[#allocation17_spill] sm:$0xff] %v6601_v28  ;;  %v6605_v41 = vpop.f32.mrf.mxu0  ;;  %v6607_v44 = vpop.f32.mrf.mxu1  ;;  %v987_v28 = vld [vmem:[%s9671_s0 + $0xaa] sm:$0xff] }
  0xba   :  { %9697 = vst [vmem:[#allocation18_spill] sm:$0xff] %v6603_v31  ;;  %v54_v31 = vld [vmem:[%s9671_s0 + $0x90] sm:$0xff] }
  0xbc   :  { %5126 = vmatmul.msk.f32.gmra.mxu1 %vm170_vm0, %v53_v53  ;;  %5439 = vmatmul.msk.f32.gmra.mxu0 %vm170_vm0, %v6237_v25  ;;  %v981_v25 = vld [vmem:[%s9671_s0 + $0x62] sm:$0xff] }
  0xbd   :  { %5186 = vmatmul.msk.f32.gmra.mxu2 %vm170_vm0, %v980_v21  ;;  %5313 = vmatmul.msk.f32.gmra.mxu3 %vm170_vm0, %v50_v59 }
  0xc0   :  { %v6620_v52 = vpop.f32.mrf.mxu2  ;;  %v6622_v9 = vpop.f32.mrf.mxu3 }
  0xc1   :  { %9698 = vst [vmem:[#allocation19_spill] sm:$0xff] %v6620_v52  ;;  %v6624_v13 = vpop.f32.mrf.mxu0  ;;  %v6626_v17 = vpop.f32.mrf.mxu1  ;;  %v986_v52 = vld [vmem:[%s9671_s0 + $0x9a] sm:$0xff] }
  0xc2   :  { %9699 = vst [vmem:[#allocation20_spill] sm:$0xff] %v6622_v9 }
  0xc4   :  { %5127 = vmatmul.msk.f32.gmra.mxu1 %vm170_vm0, %v54_v31  ;;  %5440 = vmatmul.msk.f32.gmra.mxu0 %vm170_vm0, %v6259_v29  ;;  %v982_v29 = vld [vmem:[%s9671_s0 + $0x6a] sm:$0xff] }
  0xc5   :  { %5187 = vmatmul.msk.f32.gmra.mxu2 %vm170_vm0, %v981_v25  ;;  %5314 = vmatmul.msk.f32.gmra.mxu3 %vm170_vm0, %v51_v3 }
  0xc8   :  { %v6639_v59 = vpop.f32.mrf.mxu2  ;;  %v6641_v21 = vpop.f32.mrf.mxu3 }
  0xc9   :  { %9700 = vst [vmem:[#allocation21_spill] sm:$0xff] %v6639_v59  ;;  %v6643_v9 = vpop.f32.mrf.mxu0  ;;  %v6645_v5 = vpop.f32.mrf.mxu1  ;;  %v985_v59 = vld [vmem:[%s9671_s0 + $0x92] sm:$0xff] }
  0xca   :  { %9701 = vst [vmem:[#allocation22_spill] sm:$0xff] %v6641_v21 }
  0xcc   :  { %5128 = vmatmul.msk.f32.gmra.mxu1 %vm170_vm0, %v55_v62  ;;  %5441 = vmatmul.msk.f32.gmra.mxu0 %vm170_vm0, %v6284_v34  ;;  %v983_v34 = vld [vmem:[%s9671_s0 + $0x7a] sm:$0xff] }
  0xcd   :  { %5188 = vmatmul.msk.f32.gmra.mxu2 %vm170_vm0, %v982_v29  ;;  %5315 = vmatmul.msk.f32.gmra.mxu3 %vm170_vm0, %v52_v16 }
  0xd0   :  { %v6658_v3 = vpop.f32.mrf.mxu2  ;;  %v6660_v25 = vpop.f32.mrf.mxu3 }
  0xd1   :  { %9702 = vst [vmem:[#allocation23_spill] sm:$0xff] %v6658_v3  ;;  %v6662_v21 = vpop.f32.mrf.mxu0  ;;  %v6664_v56 = vpop.f32.mrf.mxu1  ;;  %v58_v3 = vld [vmem:[%s9671_s0 + $0xc0] sm:$0xff] }
  0xd2   :  { %9703 = vst [vmem:[#allocation24_spill] sm:$0xff] %v6660_v25 }
  0xd4   :  { %5129 = vmatmul.msk.f32.gmra.mxu1 %vm170_vm0, %v56_v48  ;;  %5442 = vmatmul.msk.f32.gmra.mxu0 %vm170_vm0, %v6306_v38  ;;  %v984_v38 = vld [vmem:[%s9671_s0 + $0x82] sm:$0xff] }
  0xd5   :  { %5189 = vmatmul.msk.f32.gmra.mxu2 %vm170_vm0, %v983_v34  ;;  %5316 = vmatmul.msk.f32.gmra.mxu3 %vm170_vm0, %v53_v53 }
  0xd8   :  { %v6677_v16 = vpop.f32.mrf.mxu2  ;;  %v6679_v29 = vpop.f32.mrf.mxu3 }
  0xd9   :  { %9704 = vst [vmem:[#allocation25_spill] sm:$0xff] %v6677_v16  ;;  %v6681_v25 = vpop.f32.mrf.mxu0  ;;  %v6683_v33 = vpop.f32.mrf.mxu1 }
  0xda   :  { %9705 = vst [vmem:[#allocation26_spill] sm:$0xff] %v6679_v29 }
  0xdb   :  { %9706 = vst [vmem:[#allocation27_spill] sm:$0xff] %v6683_v33  ;;  %v64_v33 = vld [vmem:[%s9671_s0 + $0x108] sm:$0xff] }
  0xdc   :  { %5130 = vmatmul.msk.f32.gmra.mxu1 %vm170_vm0, %v57_v20  ;;  %5443 = vmatmul.msk.f32.gmra.mxu0 %vm170_vm0, %v6328_v42 }
  0xdd   :  { %5190 = vmatmul.msk.f32.gmra.mxu2 %vm170_vm0, %v984_v38  ;;  %5317 = vmatmul.msk.f32.gmra.mxu3 %vm170_vm0, %v54_v31 }
  0xe0   :  { %v6696_v53 = vpop.f32.mrf.mxu2  ;;  %v6698_v34 = vpop.f32.mrf.mxu3 }
  0xe1   :  { %9707 = vst [vmem:[#allocation28_spill] sm:$0xff] %v6696_v53  ;;  %v6700_v29 = vpop.f32.mrf.mxu0  ;;  %v781_v16 = vpop.f32.mrf.mxu1  ;;  %v59_v53 = vld [vmem:[%s9671_s0 + $0xc8] sm:$0xff] }
  0xe2   :  { %9708 = vst [vmem:[#allocation29_spill] sm:$0xff] %v6698_v34 }
  0xe4   :  { %5131 = vmatmul.msk.f32.gmra.mxu1 %vm170_vm0, %v58_v3  ;;  %5444 = vmatmul.msk.f32.gmra.mxu0 %vm170_vm0, %v6350_v46 }
  0xe5   :  { %5191 = vmatmul.msk.f32.gmra.mxu2 %vm170_vm0, %v985_v59  ;;  %5318 = vmatmul.msk.f32.gmra.mxu3 %vm170_vm0, %v55_v62 }
  0xe8   :  { %v6713_v42 = vpop.f32.mrf.mxu2  ;;  %v6715_v31 = vpop.f32.mrf.mxu3 }
  0xe9   :  { %9709 = vst [vmem:[#allocation30_spill] sm:$0xff] %v6713_v42  ;;  %v6717_v38 = vpop.f32.mrf.mxu0  ;;  %v784_v34 = vpop.f32.mrf.mxu1  ;;  %v60_v42 = vld [vmem:[%s9671_s0 + $0xd8] sm:$0xff] }
  0xea   :  { %9710 = vst [vmem:[#allocation31_spill] sm:$0xff] %v6715_v31 }
  0xec   :  { %5132 = vmatmul.msk.f32.gmra.mxu1 %vm170_vm0, %v59_v53  ;;  %5445 = vmatmul.msk.f32.gmra.mxu0 %vm170_vm0, %v6372_v50 }
  0xed   :  { %5192 = vmatmul.msk.f32.gmra.mxu2 %vm170_vm0, %v986_v52  ;;  %5319 = vmatmul.msk.f32.gmra.mxu3 %vm170_vm0, %v56_v48 }
  0xf0   :  { %v6730_v46 = vpop.f32.mrf.mxu2  ;;  %v6732_v62 = vpop.f32.mrf.mxu3 }
  0xf1   :  { %9711 = vst [vmem:[#allocation32_spill] sm:$0xff] %v6730_v46  ;;  %v6734_v59 = vpop.f32.mrf.mxu0  ;;  %v787_v31 = vpop.f32.mrf.mxu1  ;;  %v61_v46 = vld [vmem:[%s9671_s0 + $0xe0] sm:$0xff] }
  0xf2   :  { %9712 = vst [vmem:[#allocation33_spill] sm:$0xff] %v6732_v62 }
  0xf4   :  { %5133 = vmatmul.msk.f32.gmra.mxu1 %vm170_vm0, %v60_v42  ;;  %5446 = vmatmul.msk.f32.gmra.mxu0 %vm170_vm0, %v6394_v55  ;;  %v988_v55 = vld [vmem:[%s9671_s0 + $0xb2] sm:$0xff] }
  0xf5   :  { %5193 = vmatmul.msk.f32.gmra.mxu2 %vm170_vm0, %v987_v28  ;;  %5320 = vmatmul.msk.f32.gmra.mxu3 %vm170_vm0, %v57_v20 }
  0xf8   :  { %v6747_v50 = vpop.f32.mrf.mxu2  ;;  %v6749_v48 = vpop.f32.mrf.mxu3 }
  0xf9   :  { %9713 = vst [vmem:[#allocation34_spill] sm:$0xff] %v6747_v50  ;;  %v6751_v52 = vpop.f32.mrf.mxu0  ;;  %v6753_v62 = vpop.f32.mrf.mxu1 }
  0xfa   :  { %9714 = vst [vmem:[#allocation35_spill] sm:$0xff] %v6749_v48 }
  0xfc   :  { %5134 = vmatmul.msk.f32.gmra.mxu1 %vm170_vm0, %v61_v46  ;;  %5447 = vmatmul.msk.f32.gmra.mxu0 %vm170_vm0, %v6416_v60  ;;  %v989_v60 = vld [vmem:[%s9671_s0 + $0xc2] sm:$0xff] }
  0xfd   :  { %5194 = vmatmul.msk.f32.gmra.mxu2 %vm170_vm0, %v988_v55  ;;  %5321 = vmatmul.msk.f32.gmra.mxu3 %vm170_vm0, %v58_v3 }
 0x100   :  { %v6766_v20 = vpop.f32.mrf.mxu2  ;;  %v6768_v28 = vpop.f32.mrf.mxu3 }
 0x101   :  { %9715 = vst [vmem:[#allocation36_spill] sm:$0xff] %v6766_v20  ;;  %v6770_v48 = vpop.f32.mrf.mxu0  ;;  %v6772_v50 = vpop.f32.mrf.mxu1 }
 0x102   :  { %9716 = vst [vmem:[#allocation37_spill] sm:$0xff] %v6768_v28 }
 0x104   :  { %5135 = vmatmul.msk.f32.gmra.mxu1 %vm170_vm0, %v62_v4  ;;  %5448 = vmatmul.msk.f32.gmra.mxu0 %vm170_vm0, %v6435_v0  ;;  %v782_v0 = vadd.f32 %v781_v16, %v6454_v7  ;;  %v991_v7 = vld [vmem:[%s9671_s0 + $0xda] sm:$0xff] }
 0x105   :  { %5195 = vmatmul.msk.f32.gmra.mxu2 %vm170_vm0, %v989_v60  ;;  %5322 = vmatmul.msk.f32.gmra.mxu3 %vm170_vm0, %v59_v53 }
 0x108   :  { %v6785_v3 = vpop.f32.mrf.mxu3  ;;  %v1246_v55 = vpop.f32.mrf.mxu2 }
 0x109   :  { %9717 = vst [vmem:[#allocation38_spill] sm:$0xff] %v6785_v3  ;;  %v6787_v28 = vpop.f32.mrf.mxu0  ;;  %v6789_v20 = vpop.f32.mrf.mxu1  ;;  %v1438_v53 = vadd.f32 %v1246_v55, %v782_v0 }
 0x10c   :  { %5136 = vmatmul.msk.f32.gmra.mxu1 %vm170_vm0, %v63_v61  ;;  %5449 = vmatmul.msk.f32.gmra.mxu0 %vm170_vm0, %v6461_v11  ;;  %v785_v11 = vadd.f32 %v784_v34, %v6481_v23  ;;  %v992_v23 = vld [vmem:[%s9671_s0 + $0xe2] sm:$0xff] }
 0x10d   :  { %5196 = vmatmul.msk.f32.gmra.mxu2 %vm170_vm0, %v990_v54  ;;  %5323 = vmatmul.msk.f32.gmra.mxu3 %vm170_vm0, %v60_v42 }
 0x110   :  { %v1249_v60 = vpop.f32.mrf.mxu2  ;;  %v1776_v3 = vpop.f32.mrf.mxu3 }
 0x111   :  { %v6803_v45 = vadd.f32 %v1776_v3, %v1438_v53  ;;  %v6805_v32 = vpop.f32.mrf.mxu0  ;;  %v6807_v19 = vpop.f32.mrf.mxu1  ;;  %v1439_v54 = vadd.f32 %v1249_v60, %v785_v11  ;;  %v65_v53 = vld [vmem:[%s9671_s0 + $0x110] sm:$0xff] }
 0x114   :  { %5137 = vmatmul.msk.f32.gmra.mxu1 %vm170_vm0, %v64_v33  ;;  %5450 = vmatmul.msk.f32.gmra.mxu0 %vm170_vm0, %v6488_v27  ;;  %v788_v27 = vadd.f32 %v787_v31, %v6505_v36  ;;  %v993_v36 = vld [vmem:[%s9671_s0 + $0xf2] sm:$0xff] }
 0x115   :  { %5197 = vmatmul.msk.f32.gmra.mxu2 %vm170_vm0, %v991_v7  ;;  %5324 = vmatmul.msk.f32.gmra.mxu3 %vm170_vm0, %v61_v46 }
 0x118   :  { %v1252_v16 = vpop.f32.mrf.mxu2  ;;  %v1779_v42 = vpop.f32.mrf.mxu3 }
 0x119   :  { %v6821_v3 = vadd.f32 %v1779_v42, %v1439_v54  ;;  %v6823_v55 = vpop.f32.mrf.mxu1  ;;  %v6825_v0 = vpop.f32.mrf.mxu0  ;;  %v1440_v34 = vadd.f32 %v1252_v16, %v788_v27  ;;  %v66_v42 = vld [vmem:[%s9671_s0 + $0x120] sm:$0xff] }
 0x11c   :  { %5138 = vmatmul.msk.f32.gmra.mxu1 %vm170_vm0, %v65_v53  ;;  %5451 = vmatmul.msk.f32.gmra.mxu0 %vm170_vm0, %v6512_v40  ;;  %v791_v40 = vadd.f32 %v6753_v62, %v6529_v49  ;;  %v994_v49 = vld [vmem:[%s9671_s0 + $0xfa] sm:$0xff] }
 0x11d   :  { %5198 = vmatmul.msk.f32.gmra.mxu2 %vm170_vm0, %v992_v23  ;;  %5325 = vmatmul.msk.f32.gmra.mxu3 %vm170_vm0, %v62_v4 }
 0x120   :  { %v1255_v46 = vpop.f32.mrf.mxu2  ;;  %v1782_v60 = vpop.f32.mrf.mxu3 }
 0x121   :  { %v6839_v7 = vadd.f32 %v1782_v60, %v1440_v34  ;;  %v6841_v11 = vpop.f32.mrf.mxu1  ;;  %v6843_v54 = vpop.f32.mrf.mxu0  ;;  %v1441_v4 = vadd.f32 %v1255_v46, %v791_v40 }
 0x124   :  { %5139 = vmatmul.msk.f32.gmra.mxu1 %vm170_vm0, %v66_v42  ;;  %5452 = vmatmul.msk.f32.gmra.mxu0 %vm170_vm0, %v6114_v2  ;;  %v67_v2 = vld [vmem:[%s9671_s0 + $0x128] sm:$0xff] }
 0x125   :  { %5199 = vmatmul.msk.f32.gmra.mxu2 %vm170_vm0, %v993_v36  ;;  %5326 = vmatmul.msk.f32.gmra.mxu3 %vm170_vm0, %v63_v61  ;;  %v794_v61 = vadd.f32 %v6772_v50, %v6548_v57  ;;  %v995_v57 = vld [vmem:[%s9671_s0 + $0x10a] sm:$0xff] }
 0x128   :  { %v1258_v31 = vpop.f32.mrf.mxu2  ;;  %v1785_v16 = vpop.f32.mrf.mxu3 }
 0x129   :  { %v6858_v23 = vadd.f32 %v1785_v16, %v1441_v4  ;;  %v6860_v27 = vpop.f32.mrf.mxu1  ;;  %v6862_v34 = vpop.f32.mrf.mxu0  ;;  %v1442_v62 = vadd.f32 %v1258_v31, %v794_v61 }
 0x12c   :  { %5140 = vmatmul.msk.f32.gmra.mxu1 %vm170_vm0, %v67_v2  ;;  %5453 = vmatmul.msk.f32.gmra.mxu0 %vm170_vm0, %v6133_v6  ;;  %v68_v6 = vld [vmem:[%s9671_s0 + $0x138] sm:$0xff] }
 0x12d   :  { %5200 = vmatmul.msk.f32.gmra.mxu2 %vm170_vm0, %v994_v49  ;;  %5327 = vmatmul.msk.f32.gmra.mxu3 %vm170_vm0, %v64_v33  ;;  %v797_v33 = vadd.f32 %v6789_v20, %v6567_v63  ;;  %v996_v63 = vld [vmem:[%s9671_s0 + $0x112] sm:$0xff]  ;;  %v800_v20 = vadd.f32 %v6807_v19, %v6586_v12  ;;  %v997_v19 = vld [vmem:[%s9671_s0 + $0x122] sm:$0xff]  ;;  %v803_v12 = vadd.f32 %v6823_v55, %v6605_v41  ;;  %v998_v41 = vld [vmem:[%s9671_s0 + $0x12a] sm:$0xff] }
 0x12e   :  { %v806_v55 = vadd.f32 %v6841_v11, %v6624_v13  ;;  %v999_v13 = vld [vmem:[%s9671_s0 + $0x13a] sm:$0xff]  ;;  %v809_v11 = vadd.f32 %v6860_v27, %v6643_v9  ;;  %v1000_v9 = vld [vmem:[%s9671_s0 + $0x142] sm:$0xff] }
 0x130   :  { %v1261_v46 = vpop.f32.mrf.mxu2  ;;  %v1788_v60 = vpop.f32.mrf.mxu3 }
 0x131   :  { %v6877_v36 = vadd.f32 %v1788_v60, %v1442_v62  ;;  %v6879_v40 = vpop.f32.mrf.mxu1  ;;  %v6881_v4 = vpop.f32.mrf.mxu0  ;;  %v1443_v50 = vadd.f32 %v1261_v46, %v797_v33 }
 0x132   :  { %v812_v27 = vadd.f32 %v6879_v40, %v6662_v21  ;;  %v1001_v21 = vld [vmem:[%s9671_s0 + $0x152] sm:$0xff] }
 0x134   :  { %5141 = vmatmul.msk.f32.gmra.mxu1 %vm170_vm0, %v68_v6  ;;  %5454 = vmatmul.msk.f32.gmra.mxu0 %vm170_vm0, %v6154_v10  ;;  %v69_v10 = vld [vmem:[%s9671_s0 + $0x140] sm:$0xff] }
 0x135   :  { %5201 = vmatmul.msk.f32.gmra.mxu2 %vm170_vm0, %v995_v57  ;;  %5328 = vmatmul.msk.f32.gmra.mxu3 %vm170_vm0, %v65_v53 }
 0x138   :  { %v1264_v31 = vpop.f32.mrf.mxu2  ;;  %v1791_v16 = vpop.f32.mrf.mxu3 }
 0x139   :  { %v6896_v49 = vadd.f32 %v1791_v16, %v1443_v50  ;;  %v6898_v61 = vpop.f32.mrf.mxu1  ;;  %v6900_v62 = vpop.f32.mrf.mxu0  ;;  %v1444_v53 = vadd.f32 %v1264_v31, %v800_v20 }
 0x13a   :  { %v815_v40 = vadd.f32 %v6898_v61, %v6681_v25  ;;  %v1002_v25 = vld [vmem:[%s9671_s0 + $0x15a] sm:$0xff] }
 0x13c   :  { %5142 = vmatmul.msk.f32.gmra.mxu1 %vm170_vm0, %v69_v10  ;;  %5455 = vmatmul.msk.f32.gmra.mxu0 %vm170_vm0, %v6176_v14  ;;  %v70_v14 = vld [vmem:[%s9671_s0 + $0x150] sm:$0xff] }
 0x13d   :  { %5202 = vmatmul.msk.f32.gmra.mxu2 %vm170_vm0, %v996_v63  ;;  %5329 = vmatmul.msk.f32.gmra.mxu3 %vm170_vm0, %v66_v42 }
 0x140   :  { %v1267_v46 = vpop.f32.mrf.mxu2  ;;  %v1794_v60 = vpop.f32.mrf.mxu3 }
 0x141   :  { %v6915_v57 = vadd.f32 %v1794_v60, %v1444_v53  ;;  %v6917_v33 = vpop.f32.mrf.mxu1  ;;  %v6919_v50 = vpop.f32.mrf.mxu0  ;;  %v1445_v42 = vadd.f32 %v1267_v46, %v803_v12 }
 0x142   :  { %v818_v61 = vadd.f32 %v6917_v33, %v6700_v29  ;;  %v1003_v29 = vld [vmem:[%s9671_s0 + $0x16a] sm:$0xff] }
 0x144   :  { %5143 = vmatmul.msk.f32.gmra.mxu1 %vm170_vm0, %v70_v14  ;;  %5456 = vmatmul.msk.f32.gmra.mxu0 %vm170_vm0, %v6198_v18  ;;  %v71_v18 = vld [vmem:[%s9671_s0 + $0x158] sm:$0xff] }
 0x145   :  { %5203 = vmatmul.msk.f32.gmra.mxu2 %vm170_vm0, %v997_v19  ;;  %5330 = vmatmul.msk.f32.gmra.mxu3 %vm170_vm0, %v67_v2 }
 0x148   :  { %v1270_v31 = vpop.f32.mrf.mxu2  ;;  %v1797_v16 = vpop.f32.mrf.mxu3 }
 0x149   :  { %v6934_v63 = vadd.f32 %v1797_v16, %v1445_v42  ;;  %v6936_v20 = vpop.f32.mrf.mxu1  ;;  %v6938_v53 = vpop.f32.mrf.mxu0  ;;  %v1446_v2 = vadd.f32 %v1270_v31, %v806_v55 }
 0x14a   :  { %v821_v33 = vadd.f32 %v6936_v20, %v6717_v38  ;;  %v1004_v38 = vld [vmem:[%s9671_s0 + $0x172] sm:$0xff]  ;;  %v5273_v20 = vld [vmem:[%s9671_s0 + $0x180] sm:$0xff] }
 0x14c   :  { %5144 = vmatmul.msk.f32.gmra.mxu1 %vm170_vm0, %v71_v18  ;;  %5457 = vmatmul.msk.f32.gmra.mxu0 %vm170_vm0, %v6220_v22  ;;  %v72_v22 = vld [vmem:[%s9671_s0 + $0x168] sm:$0xff] }
 0x14d   :  { %5204 = vmatmul.msk.f32.gmra.mxu2 %vm170_vm0, %v998_v41  ;;  %5331 = vmatmul.msk.f32.gmra.mxu3 %vm170_vm0, %v68_v6 }
 0x150   :  { %v1273_v46 = vpop.f32.mrf.mxu2  ;;  %v1800_v60 = vpop.f32.mrf.mxu3 }
 0x151   :  { %v6953_v19 = vadd.f32 %v1800_v60, %v1446_v2  ;;  %v6955_v12 = vpop.f32.mrf.mxu1  ;;  %v6957_v42 = vpop.f32.mrf.mxu0  ;;  %v1447_v6 = vadd.f32 %v1273_v46, %v809_v11 }
 0x154   :  { %5145 = vmatmul.msk.f32.gmra.mxu1 %vm170_vm0, %v72_v22  ;;  %5458 = vmatmul.msk.f32.gmra.mxu0 %vm170_vm0, %v6242_v26  ;;  %v73_v26 = vld [vmem:[%s9671_s0 + $0x170] sm:$0xff] }
 0x155   :  { %5205 = vmatmul.msk.f32.gmra.mxu2 %vm170_vm0, %v999_v13  ;;  %5332 = vmatmul.msk.f32.gmra.mxu3 %vm170_vm0, %v69_v10 }
 0x158   :  { %v1276_v31 = vpop.f32.mrf.mxu2  ;;  %v1803_v16 = vpop.f32.mrf.mxu3 }
 0x159   :  { %v6972_v41 = vadd.f32 %v1803_v16, %v1447_v6  ;;  %v6974_v55 = vpop.f32.mrf.mxu1  ;;  %v6976_v2 = vpop.f32.mrf.mxu0  ;;  %v1448_v10 = vadd.f32 %v1276_v31, %v812_v27 }
 0x15b   :  { %9718 = vst [vmem:[#allocation39_spill] sm:$0xff] %v6972_v41 }
 0x15c   :  { %5146 = vmatmul.msk.f32.gmra.mxu1 %vm170_vm0, %v73_v26  ;;  %5459 = vmatmul.msk.f32.gmra.mxu0 %vm170_vm0, %v6264_v30  ;;  %v74_v30 = vld [vmem:[%s9671_s0 + $0x1b0] sm:$0xff] }
 0x15d   :  { %5206 = vmatmul.msk.f32.gmra.mxu2 %vm170_vm0, %v1000_v9  ;;  %5333 = vmatmul.msk.f32.gmra.mxu3 %vm170_vm0, %v70_v14 }
 0x160   :  { %v1279_v46 = vpop.f32.mrf.mxu2  ;;  %v1806_v60 = vpop.f32.mrf.mxu3 }
 0x161   :  { %v6991_v13 = vadd.f32 %v1806_v60, %v1448_v10  ;;  %v6993_v11 = vpop.f32.mrf.mxu1  ;;  %v6995_v6 = vpop.f32.mrf.mxu0  ;;  %v1449_v14 = vadd.f32 %v1279_v46, %v815_v40 }
 0x162   :  { %9719 = vst [vmem:[#allocation40_spill] sm:$0xff] %v6995_v6 }
 0x164   :  { %5147 = vmatmul.msk.f32.gmra.mxu1 %vm170_vm0, %v74_v30  ;;  %5460 = vmatmul.msk.f32.gmra.mxu0 %vm170_vm0, %v6289_v35  ;;  %v75_v35 = vld [vmem:[%s9671_s0 + $0x1b8] sm:$0xff] }
 0x165   :  { %5207 = vmatmul.msk.f32.gmra.mxu2 %vm170_vm0, %v1001_v21  ;;  %5334 = vmatmul.msk.f32.gmra.mxu3 %vm170_vm0, %v71_v18 }
 0x168   :  { %v1282_v31 = vpop.f32.mrf.mxu2  ;;  %v1809_v16 = vpop.f32.mrf.mxu3 }
 0x169   :  { %v7010_v9 = vadd.f32 %v1809_v16, %v1449_v14  ;;  %v7012_v27 = vpop.f32.mrf.mxu1  ;;  %v7014_v10 = vpop.f32.mrf.mxu0  ;;  %v1450_v18 = vadd.f32 %v1282_v31, %v818_v61 }
 0x16a   :  { %9720 = vst [vmem:[#allocation41_spill] sm:$0xff] %v7014_v10 }
 0x16c   :  { %5148 = vmatmul.msk.f32.gmra.mxu1 %vm170_vm0, %v75_v35  ;;  %5461 = vmatmul.msk.f32.gmra.mxu0 %vm170_vm0, %v6311_v39  ;;  %v76_v39 = vld [vmem:[%s9671_s0 + $0x1c8] sm:$0xff] }
 0x16d   :  { %5208 = vmatmul.msk.f32.gmra.mxu2 %vm170_vm0, %v1002_v25  ;;  %5335 = vmatmul.msk.f32.gmra.mxu3 %vm170_vm0, %v72_v22 }
 0x170   :  { %v1285_v46 = vpop.f32.mrf.mxu2  ;;  %v1812_v60 = vpop.f32.mrf.mxu3 }
 0x171   :  { %v7029_v30 = vadd.f32 %v1812_v60, %v1450_v18  ;;  %v7031_v21 = vpop.f32.mrf.mxu1  ;;  %v7033_v40 = vpop.f32.mrf.mxu0  ;;  %v1451_v22 = vadd.f32 %v1285_v46, %v821_v33 }
 0x174   :  { %5149 = vmatmul.msk.f32.gmra.mxu1 %vm170_vm0, %v76_v39  ;;  %5462 = vmatmul.msk.f32.gmra.mxu0 %vm170_vm0, %v6333_v43  ;;  %v77_v43 = vld [vmem:[%s9671_s0 + $0x1d0] sm:$0xff] }
 0x175   :  { %5209 = vmatmul.msk.f32.gmra.mxu2 %vm170_vm0, %v1003_v29  ;;  %5336 = vmatmul.msk.f32.gmra.mxu3 %vm170_vm0, %v73_v26  ;;  %v824_v26 = vadd.f32 %v6955_v12, %v6734_v59  ;;  %v5400_v59 = vld [vmem:[%s9671_s0 + $0x171] sm:$0xff] }
 0x176   :  { %v1005_v12 = vld [vmem:[%s9671_s0 + $0x1b2] sm:$0xff] }
 0x178   :  { %v1288_v14 = vpop.f32.mrf.mxu2  ;;  %v1815_v31 = vpop.f32.mrf.mxu3 }
 0x179   :  { %v7048_v16 = vadd.f32 %v1815_v31, %v1451_v22  ;;  %v7050_v35 = vpop.f32.mrf.mxu1  ;;  %v7052_v25 = vpop.f32.mrf.mxu0  ;;  %v1452_v61 = vadd.f32 %v1288_v14, %v824_v26  ;;  %v5274_v22 = vld [vmem:[%s9671_s0 + $0x188] sm:$0xff]  ;;  %v827_v14 = vadd.f32 %v6974_v55, %v6751_v52  ;;  %v1006_v55 = vld [vmem:[%s9671_s0 + $0x1ba] sm:$0xff] }
 0x17a   :  { %v5401_v52 = vld [vmem:[%s9671_s0 + $0x181] sm:$0xff] }
 0x17c   :  { %5150 = vmatmul.msk.f32.gmra.mxu1 %vm170_vm0, %v77_v43  ;;  %5463 = vmatmul.msk.f32.gmra.mxu0 %vm170_vm0, %v6355_v47  ;;  %v78_v47 = vld [vmem:[%s9671_s0 + $0x1e0] sm:$0xff] }
 0x17d   :  { %5210 = vmatmul.msk.f32.gmra.mxu2 %vm170_vm0, %v1004_v38  ;;  %5337 = vmatmul.msk.f32.gmra.mxu3 %vm170_vm0, %v5273_v20 }
 0x180   :  { %v1291_v18 = vpop.f32.mrf.mxu2  ;;  %v1818_v46 = vpop.f32.mrf.mxu3 }
 0x181   :  { %v7070_v60 = vadd.f32 %v1818_v46, %v1452_v61  ;;  %v7072_v29 = vpop.f32.mrf.mxu1  ;;  %v7074_v33 = vpop.f32.mrf.mxu0  ;;  %v1453_v31 = vadd.f32 %v1291_v18, %v827_v14  ;;  %v830_v18 = vadd.f32 %v6993_v11, %v6770_v48  ;;  %v5402_v48 = vld [vmem:[%s9671_s0 + $0x189] sm:$0xff] }
 0x182   :  { %v1007_v11 = vld [vmem:[%s9671_s0 + $0x1ca] sm:$0xff] }
 0x184   :  { %5151 = vmatmul.msk.f32.gmra.mxu1 %vm170_vm0, %v78_v47  ;;  %5464 = vmatmul.msk.f32.gmra.mxu0 %vm170_vm0, %v5400_v59  ;;  %v79_v59 = vld [vmem:[%s9671_s0 + $0x1e8] sm:$0xff] }
 0x185   :  { %5211 = vmatmul.msk.f32.gmra.mxu2 %vm170_vm0, %v1005_v12  ;;  %5338 = vmatmul.msk.f32.gmra.mxu3 %vm170_vm0, %v5274_v22 }
 0x188   :  { %v1294_v38 = vpop.f32.mrf.mxu2  ;;  %v1821_v20 = vpop.f32.mrf.mxu3 }
 0x189   :  { %v7094_v26 = vadd.f32 %v1821_v20, %v1453_v31  ;;  %v7096_v61 = vpop.f32.mrf.mxu1  ;;  %v7098_v46 = vpop.f32.mrf.mxu0  ;;  %v1454_v12 = vadd.f32 %v1294_v38, %v830_v18 }
 0x18c   :  { %5152 = vmatmul.msk.f32.gmra.mxu1 %vm170_vm0, %v79_v59  ;;  %5465 = vmatmul.msk.f32.gmra.mxu0 %vm170_vm0, %v5401_v52  ;;  %v80_v52 = vld [vmem:[%s9671_s0 + $0x1f8] sm:$0xff] }
 0x18d   :  { %5212 = vmatmul.msk.f32.gmra.mxu2 %vm170_vm0, %v1006_v55  ;;  %5339 = vmatmul.msk.f32.gmra.mxu3 %vm170_vm0, %v76_v39  ;;  %v833_v39 = vadd.f32 %v7012_v27, %v6787_v28  ;;  %v5403_v28 = vld [vmem:[%s9671_s0 + $0x1c9] sm:$0xff]  ;;  %v1008_v27 = vld [vmem:[%s9671_s0 + $0x1d2] sm:$0xff] }
 0x190   :  { %v1297_v22 = vpop.f32.mrf.mxu2  ;;  %v1824_v14 = vpop.f32.mrf.mxu3 }
 0x191   :  { %v7115_v31 = vadd.f32 %v1824_v14, %v1454_v12  ;;  %v7117_v20 = vpop.f32.mrf.mxu1  ;;  %v7119_v6 = vpop.f32.mrf.mxu0  ;;  %v1455_v38 = vadd.f32 %v1297_v22, %v833_v39 }
 0x194   :  { %5153 = vmatmul.msk.f32.gmra.mxu1 %vm170_vm0, %v80_v52  ;;  %5466 = vmatmul.msk.f32.gmra.mxu0 %vm170_vm0, %v5402_v48  ;;  %v81_v48 = vld [vmem:[%s9671_s0 + $0x200] sm:$0xff] }
 0x195   :  { %5213 = vmatmul.msk.f32.gmra.mxu2 %vm170_vm0, %v1007_v11  ;;  %5340 = vmatmul.msk.f32.gmra.mxu3 %vm170_vm0, %v77_v43  ;;  %v836_v43 = vadd.f32 %v7031_v21, %v6805_v32  ;;  %v5404_v32 = vld [vmem:[%s9671_s0 + $0x1d1] sm:$0xff]  ;;  %v1009_v21 = vld [vmem:[%s9671_s0 + $0x1e2] sm:$0xff] }
 0x198   :  { %v1300_v55 = vpop.f32.mrf.mxu2  ;;  %v1827_v18 = vpop.f32.mrf.mxu3 }
 0x199   :  { %v7136_v12 = vadd.f32 %v1827_v18, %v1455_v38  ;;  %v7138_v14 = vpop.f32.mrf.mxu1  ;;  %v7140_v41 = vpop.f32.mrf.mxu0  ;;  %v1456_v22 = vadd.f32 %v1300_v55, %v836_v43 }
 0x19c   :  { %5154 = vmatmul.msk.f32.gmra.mxu1 %vm170_vm0, %v81_v48  ;;  %5467 = vmatmul.msk.f32.gmra.mxu0 %vm170_vm0, %v5403_v28  ;;  %v82_v28 = vld [vmem:[%s9671_s0 + $0x210] sm:$0xff] }
 0x19d   :  { %5214 = vmatmul.msk.f32.gmra.mxu2 %vm170_vm0, %v1008_v27  ;;  %5341 = vmatmul.msk.f32.gmra.mxu3 %vm170_vm0, %v78_v47  ;;  %v839_v47 = vadd.f32 %v7050_v35, %v6456_v8  ;;  %v5405_v8 = vld [vmem:[%s9671_s0 + $0x1e1] sm:$0xff]  ;;  %v1010_v35 = vld [vmem:[%s9671_s0 + $0x1ea] sm:$0xff] }
 0x1a0   :  { %v1303_v11 = vpop.f32.mrf.mxu2  ;;  %v1830_v39 = vpop.f32.mrf.mxu3 }
 0x1a1   :  { %v7157_v38 = vadd.f32 %v1830_v39, %v1456_v22  ;;  %v7159_v18 = vpop.f32.mrf.mxu1  ;;  %v7161_v10 = vpop.f32.mrf.mxu0  ;;  %v1457_v55 = vadd.f32 %v1303_v11, %v839_v47 }
 0x1a3   :  { %9721 = vst [vmem:[#allocation42_spill] sm:$0xff] %v7157_v38 }
 0x1a4   :  { %5155 = vmatmul.msk.f32.gmra.mxu1 %vm170_vm0, %v82_v28  ;;  %5468 = vmatmul.msk.f32.gmra.mxu0 %vm170_vm0, %v5404_v32  ;;  %v83_v32 = vld [vmem:[%s9671_s0 + $0x218] sm:$0xff] }
 0x1a5   :  { %5215 = vmatmul.msk.f32.gmra.mxu2 %vm170_vm0, %v1009_v21  ;;  %5342 = vmatmul.msk.f32.gmra.mxu3 %vm170_vm0, %v79_v59  ;;  %v842_v59 = vadd.f32 %v7072_v29, %v6483_v24  ;;  %v5406_v24 = vld [vmem:[%s9671_s0 + $0x1e9] sm:$0xff]  ;;  %v1011_v29 = vld [vmem:[%s9671_s0 + $0x1fa] sm:$0xff] }
 0x1a8   :  { %v1306_v27 = vpop.f32.mrf.mxu2  ;;  %v1833_v43 = vpop.f32.mrf.mxu3 }
 0x1a9   :  { %v7178_v22 = vadd.f32 %v1833_v43, %v1457_v55  ;;  %v7180_v39 = vpop.f32.mrf.mxu1  ;;  %v7182_v38 = vpop.f32.mrf.mxu0  ;;  %v1458_v11 = vadd.f32 %v1306_v27, %v842_v59 }
 0x1ab   :  { %9722 = vst [vmem:[#allocation43_spill] sm:$0xff] %v7178_v22 }
 0x1ac   :  { %5156 = vmatmul.msk.f32.gmra.mxu1 %vm170_vm0, %v83_v32  ;;  %5469 = vmatmul.msk.f32.gmra.mxu0 %vm170_vm0, %v5405_v8  ;;  %v84_v8 = vld [vmem:[%s9671_s0 + $0x228] sm:$0xff] }
 0x1ad   :  { %5216 = vmatmul.msk.f32.gmra.mxu2 %vm170_vm0, %v1010_v35  ;;  %5343 = vmatmul.msk.f32.gmra.mxu3 %vm170_vm0, %v80_v52  ;;  %v845_v52 = vadd.f32 %v7096_v61, %v6507_v37  ;;  %v5407_v37 = vld [vmem:[%s9671_s0 + $0x1f9] sm:$0xff]  ;;  %v1012_v61 = vld [vmem:[%s9671_s0 + $0x202] sm:$0xff] }
 0x1b0   :  { %v1309_v21 = vpop.f32.mrf.mxu2  ;;  %v1836_v47 = vpop.f32.mrf.mxu3 }
 0x1b1   :  { %v7199_v55 = vadd.f32 %v1836_v47, %v1458_v11  ;;  %v7201_v43 = vpop.f32.mrf.mxu1  ;;  %v7203_v22 = vpop.f32.mrf.mxu0  ;;  %v1459_v27 = vadd.f32 %v1309_v21, %v845_v52 }
 0x1b3   :  { %9723 = vst [vmem:[#allocation44_spill] sm:$0xff] %v7199_v55 }
 0x1b4   :  { %5157 = vmatmul.msk.f32.gmra.mxu1 %vm170_vm0, %v84_v8  ;;  %5470 = vmatmul.msk.f32.gmra.mxu0 %vm170_vm0, %v5406_v24  ;;  %v85_v24 = vld [vmem:[%s9671_s0 + $0x230] sm:$0xff] }
 0x1b5   :  { %5217 = vmatmul.msk.f32.gmra.mxu2 %vm170_vm0, %v1011_v29  ;;  %5344 = vmatmul.msk.f32.gmra.mxu3 %vm170_vm0, %v81_v48  ;;  %v848_v48 = vadd.f32 %v7117_v20, %v6531_v51  ;;  %v5408_v51 = vld [vmem:[%s9671_s0 + $0x201] sm:$0xff]  ;;  %v1013_v20 = vld [vmem:[%s9671_s0 + $0x212] sm:$0xff] }
 0x1b8   :  { %v1312_v35 = vpop.f32.mrf.mxu2  ;;  %v1839_v59 = vpop.f32.mrf.mxu3 }
 0x1b9   :  { %v7220_v11 = vadd.f32 %v1839_v59, %v1459_v27  ;;  %v7222_v47 = vpop.f32.mrf.mxu1  ;;  %v7224_v55 = vpop.f32.mrf.mxu0  ;;  %v1460_v21 = vadd.f32 %v1312_v35, %v848_v48 }
 0x1ba   :  { %9725 = vst [vmem:[#allocation46_spill] sm:$0xff] %v7224_v55  ;;  %v8565_v55 = vld [vmem:[%s9671_s0 + $0x1fa] sm:$0xff] }
 0x1bb   :  { %9724 = vst [vmem:[#allocation45_spill] sm:$0xff] %v7220_v11 }
 0x1bc   :  { %5158 = vmatmul.msk.f32.gmra.mxu1 %vm170_vm0, %v85_v24  ;;  %5471 = vmatmul.msk.f32.gmra.mxu0 %vm170_vm0, %v5407_v37  ;;  %v86_v37 = vld [vmem:[%s9671_s0 + $0x240] sm:$0xff] }
 0x1bd   :  { %5218 = vmatmul.msk.f32.gmra.mxu2 %vm170_vm0, %v1012_v61  ;;  %5345 = vmatmul.msk.f32.gmra.mxu3 %vm170_vm0, %v82_v28  ;;  %v851_v28 = vadd.f32 %v7138_v14, %v6550_v58  ;;  %v5409_v58 = vld [vmem:[%s9671_s0 + $0x211] sm:$0xff]  ;;  %v1014_v14 = vld [vmem:[%s9671_s0 + $0x21a] sm:$0xff] }
 0x1c0   :  { %v1315_v29 = vpop.f32.mrf.mxu2  ;;  %v1842_v52 = vpop.f32.mrf.mxu3 }
 0x1c1   :  { %v7241_v27 = vadd.f32 %v1842_v52, %v1460_v21  ;;  %v7243_v59 = vpop.f32.mrf.mxu1  ;;  %v7245_v11 = vpop.f32.mrf.mxu0  ;;  %v1461_v35 = vadd.f32 %v1315_v29, %v851_v28 }
 0x1c2   :  { %9727 = vst [vmem:[#allocation48_spill] sm:$0xff] %v7245_v11 }
 0x1c3   :  { %9726 = vst [vmem:[#allocation47_spill] sm:$0xff] %v7241_v27 }
 0x1c4   :  { %5159 = vmatmul.msk.f32.gmra.mxu1 %vm170_vm0, %v86_v37  ;;  %5472 = vmatmul.msk.f32.gmra.mxu0 %vm170_vm0, %v5408_v51  ;;  %v87_v51 = vld [vmem:[%s9671_s0 + $0x248] sm:$0xff] }
 0x1c5   :  { %5219 = vmatmul.msk.f32.gmra.mxu2 %vm170_vm0, %v1013_v20  ;;  %5346 = vmatmul.msk.f32.gmra.mxu3 %vm170_vm0, %v83_v32  ;;  %v854_v32 = vadd.f32 %v7159_v18, %v6569_v1  ;;  %v5410_v1 = vld [vmem:[%s9671_s0 + $0x219] sm:$0xff]  ;;  %v1015_v18 = vld [vmem:[%s9671_s0 + $0x22a] sm:$0xff] }
 0x1c8   :  { %v1318_v61 = vpop.f32.mrf.mxu2  ;;  %v1845_v48 = vpop.f32.mrf.mxu3 }
 0x1c9   :  { %v7262_v21 = vadd.f32 %v1845_v48, %v1461_v35  ;;  %v7264_v52 = vpop.f32.mrf.mxu1  ;;  %v7266_v27 = vpop.f32.mrf.mxu0  ;;  %v1462_v29 = vadd.f32 %v1318_v61, %v854_v32 }
 0x1ca   :  { %9729 = vst [vmem:[#allocation50_spill] sm:$0xff] %v7266_v27 }
 0x1cb   :  { %9728 = vst [vmem:[#allocation49_spill] sm:$0xff] %v7262_v21 }
 0x1cc   :  { %5160 = vmatmul.msk.f32.gmra.mxu1 %vm170_vm0, %v87_v51  ;;  %5473 = vmatmul.msk.f32.gmra.mxu0 %vm170_vm0, %v5409_v58  ;;  %v88_v58 = vld [vmem:[%s9671_s0 + $0x258] sm:$0xff] }
 0x1cd   :  { %5220 = vmatmul.msk.f32.gmra.mxu2 %vm170_vm0, %v1014_v14  ;;  %5347 = vmatmul.msk.f32.gmra.mxu3 %vm170_vm0, %v84_v8  ;;  %v857_v8 = vadd.f32 %v7180_v39, %v6588_v15  ;;  %v5411_v15 = vld [vmem:[%s9671_s0 + $0x229] sm:$0xff]  ;;  %v1016_v39 = vld [vmem:[%s9671_s0 + $0x232] sm:$0xff] }
 0x1d0   :  { %v1321_v20 = vpop.f32.mrf.mxu2  ;;  %v1848_v28 = vpop.f32.mrf.mxu3 }
 0x1d1   :  { %v7283_v35 = vadd.f32 %v1848_v28, %v1462_v29  ;;  %v7285_v48 = vpop.f32.mrf.mxu1  ;;  %v7287_v21 = vpop.f32.mrf.mxu0  ;;  %v1463_v61 = vadd.f32 %v1321_v20, %v857_v8  ;;  %v860_v20 = vadd.f32 %v7201_v43, %v6607_v44  ;;  %v90_v44 = vld [vmem:[%s9671_s0 + $0x270] sm:$0xff] }
 0x1d2   :  { %9730 = vst [vmem:[#allocation51_spill] sm:$0xff] %v7287_v21  ;;  %v5412_v43 = vld [vmem:[%s9671_s0 + $0x231] sm:$0xff] }
 0x1d4   :  { %5161 = vmatmul.msk.f32.gmra.mxu1 %vm170_vm0, %v88_v58  ;;  %5474 = vmatmul.msk.f32.gmra.mxu0 %vm170_vm0, %v5410_v1  ;;  %v89_v1 = vld [vmem:[%s9671_s0 + $0x260] sm:$0xff] }
 0x1d5   :  { %5221 = vmatmul.msk.f32.gmra.mxu2 %vm170_vm0, %v1015_v18  ;;  %5348 = vmatmul.msk.f32.gmra.mxu3 %vm170_vm0, %v85_v24  ;;  %v39_v24 = vld [vmem:[%s9672_s1 + $0x30] sm:$0xff]  ;;  %v40_v18 = vld [vmem:[%s9672_s1 + $0x38] sm:$0xff] }
 0x1d6   :  { %3362 = vmatpush.msra.mxu2 %v39_v24  ;;  %3891 = vmatpush.msra.mxu3 %v40_v18 }
 0x1d8   :  { %v1324_v14 = vpop.f32.mrf.mxu2  ;;  %v1851_v32 = vpop.f32.mrf.mxu3 }
 0x1d9   :  { %v7304_v29 = vadd.f32 %v1851_v32, %v1463_v61  ;;  %v7306_v28 = vpop.f32.mrf.mxu1  ;;  %v7308_v21 = vpop.f32.mrf.mxu0  ;;  %v1464_v8 = vadd.f32 %v1324_v14, %v860_v20  ;;  %v1017_v14 = vld [vmem:[%s9671_s0 + $0x242] sm:$0xff] }
 0x1da   :  { %v41_v20 = vld [vmem:[%s9672_s1 + $0x40] sm:$0xff] }
 0x1db   :  { %9731 = vst [vmem:[#allocation52_spill] sm:$0xff] %v7304_v29  ;;  %4420 = vmatpush.msra.mxu0 %v41_v20 }
 0x1dc   :  { %5162 = vmatmul.msk.f32.gmra.mxu1 %vm170_vm0, %v89_v1  ;;  %5475 = vmatmul.msk.f32.gmra.mxu0 %vm170_vm0, %v5411_v15 }
 0x1dd   :  { %5222 = vmatmul.msk.f32.gmra.mxu2 %vm170_vm0, %v1016_v39  ;;  %5349 = vmatmul.msk.f32.gmra.mxu3 %vm170_vm0, %v86_v37  ;;  %v38_v37 = vld [vmem:[%s9672_s1 + $0x28] sm:$0xff]  ;;  %v863_v39 = vadd.f32 %v7222_v47, %v6626_v17  ;;  %v91_v17 = vld [vmem:[%s9671_s0 + $0x278] sm:$0xff] }
 0x1de   :  { %2832 = vmatpush.msra.mxu1 %v38_v37  ;;  %v5413_v47 = vld [vmem:[%s9671_s0 + $0x241] sm:$0xff] }
 0x1e0   :  { %v1327_v61 = vpop.f32.mrf.mxu2  ;;  %v1854_v32 = vpop.f32.mrf.mxu3 }
 0x1e1   :  { %v7331_v24 = vadd.f32 %v1854_v32, %v1464_v8  ;;  %v7333_v29 = vpop.f32.mrf.mxu1  ;;  %v7335_v15 = vpop.f32.mrf.mxu0  ;;  %v1465_v18 = vadd.f32 %v1327_v61, %v863_v39  ;;  %v866_v61 = vadd.f32 %v7243_v59, %v6645_v5  ;;  %v5414_v5 = vld [vmem:[%s9671_s0 + $0x249] sm:$0xff]  ;;  %v1019_v59 = vld [vmem:[%s9671_s0 + $0x25a] sm:$0xff] }
 0x1e2   :  { %9733 = vst [vmem:[#allocation54_spill] sm:$0xff] %v7335_v15 }
 0x1e3   :  { %9732 = vst [vmem:[#allocation53_spill] sm:$0xff] %v7331_v24 }
 0x1e4   :  { %5163 = vmatmul.msk.f32.gmra.mxu1 %vm170_vm0, %v90_v44  ;;  %5476 = vmatmul.msk.f32.gmra.mxu0 %vm170_vm0, %v5412_v43 }
 0x1e5   :  { %5223 = vmatmul.msk.f32.gmra.mxu2 %vm170_vm0, %v1017_v14  ;;  %5350 = vmatmul.msk.f32.gmra.mxu3 %vm170_vm0, %v87_v51  ;;  %v1018_v51 = vld [vmem:[%s9671_s0 + $0x24a] sm:$0xff] }
 0x1e8   :  { %v1330_v8 = vpop.f32.mrf.mxu2  ;;  %v1857_v32 = vpop.f32.mrf.mxu3 }
 0x1e9   :  { %v7358_v37 = vadd.f32 %v1857_v32, %v1465_v18  ;;  %v7360_v15 = vpop.f32.mrf.mxu1  ;;  %v7362_v43 = vpop.f32.mrf.mxu0  ;;  %v1466_v14 = vadd.f32 %v1330_v8, %v866_v61 }
 0x1ea   :  { %9735 = vst [vmem:[#allocation56_spill] sm:$0xff] %v7362_v43 }
 0x1eb   :  { %9734 = vst [vmem:[#allocation55_spill] sm:$0xff] %v7358_v37 }
 0x1ec   :  { %5164 = vmatmul.msk.f32.gmra.mxu1 %vm170_vm0, %v91_v17  ;;  %5477 = vmatmul.msk.f32.gmra.mxu0 %vm170_vm0, %v5413_v47  ;;  %v92_v47 = vld [vmem:[%s9671_s0 + $0x288] sm:$0xff] }
 0x1ed   :  { %5224 = vmatmul.msk.f32.gmra.mxu2 %vm170_vm0, %v1018_v51  ;;  %5351 = vmatmul.msk.f32.gmra.mxu3 %vm170_vm0, %v88_v58  ;;  %v869_v58 = vadd.f32 %v7264_v52, %v6664_v56  ;;  %v5415_v56 = vld [vmem:[%s9671_s0 + $0x259] sm:$0xff]  ;;  %v1020_v52 = vld [vmem:[%s9671_s0 + $0x262] sm:$0xff] }
 0x1f0   :  { %v1333_v39 = vpop.f32.mrf.mxu2  ;;  %v1860_v20 = vpop.f32.mrf.mxu3 }
 0x1f1   :  { %v7379_v18 = vadd.f32 %v1860_v20, %v1466_v14  ;;  %v7381_v32 = vpop.f32.mrf.mxu1  ;;  %v7383_v43 = vpop.f32.mrf.mxu0  ;;  %v1467_v8 = vadd.f32 %v1333_v39, %v869_v58 }
 0x1f2   :  { %9737 = vst [vmem:[#allocation58_spill] sm:$0xff] %v7383_v43 }
 0x1f3   :  { %9736 = vst [vmem:[#allocation57_spill] sm:$0xff] %v7379_v18 }
 0x1f4   :  { %5165 = vmatmul.msk.f32.gmra.mxu1 %vm170_vm0, %v92_v47  ;;  %5478 = vmatmul.msk.f32.gmra.mxu0 %vm170_vm0, %v5414_v5  ;;  %v93_v5 = vld [vmem:[%s9671_s0 + $0x290] sm:$0xff] }
 0x1f5   :  { %5225 = vmatmul.msk.f32.gmra.mxu2 %vm170_vm0, %v1019_v59  ;;  %5352 = vmatmul.msk.f32.gmra.mxu3 %vm170_vm0, %v89_v1  ;;  %v9740_v1 = vld [vmem:[#allocation27_spill] sm:$0xff] }
 0x1f6   :  { %v872_v39 = vadd.f32 %v7285_v48, %v9740_v1  ;;  %v5416_v48 = vld [vmem:[%s9671_s0 + $0x261] sm:$0xff] }
 0x1f8   :  { %v1336_v51 = vpop.f32.mrf.mxu2  ;;  %v1863_v61 = vpop.f32.mrf.mxu3 }
 0x1f9   :  { %v7400_v14 = vadd.f32 %v1863_v61, %v1467_v8  ;;  %v7402_v20 = vpop.f32.mrf.mxu1  ;;  %v7404_v24 = vpop.f32.mrf.mxu0  ;;  %v1468_v59 = vadd.f32 %v1336_v51, %v872_v39  ;;  %v9743_v51 = vld [vmem:[#allocation5_spill] sm:$0xff] }
 0x1fa   :  { %9739 = vst [vmem:[#allocation60_spill] sm:$0xff] %v7404_v24 }
 0x1fb   :  { %9738 = vst [vmem:[#allocation59_spill] sm:$0xff] %v7400_v14 }
 0x1fc   :  { %5166 = vmatmul.msk.f32.gmra.mxu1 %vm170_vm0, %v93_v5  ;;  %5479 = vmatmul.msk.f32.gmra.mxu0 %vm170_vm0, %v5415_v56  ;;  %v94_v56 = vld [vmem:[%s9671_s0 + $0x2a0] sm:$0xff] }
 0x1fd   :  { %5226 = vmatmul.msk.f32.gmra.mxu2 %vm170_vm0, %v1020_v52  ;;  %5353 = vmatmul.msk.f32.gmra.mxu3 %vm170_vm0, %v90_v44  ;;  %v1021_v44 = vld [vmem:[%s9671_s0 + $0x272] sm:$0xff]  ;;  %v875_v52 = vadd.f32 %v7306_v28, %v9743_v51 }
 0x1fe   :  { %v5417_v28 = vld [vmem:[%s9671_s0 + $0x271] sm:$0xff] }
 0x200   :  { %v1339_v58 = vpop.f32.mrf.mxu2  ;;  %v1866_v8 = vpop.f32.mrf.mxu3 }
 0x201   :  { %v7421_v61 = vadd.f32 %v1866_v8, %v1468_v59  ;;  %v7423_v43 = vpop.f32.mrf.mxu1  ;;  %v7425_v37 = vpop.f32.mrf.mxu0  ;;  %v1469_v1 = vadd.f32 %v1339_v58, %v875_v52  ;;  %v9746_v58 = vld [vmem:[#allocation7_spill] sm:$0xff] }
 0x202   :  { %9742 = vst [vmem:[#allocation61_spill] sm:$0xff] %v7425_v37 }
 0x203   :  { %9741 = vst [vmem:[#allocation27_spill] sm:$0xff] %v7421_v61 }
 0x204   :  { %5167 = vmatmul.msk.f32.gmra.mxu1 %vm170_vm0, %v94_v56  ;;  %5480 = vmatmul.msk.f32.gmra.mxu0 %vm170_vm0, %v5416_v48  ;;  %v95_v48 = vld [vmem:[%s9671_s0 + $0x2a8] sm:$0xff] }
 0x205   :  { %5227 = vmatmul.msk.f32.gmra.mxu2 %vm170_vm0, %v1021_v44  ;;  %5354 = vmatmul.msk.f32.gmra.mxu3 %vm170_vm0, %v91_v17  ;;  %v1022_v17 = vld [vmem:[%s9671_s0 + $0x27a] sm:$0xff]  ;;  %v878_v44 = vadd.f32 %v7333_v29, %v9746_v58 }
 0x206   :  { %v5418_v29 = vld [vmem:[%s9671_s0 + $0x279] sm:$0xff] }
 0x208   :  { %v1342_v39 = vpop.f32.mrf.mxu2  ;;  %v1869_v59 = vpop.f32.mrf.mxu3 }
 0x209   :  { %v7442_v8 = vadd.f32 %v1869_v59, %v1469_v1  ;;  %v7444_v24 = vpop.f32.mrf.mxu1  ;;  %v7446_v18 = vpop.f32.mrf.mxu0  ;;  %v1470_v51 = vadd.f32 %v1342_v39, %v878_v44  ;;  %v9749_v39 = vld [vmem:[#allocation9_spill] sm:$0xff] }
 0x20a   :  { %9745 = vst [vmem:[#allocation62_spill] sm:$0xff] %v7446_v18 }
 0x20b   :  { %9744 = vst [vmem:[#allocation5_spill] sm:$0xff] %v7442_v8 }
 0x20c   :  { %5168 = vmatmul.msk.f32.gmra.mxu1 %vm170_vm0, %v95_v48  ;;  %5481 = vmatmul.msk.f32.gmra.mxu0 %vm170_vm0, %v5417_v28  ;;  %v96_v28 = vld [vmem:[%s9671_s0 + $0x2b8] sm:$0xff] }
 0x20d   :  { %5228 = vmatmul.msk.f32.gmra.mxu2 %vm170_vm0, %v1022_v17  ;;  %5355 = vmatmul.msk.f32.gmra.mxu3 %vm170_vm0, %v92_v47  ;;  %v1023_v47 = vld [vmem:[%s9671_s0 + $0x28a] sm:$0xff]  ;;  %v881_v17 = vadd.f32 %v7360_v15, %v9749_v39 }
 0x20e   :  { %v5419_v15 = vld [vmem:[%s9671_s0 + $0x289] sm:$0xff] }
 0x210   :  { %v1345_v52 = vpop.f32.mrf.mxu2  ;;  %v1872_v1 = vpop.f32.mrf.mxu3 }
 0x211   :  { %v7463_v59 = vadd.f32 %v1872_v1, %v1470_v51  ;;  %v7465_v8 = vpop.f32.mrf.mxu1  ;;  %v7467_v37 = vpop.f32.mrf.mxu0  ;;  %v1471_v58 = vadd.f32 %v1345_v52, %v881_v17  ;;  %v9752_v52 = vld [vmem:[#allocation11_spill] sm:$0xff] }
 0x212   :  { %9748 = vst [vmem:[#allocation63_spill] sm:$0xff] %v7467_v37 }
 0x213   :  { %9747 = vst [vmem:[#allocation7_spill] sm:$0xff] %v7463_v59 }
 0x214   :  { %5169 = vmatmul.msk.f32.gmra.mxu1 %vm170_vm0, %v96_v28  ;;  %5482 = vmatmul.msk.f32.gmra.mxu0 %vm170_vm0, %v5418_v29  ;;  %v97_v29 = vld [vmem:[%s9671_s0 + $0x2c0] sm:$0xff] }
 0x215   :  { %5229 = vmatmul.msk.f32.gmra.mxu2 %vm170_vm0, %v1023_v47  ;;  %5356 = vmatmul.msk.f32.gmra.mxu3 %vm170_vm0, %v93_v5  ;;  %v1024_v5 = vld [vmem:[%s9671_s0 + $0x292] sm:$0xff]  ;;  %v884_v47 = vadd.f32 %v7381_v32, %v9752_v52 }
 0x216   :  { %v5420_v32 = vld [vmem:[%s9671_s0 + $0x291] sm:$0xff] }
 0x218   :  { %v1348_v44 = vpop.f32.mrf.mxu2  ;;  %v1875_v51 = vpop.f32.mrf.mxu3 }
 0x219   :  { %v7484_v1 = vadd.f32 %v1875_v51, %v1471_v58  ;;  %v7486_v37 = vpop.f32.mrf.mxu1  ;;  %v7488_v14 = vpop.f32.mrf.mxu0  ;;  %v1472_v39 = vadd.f32 %v1348_v44, %v884_v47  ;;  %v9755_v44 = vld [vmem:[#allocation13_spill] sm:$0xff] }
 0x21a   :  { %9751 = vst [vmem:[#allocation64_spill] sm:$0xff] %v7488_v14 }
 0x21b   :  { %9750 = vst [vmem:[#allocation9_spill] sm:$0xff] %v7484_v1 }
 0x21c   :  { %5170 = vmatmul.msk.f32.gmra.mxu1 %vm170_vm0, %v97_v29  ;;  %5483 = vmatmul.msk.f32.gmra.mxu0 %vm170_vm0, %v5419_v15  ;;  %v98_v15 = vld [vmem:[%s9671_s0 + $0x2d0] sm:$0xff] }
 0x21d   :  { %5230 = vmatmul.msk.f32.gmra.mxu2 %vm170_vm0, %v1024_v5  ;;  %5357 = vmatmul.msk.f32.gmra.mxu3 %vm170_vm0, %v94_v56  ;;  %v1025_v56 = vld [vmem:[%s9671_s0 + $0x2a2] sm:$0xff]  ;;  %v887_v5 = vadd.f32 %v7402_v20, %v9755_v44 }
 0x21e   :  { %v5421_v20 = vld [vmem:[%s9671_s0 + $0x2a1] sm:$0xff] }
 0x220   :  { %v1351_v17 = vpop.f32.mrf.mxu2  ;;  %v1878_v58 = vpop.f32.mrf.mxu3 }
 0x221   :  { %v7505_v51 = vadd.f32 %v1878_v58, %v1472_v39  ;;  %v7507_v1 = vpop.f32.mrf.mxu1  ;;  %v7509_v18 = vpop.f32.mrf.mxu0  ;;  %v1473_v52 = vadd.f32 %v1351_v17, %v887_v5  ;;  %v9758_v17 = vld [vmem:[#allocation15_spill] sm:$0xff] }
 0x222   :  { %9754 = vst [vmem:[#allocation65_spill] sm:$0xff] %v7509_v18 }
 0x223   :  { %9753 = vst [vmem:[#allocation11_spill] sm:$0xff] %v7505_v51 }
 0x224   :  { %5171 = vmatmul.msk.f32.gmra.mxu1 %vm170_vm0, %v98_v15  ;;  %5484 = vmatmul.msk.f32.gmra.mxu0 %vm170_vm0, %v5420_v32  ;;  %v99_v32 = vld [vmem:[%s9671_s0 + $0x2d8] sm:$0xff] }
 0x225   :  { %5231 = vmatmul.msk.f32.gmra.mxu2 %vm170_vm0, %v1025_v56  ;;  %5358 = vmatmul.msk.f32.gmra.mxu3 %vm170_vm0, %v95_v48  ;;  %v1026_v48 = vld [vmem:[%s9671_s0 + $0x2aa] sm:$0xff]  ;;  %v890_v56 = vadd.f32 %v7423_v43, %v9758_v17 }
 0x226   :  { %v5422_v43 = vld [vmem:[%s9671_s0 + $0x2a9] sm:$0xff] }
 0x228   :  { %v1354_v47 = vpop.f32.mrf.mxu2  ;;  %v1881_v39 = vpop.f32.mrf.mxu3 }
 0x229   :  { %v7526_v58 = vadd.f32 %v1881_v39, %v1473_v52  ;;  %v7528_v51 = vpop.f32.mrf.mxu1  ;;  %v7530_v18 = vpop.f32.mrf.mxu0  ;;  %v1474_v44 = vadd.f32 %v1354_v47, %v890_v56  ;;  %v9761_v47 = vld [vmem:[#allocation17_spill] sm:$0xff] }
 0x22a   :  { %9757 = vst [vmem:[#allocation66_spill] sm:$0xff] %v7530_v18 }
 0x22b   :  { %9756 = vst [vmem:[#allocation13_spill] sm:$0xff] %v7526_v58 }
 0x22c   :  { %5172 = vmatmul.msk.f32.gmra.mxu1 %vm170_vm0, %v99_v32  ;;  %5485 = vmatmul.msk.f32.gmra.mxu0 %vm170_vm0, %v5421_v20  ;;  %v100_v20 = vld [vmem:[%s9671_s0 + $0x2e8] sm:$0xff] }
 0x22d   :  { %5232 = vmatmul.msk.f32.gmra.mxu2 %vm170_vm0, %v1026_v48  ;;  %5359 = vmatmul.msk.f32.gmra.mxu3 %vm170_vm0, %v96_v28  ;;  %v1027_v28 = vld [vmem:[%s9671_s0 + $0x2ba] sm:$0xff]  ;;  %v893_v48 = vadd.f32 %v7444_v24, %v9761_v47 }
 0x22e   :  { %v5423_v24 = vld [vmem:[%s9671_s0 + $0x2b9] sm:$0xff] }
 0x230   :  { %v1357_v5 = vpop.f32.mrf.mxu2  ;;  %v1884_v52 = vpop.f32.mrf.mxu3 }
 0x231   :  { %v7547_v39 = vadd.f32 %v1884_v52, %v1474_v44  ;;  %v7549_v58 = vpop.f32.mrf.mxu1  ;;  %v7551_v18 = vpop.f32.mrf.mxu0  ;;  %v1475_v17 = vadd.f32 %v1357_v5, %v893_v48  ;;  %v9764_v5 = vld [vmem:[#allocation19_spill] sm:$0xff] }
 0x232   :  { %9760 = vst [vmem:[#allocation67_spill] sm:$0xff] %v7551_v18 }
 0x233   :  { %9759 = vst [vmem:[#allocation15_spill] sm:$0xff] %v7547_v39 }
 0x234   :  { %5173 = vmatmul.msk.f32.gmra.mxu1 %vm170_vm0, %v100_v20  ;;  %5486 = vmatmul.msk.f32.gmra.mxu0 %vm170_vm0, %v5422_v43  ;;  %v101_v43 = vld [vmem:[%s9671_s0 + $0x2f0] sm:$0xff] }
 0x235   :  { %5233 = vmatmul.msk.f32.gmra.mxu2 %vm170_vm0, %v1027_v28  ;;  %5360 = vmatmul.msk.f32.gmra.mxu3 %vm170_vm0, %v97_v29  ;;  %v1028_v29 = vld [vmem:[%s9671_s0 + $0x2c2] sm:$0xff]  ;;  %v896_v28 = vadd.f32 %v7465_v8, %v9764_v5 }
 0x236   :  { %v5424_v8 = vld [vmem:[%s9671_s0 + $0x2c1] sm:$0xff] }
 0x238   :  { %v1360_v56 = vpop.f32.mrf.mxu2  ;;  %v1887_v44 = vpop.f32.mrf.mxu3 }
 0x239   :  { %v7568_v52 = vadd.f32 %v1887_v44, %v1475_v17  ;;  %v7570_v39 = vpop.f32.mrf.mxu1  ;;  %v7572_v18 = vpop.f32.mrf.mxu0  ;;  %v1476_v47 = vadd.f32 %v1360_v56, %v896_v28  ;;  %v9767_v56 = vld [vmem:[#allocation21_spill] sm:$0xff] }
 0x23a   :  { %9763 = vst [vmem:[#allocation68_spill] sm:$0xff] %v7572_v18 }
 0x23b   :  { %9762 = vst [vmem:[#allocation17_spill] sm:$0xff] %v7568_v52 }
 0x23c   :  { %5174 = vmatmul.msk.f32.gmra.mxu1 %vm170_vm0, %v101_v43  ;;  %5487 = vmatmul.msk.f32.gmra.mxu0 %vm170_vm0, %v5423_v24  ;;  %v102_v24 = vld [vmem:[%s9671_s0 + $0x300] sm:$0xff] }
 0x23d   :  { %5234 = vmatmul.msk.f32.gmra.mxu2 %vm170_vm0, %v1028_v29  ;;  %5361 = vmatmul.msk.f32.gmra.mxu3 %vm170_vm0, %v98_v15  ;;  %v1029_v15 = vld [vmem:[%s9671_s0 + $0x2d2] sm:$0xff]  ;;  %v899_v29 = vadd.f32 %v7486_v37, %v9767_v56 }
 0x23e   :  { %v5425_v37 = vld [vmem:[%s9671_s0 + $0x2d1] sm:$0xff] }
 0x240   :  { %v1363_v48 = vpop.f32.mrf.mxu2  ;;  %v1890_v17 = vpop.f32.mrf.mxu3 }
 0x241   :  { %v7589_v44 = vadd.f32 %v1890_v17, %v1476_v47  ;;  %v7591_v52 = vpop.f32.mrf.mxu1  ;;  %v7593_v18 = vpop.f32.mrf.mxu0  ;;  %v1477_v5 = vadd.f32 %v1363_v48, %v899_v29  ;;  %v9770_v48 = vld [vmem:[#allocation23_spill] sm:$0xff] }
 0x242   :  { %9766 = vst [vmem:[#allocation69_spill] sm:$0xff] %v7593_v18 }
 0x243   :  { %9765 = vst [vmem:[#allocation19_spill] sm:$0xff] %v7589_v44 }
 0x244   :  { %5175 = vmatmul.msk.f32.gmra.mxu1 %vm170_vm0, %v102_v24  ;;  %5488 = vmatmul.msk.f32.gmra.mxu0 %vm170_vm0, %v5424_v8  ;;  %v103_v8 = vld [vmem:[%s9671_s0 + $0x308] sm:$0xff] }
 0x245   :  { %5235 = vmatmul.msk.f32.gmra.mxu2 %vm170_vm0, %v1029_v15  ;;  %5362 = vmatmul.msk.f32.gmra.mxu3 %vm170_vm0, %v99_v32  ;;  %v1030_v32 = vld [vmem:[%s9671_s0 + $0x2da] sm:$0xff]  ;;  %v902_v15 = vadd.f32 %v7507_v1, %v9770_v48 }
 0x246   :  { %v5426_v1 = vld [vmem:[%s9671_s0 + $0x2d9] sm:$0xff] }
 0x248   :  { %v1366_v28 = vpop.f32.mrf.mxu2  ;;  %v1893_v47 = vpop.f32.mrf.mxu3 }
 0x249   :  { %v7610_v17 = vadd.f32 %v1893_v47, %v1477_v5  ;;  %v7612_v44 = vpop.f32.mrf.mxu1  ;;  %v7614_v18 = vpop.f32.mrf.mxu0  ;;  %v1478_v56 = vadd.f32 %v1366_v28, %v902_v15  ;;  %v9773_v28 = vld [vmem:[#allocation25_spill] sm:$0xff] }
 0x24a   :  { %9769 = vst [vmem:[#allocation70_spill] sm:$0xff] %v7614_v18 }
 0x24b   :  { %9768 = vst [vmem:[#allocation21_spill] sm:$0xff] %v7610_v17 }
 0x24c   :  { %5176 = vmatmul.msk.f32.gmra.mxu1 %vm170_vm0, %v103_v8  ;;  %5489 = vmatmul.msk.f32.gmra.mxu0 %vm170_vm0, %v5425_v37  ;;  %v104_v37 = vld [vmem:[%s9671_s0 + $0x318] sm:$0xff] }
 0x24d   :  { %5236 = vmatmul.msk.f32.gmra.mxu2 %vm170_vm0, %v1030_v32  ;;  %5363 = vmatmul.msk.f32.gmra.mxu3 %vm170_vm0, %v100_v20  ;;  %v1031_v20 = vld [vmem:[%s9671_s0 + $0x2ea] sm:$0xff]  ;;  %v905_v32 = vadd.f32 %v7528_v51, %v9773_v28 }
 0x24e   :  { %v5427_v51 = vld [vmem:[%s9671_s0 + $0x2e9] sm:$0xff] }
 0x250   :  { %v1369_v29 = vpop.f32.mrf.mxu2  ;;  %v1896_v5 = vpop.f32.mrf.mxu3 }
 0x251   :  { %v7631_v47 = vadd.f32 %v1896_v5, %v1478_v56  ;;  %v7633_v17 = vpop.f32.mrf.mxu1  ;;  %v7635_v18 = vpop.f32.mrf.mxu0  ;;  %v1479_v48 = vadd.f32 %v1369_v29, %v905_v32  ;;  %v9776_v29 = vld [vmem:[#allocation28_spill] sm:$0xff] }
 0x252   :  { %9772 = vst [vmem:[#allocation71_spill] sm:$0xff] %v7635_v18 }
 0x253   :  { %9771 = vst [vmem:[#allocation23_spill] sm:$0xff] %v7631_v47 }
 0x254   :  { %5177 = vmatmul.msk.f32.gmra.mxu1 %vm170_vm0, %v104_v37  ;;  %5490 = vmatmul.msk.f32.gmra.mxu0 %vm170_vm0, %v5426_v1  ;;  %v105_v1 = vld [vmem:[%s9671_s0 + $0x320] sm:$0xff] }
 0x255   :  { %5237 = vmatmul.msk.f32.gmra.mxu2 %vm170_vm0, %v1031_v20  ;;  %5364 = vmatmul.msk.f32.gmra.mxu3 %vm170_vm0, %v101_v43  ;;  %v1032_v43 = vld [vmem:[%s9671_s0 + $0x2f2] sm:$0xff]  ;;  %v908_v20 = vadd.f32 %v7549_v58, %v9776_v29  ;;  %v5499_v58 = vld [vmem:[%s9671_s0 + $0x1a] sm:$0xff] }
 0x258   :  { %v1372_v15 = vpop.f32.mrf.mxu2  ;;  %v1899_v56 = vpop.f32.mrf.mxu3 }
 0x259   :  { %v7652_v5 = vadd.f32 %v1899_v56, %v1479_v48  ;;  %v7654_v47 = vpop.f32.mrf.mxu1  ;;  %v7656_v18 = vpop.f32.mrf.mxu0  ;;  %v1480_v28 = vadd.f32 %v1372_v15, %v908_v20  ;;  %v9779_v15 = vld [vmem:[#allocation30_spill] sm:$0xff] }
 0x25a   :  { %9775 = vst [vmem:[#allocation72_spill] sm:$0xff] %v7656_v18 }
 0x25b   :  { %9774 = vst [vmem:[#allocation25_spill] sm:$0xff] %v7652_v5 }
 0x25c   :  { %5178 = vmatmul.msk.f32.gmra.mxu1 %vm170_vm0, %v105_v1  ;;  %5491 = vmatmul.msk.f32.gmra.mxu0 %vm170_vm0, %v5427_v51  ;;  %v5428_v51 = vld [vmem:[%s9671_s0 + $0x2f1] sm:$0xff] }
 0x25d   :  { %5238 = vmatmul.msk.f32.gmra.mxu2 %vm170_vm0, %v1032_v43  ;;  %5365 = vmatmul.msk.f32.gmra.mxu3 %vm170_vm0, %v102_v24  ;;  %v1033_v24 = vld [vmem:[%s9671_s0 + $0x302] sm:$0xff]  ;;  %v911_v43 = vadd.f32 %v7570_v39, %v9779_v15 }
 0x25e   :  { %v5500_v39 = vld [vmem:[%s9671_s0 + $0x22] sm:$0xff] }
 0x260   :  { %v1375_v32 = vpop.f32.mrf.mxu2  ;;  %v1902_v48 = vpop.f32.mrf.mxu3 }
 0x261   :  { %v7673_v56 = vadd.f32 %v1902_v48, %v1480_v28  ;;  %v7675_v5 = vpop.f32.mrf.mxu1  ;;  %v7677_v18 = vpop.f32.mrf.mxu0  ;;  %v1481_v29 = vadd.f32 %v1375_v32, %v911_v43  ;;  %v9782_v32 = vld [vmem:[#allocation32_spill] sm:$0xff] }
 0x262   :  { %9778 = vst [vmem:[#allocation73_spill] sm:$0xff] %v7677_v18 }
 0x263   :  { %9777 = vst [vmem:[#allocation28_spill] sm:$0xff] %v7673_v56 }
 0x264   :  { %5492 = vmatmul.msk.f32.gmra.mxu0 %vm170_vm0, %v5428_v51  ;;  %5563 = vmatmul.msk.f32.vlgmr.msra.gmra.mxu1 %vm170_vm0, %v5499_v58  ;;  %v5429_v51 = vld [vmem:[%s9671_s0 + $0x301] sm:$0xff]  ;;  %v914_v58 = vadd.f32 %v7591_v52, %v9782_v32  ;;  %v7727_v52 = vld [vmem:[%s9671_s0 + $0x32] sm:$0xff] }
 0x265   :  { %5239 = vmatmul.msk.f32.gmra.mxu2 %vm170_vm0, %v1033_v24  ;;  %5366 = vmatmul.msk.f32.gmra.mxu3 %vm170_vm0, %v103_v8  ;;  %v1034_v8 = vld [vmem:[%s9671_s0 + $0x30a] sm:$0xff] }
 0x268   :  { %v1378_v20 = vpop.f32.mrf.mxu2  ;;  %v1905_v28 = vpop.f32.mrf.mxu3 }
 0x269   :  { %v7694_v48 = vadd.f32 %v1905_v28, %v1481_v29  ;;  %v7696_v56 = vpop.f32.mrf.mxu1  ;;  %v7698_v18 = vpop.f32.mrf.mxu0  ;;  %v1482_v24 = vadd.f32 %v1378_v20, %v914_v58  ;;  %v9785_v20 = vld [vmem:[#allocation34_spill] sm:$0xff] }
 0x26a   :  { %9781 = vst [vmem:[#allocation74_spill] sm:$0xff] %v7698_v18 }
 0x26b   :  { %9780 = vst [vmem:[#allocation30_spill] sm:$0xff] %v7694_v48 }
 0x26c   :  { %5493 = vmatmul.msk.f32.gmra.mxu0 %vm170_vm0, %v5429_v51  ;;  %5564 = vmatmul.msk.f32.gmra.mxu1 %vm170_vm0, %v5500_v39  ;;  %v5430_v51 = vld [vmem:[%s9671_s0 + $0x309] sm:$0xff]  ;;  %v917_v39 = vadd.f32 %v7612_v44, %v9785_v20  ;;  %v7751_v44 = vld [vmem:[%s9671_s0 + $0x3a] sm:$0xff] }
 0x26d   :  { %5240 = vmatmul.msk.f32.gmra.mxu2 %vm170_vm0, %v1034_v8  ;;  %5367 = vmatmul.msk.f32.gmra.mxu3 %vm170_vm0, %v104_v37  ;;  %v1035_v37 = vld [vmem:[%s9671_s0 + $0x31a] sm:$0xff] }
 0x270   :  { %v1381_v15 = vpop.f32.mrf.mxu2  ;;  %v1908_v43 = vpop.f32.mrf.mxu3 }
 0x271   :  { %v7715_v29 = vadd.f32 %v1908_v43, %v1482_v24  ;;  %v7717_v28 = vpop.f32.mrf.mxu1  ;;  %v7719_v18 = vpop.f32.mrf.mxu0  ;;  %v1483_v8 = vadd.f32 %v1381_v15, %v917_v39  ;;  %v5305_v15 = vld [vmem:[%s9671_s0 + $0x330] sm:$0xff] }
 0x272   :  { %9784 = vst [vmem:[#allocation75_spill] sm:$0xff] %v7719_v18 }
 0x273   :  { %9783 = vst [vmem:[#allocation32_spill] sm:$0xff] %v7715_v29 }
 0x274   :  { %5494 = vmatmul.msk.f32.gmra.mxu0 %vm170_vm0, %v5430_v51  ;;  %5565 = vmatmul.msk.f32.gmra.mxu1 %vm170_vm0, %v7727_v52  ;;  %v5431_v51 = vld [vmem:[%s9671_s0 + $0x319] sm:$0xff] }
 0x275   :  { %5241 = vmatmul.msk.f32.gmra.mxu2 %vm170_vm0, %v1035_v37  ;;  %5368 = vmatmul.msk.f32.gmra.mxu3 %vm170_vm0, %v105_v1  ;;  %v1036_v1 = vld [vmem:[%s9671_s0 + $0x322] sm:$0xff] }
 0x276   :  { %v9788_v37 = vld [vmem:[#allocation36_spill] sm:$0xff] }
 0x277   :  { %v920_v20 = vadd.f32 %v7633_v17, %v9788_v37  ;;  %v7778_v17 = vld [vmem:[%s9671_s0 + $0x4a] sm:$0xff] }
 0x278   :  { %v1384_v32 = vpop.f32.mrf.mxu2  ;;  %v1911_v58 = vpop.f32.mrf.mxu3 }
 0x279   :  { %v7739_v24 = vadd.f32 %v1911_v58, %v1483_v8  ;;  %v7741_v43 = vpop.f32.mrf.mxu1  ;;  %v7743_v18 = vpop.f32.mrf.mxu0  ;;  %v1484_v39 = vadd.f32 %v1384_v32, %v920_v20  ;;  %v5306_v32 = vld [vmem:[%s9671_s0 + $0x338] sm:$0xff] }
 0x27a   :  { %9787 = vst [vmem:[#allocation76_spill] sm:$0xff] %v7743_v18 }
 0x27b   :  { %9786 = vst [vmem:[#allocation34_spill] sm:$0xff] %v7739_v24 }
 0x27c   :  { %5495 = vmatmul.msk.f32.gmra.mxu0 %vm170_vm0, %v5431_v51  ;;  %5566 = vmatmul.msk.f32.gmra.mxu1 %vm170_vm0, %v7751_v44  ;;  %v5432_v51 = vld [vmem:[%s9671_s0 + $0x321] sm:$0xff] }
 0x27d   :  { %5242 = vmatmul.msk.f32.gmra.mxu2 %vm170_vm0, %v1036_v1  ;;  %5369 = vmatmul.msk.f32.gmra.mxu3 %vm170_vm0, %v5305_v15  ;;  %v5627_v1 = vld [vmem:[%s9671_s0 + $0x30] sm:$0xff] }
 0x27e   :  { %v9791_v15 = vld [vmem:[#allocation6_spill] sm:$0xff] }
 0x27f   :  { %v923_v37 = vadd.f32 %v7654_v47, %v9791_v15  ;;  %v7805_v47 = vld [vmem:[%s9671_s0 + $0x52] sm:$0xff] }
 0x280   :  { %v1387_v8 = vpop.f32.mrf.mxu2  ;;  %v1914_v58 = vpop.f32.mrf.mxu3 }
 0x281   :  { %v7766_v48 = vadd.f32 %v1914_v58, %v1484_v39  ;;  %v7768_v18 = vpop.f32.mrf.mxu1  ;;  %v7770_v29 = vpop.f32.mrf.mxu0  ;;  %v1485_v20 = vadd.f32 %v1387_v8, %v923_v37  ;;  %v5628_v8 = vld [vmem:[%s9671_s0 + $0x38] sm:$0xff] }
 0x282   :  { %9790 = vst [vmem:[#allocation77_spill] sm:$0xff] %v7770_v29 }
 0x283   :  { %9789 = vst [vmem:[#allocation36_spill] sm:$0xff] %v7766_v48 }
 0x284   :  { %5496 = vmatmul.msk.f32.gmra.mxu0 %vm170_vm0, %v5432_v51  ;;  %5567 = vmatmul.msk.f32.gmra.mxu1 %vm170_vm0, %v7778_v17  ;;  %v5433_v51 = vld [vmem:[%s9671_s0 + $0x331] sm:$0xff] }
 0x285   :  { %5370 = vmatmul.msk.f32.gmra.mxu3 %vm170_vm0, %v5306_v32  ;;  %5691 = vmatmul.msk.f32.vlgmr.msra.gmra.mxu2 %vm170_vm0, %v5627_v1  ;;  %v5755_v32 = vld [vmem:[%s9671_s0 + $0x31] sm:$0xff]  ;;  %v9794_v1 = vld [vmem:[#allocation8_spill] sm:$0xff] }
 0x286   :  { %v926_v15 = vadd.f32 %v7675_v5, %v9794_v1  ;;  %v7832_v5 = vld [vmem:[%s9671_s0 + $0x62] sm:$0xff] }
 0x288   :  { %v1390_v39 = vpop.f32.mrf.mxu2  ;;  %v1917_v58 = vpop.f32.mrf.mxu3 }
 0x289   :  { %v7793_v29 = vadd.f32 %v1917_v58, %v1485_v20  ;;  %v7795_v24 = vpop.f32.mrf.mxu1  ;;  %v7797_v48 = vpop.f32.mrf.mxu0  ;;  %v1486_v37 = vadd.f32 %v1390_v39, %v926_v15  ;;  %v5629_v39 = vld [vmem:[%s9671_s0 + $0x48] sm:$0xff] }
 0x28a   :  { %9793 = vst [vmem:[#allocation78_spill] sm:$0xff] %v7797_v48 }
 0x28b   :  { %9792 = vst [vmem:[#allocation6_spill] sm:$0xff] %v7793_v29 }
 0x28c   :  { %5497 = vmatmul.msk.f32.gmra.mxu0 %vm170_vm0, %v5433_v51  ;;  %5568 = vmatmul.msk.f32.gmra.mxu1 %vm170_vm0, %v7805_v47  ;;  %v5434_v51 = vld [vmem:[%s9671_s0 + $0x339] sm:$0xff] }
 0x28d   :  { %5692 = vmatmul.msk.f32.gmra.mxu2 %vm170_vm0, %v5628_v8  ;;  %5819 = vmatmul.msk.f32.vlgmr.msra.gmra.mxu3 %vm170_vm0, %v5755_v32  ;;  %v5756_v8 = vld [vmem:[%s9671_s0 + $0x39] sm:$0xff] }
 0x28e   :  { %v9797_v32 = vld [vmem:[#allocation10_spill] sm:$0xff] }
 0x28f   :  { %v929_v1 = vadd.f32 %v7696_v56, %v9797_v32  ;;  %v5630_v56 = vld [vmem:[%s9671_s0 + $0x50] sm:$0xff] }
 0x290   :  { %v1393_v20 = vpop.f32.mrf.mxu2  ;;  %v1920_v58 = vpop.f32.mrf.mxu3 }
 0x291   :  { %v7820_v29 = vadd.f32 %v1920_v58, %v1486_v37  ;;  %v7822_v48 = vpop.f32.mrf.mxu1  ;;  %v7824_v61 = vpop.f32.mrf.mxu0  ;;  %v1487_v15 = vadd.f32 %v1393_v20, %v929_v1  ;;  %v5757_v20 = vld [vmem:[%s9671_s0 + $0x49] sm:$0xff] }
 0x292   :  { %9796 = vst [vmem:[#allocation79_spill] sm:$0xff] %v7824_v61 }
 0x293   :  { %9795 = vst [vmem:[#allocation8_spill] sm:$0xff] %v7820_v29 }
 0x294   :  { %5498 = vmatmul.msk.f32.gmra.mxu0 %vm170_vm0, %v5434_v51  ;;  %5569 = vmatmul.msk.f32.gmra.mxu1 %vm170_vm0, %v7832_v5  ;;  %v7856_v51 = vld [vmem:[%s9671_s0 + $0x6a] sm:$0xff] }
 0x295   :  { %5693 = vmatmul.msk.f32.gmra.mxu2 %vm170_vm0, %v5629_v39  ;;  %5820 = vmatmul.msk.f32.gmra.mxu3 %vm170_vm0, %v5756_v8  ;;  %v9800_v39 = vld [vmem:[#allocation12_spill] sm:$0xff] }
 0x296   :  { %v932_v8 = vadd.f32 %v7717_v28, %v9800_v39  ;;  %v5631_v28 = vld [vmem:[%s9671_s0 + $0x60] sm:$0xff] }
 0x298   :  { %v1396_v37 = vpop.f32.mrf.mxu2  ;;  %v1923_v58 = vpop.f32.mrf.mxu3 }
 0x299   :  { %v7847_v61 = vadd.f32 %v1923_v58, %v1487_v15  ;;  %v7849_v29 = vpop.f32.mrf.mxu1  ;;  %v7851_v14 = vpop.f32.mrf.mxu0  ;;  %v1488_v32 = vadd.f32 %v1396_v37, %v932_v8  ;;  %v5758_v37 = vld [vmem:[%s9671_s0 + $0x51] sm:$0xff] }
 0x29a   :  { %9799 = vst [vmem:[#allocation80_spill] sm:$0xff] %v7851_v14 }
 0x29b   :  { %9798 = vst [vmem:[#allocation10_spill] sm:$0xff] %v7847_v61 }
 0x29c   :  { %5570 = vmatmul.msk.f32.gmra.mxu1 %vm170_vm0, %v7856_v51  ;;  %5947 = vmatmul.msk.f32.vlgmr.msra.gmra.mxu0 %vm170_vm0, %v7727_v52  ;;  %v7881_v52 = vld [vmem:[%s9671_s0 + $0x7a] sm:$0xff] }
 0x29d   :  { %5694 = vmatmul.msk.f32.gmra.mxu2 %vm170_vm0, %v5630_v56  ;;  %5821 = vmatmul.msk.f32.gmra.mxu3 %vm170_vm0, %v5757_v20  ;;  %v9803_v56 = vld [vmem:[#allocation14_spill] sm:$0xff] }
 0x29e   :  { %v935_v20 = vadd.f32 %v7741_v43, %v9803_v56  ;;  %v5632_v43 = vld [vmem:[%s9671_s0 + $0x68] sm:$0xff] }
 0x2a0   :  { %v1399_v1 = vpop.f32.mrf.mxu2  ;;  %v1926_v15 = vpop.f32.mrf.mxu3 }
 0x2a1   :  { %v7872_v58 = vadd.f32 %v1926_v15, %v1488_v32  ;;  %v7874_v61 = vpop.f32.mrf.mxu1  ;;  %v7876_v14 = vpop.f32.mrf.mxu0  ;;  %v1489_v39 = vadd.f32 %v1399_v1, %v935_v20  ;;  %v5759_v1 = vld [vmem:[%s9671_s0 + $0x61] sm:$0xff] }
 0x2a2   :  { %9802 = vst [vmem:[#allocation81_spill] sm:$0xff] %v7876_v14 }
 0x2a3   :  { %9801 = vst [vmem:[#allocation12_spill] sm:$0xff] %v7872_v58 }
 0x2a4   :  { %5571 = vmatmul.msk.f32.gmra.mxu1 %vm170_vm0, %v7881_v52  ;;  %5948 = vmatmul.msk.f32.gmra.mxu0 %vm170_vm0, %v7751_v44  ;;  %v7906_v44 = vld [vmem:[%s9671_s0 + $0x82] sm:$0xff] }
 0x2a5   :  { %5695 = vmatmul.msk.f32.gmra.mxu2 %vm170_vm0, %v5631_v28  ;;  %5822 = vmatmul.msk.f32.gmra.mxu3 %vm170_vm0, %v5758_v37  ;;  %v9806_v28 = vld [vmem:[#allocation16_spill] sm:$0xff] }
 0x2a6   :  { %v938_v37 = vadd.f32 %v7768_v18, %v9806_v28  ;;  %v5633_v18 = vld [vmem:[%s9671_s0 + $0x78] sm:$0xff] }
 0x2a8   :  { %v1402_v8 = vpop.f32.mrf.mxu2  ;;  %v1929_v32 = vpop.f32.mrf.mxu3 }
 0x2a9   :  { %v7897_v15 = vadd.f32 %v1929_v32, %v1489_v39  ;;  %v7899_v58 = vpop.f32.mrf.mxu1  ;;  %v7901_v14 = vpop.f32.mrf.mxu0  ;;  %v1490_v56 = vadd.f32 %v1402_v8, %v938_v37  ;;  %v5760_v8 = vld [vmem:[%s9671_s0 + $0x69] sm:$0xff] }
 0x2aa   :  { %9805 = vst [vmem:[#allocation82_spill] sm:$0xff] %v7901_v14 }
 0x2ab   :  { %9804 = vst [vmem:[#allocation14_spill] sm:$0xff] %v7897_v15 }
 0x2ac   :  { %5572 = vmatmul.msk.f32.gmra.mxu1 %vm170_vm0, %v7906_v44  ;;  %5949 = vmatmul.msk.f32.gmra.mxu0 %vm170_vm0, %v7778_v17  ;;  %v7931_v17 = vld [vmem:[%s9671_s0 + $0x92] sm:$0xff] }
 0x2ad   :  { %5696 = vmatmul.msk.f32.gmra.mxu2 %vm170_vm0, %v5632_v43  ;;  %5823 = vmatmul.msk.f32.gmra.mxu3 %vm170_vm0, %v5759_v1  ;;  %v9809_v43 = vld [vmem:[#allocation18_spill] sm:$0xff] }
 0x2ae   :  { %v941_v1 = vadd.f32 %v7795_v24, %v9809_v43  ;;  %v5634_v24 = vld [vmem:[%s9671_s0 + $0x80] sm:$0xff] }
 0x2b0   :  { %v1405_v20 = vpop.f32.mrf.mxu2  ;;  %v1932_v39 = vpop.f32.mrf.mxu3 }
 0x2b1   :  { %v7922_v32 = vadd.f32 %v1932_v39, %v1490_v56  ;;  %v7924_v15 = vpop.f32.mrf.mxu1  ;;  %v7926_v14 = vpop.f32.mrf.mxu0  ;;  %v1491_v28 = vadd.f32 %v1405_v20, %v941_v1  ;;  %v5761_v20 = vld [vmem:[%s9671_s0 + $0x79] sm:$0xff] }
 0x2b2   :  { %9808 = vst [vmem:[#allocation83_spill] sm:$0xff] %v7926_v14 }
 0x2b3   :  { %9807 = vst [vmem:[#allocation16_spill] sm:$0xff] %v7922_v32 }
 0x2b4   :  { %5573 = vmatmul.msk.f32.gmra.mxu1 %vm170_vm0, %v7931_v17  ;;  %5950 = vmatmul.msk.f32.gmra.mxu0 %vm170_vm0, %v7805_v47  ;;  %v7956_v47 = vld [vmem:[%s9671_s0 + $0x9a] sm:$0xff] }
 0x2b5   :  { %5697 = vmatmul.msk.f32.gmra.mxu2 %vm170_vm0, %v5633_v18  ;;  %5824 = vmatmul.msk.f32.gmra.mxu3 %vm170_vm0, %v5760_v8  ;;  %v9812_v18 = vld [vmem:[#allocation20_spill] sm:$0xff] }
 0x2b6   :  { %v944_v8 = vadd.f32 %v7822_v48, %v9812_v18  ;;  %v5635_v48 = vld [vmem:[%s9671_s0 + $0x90] sm:$0xff] }
 0x2b8   :  { %v1408_v37 = vpop.f32.mrf.mxu2  ;;  %v1935_v56 = vpop.f32.mrf.mxu3 }
 0x2b9   :  { %v7947_v39 = vadd.f32 %v1935_v56, %v1491_v28  ;;  %v7949_v32 = vpop.f32.mrf.mxu1  ;;  %v7951_v14 = vpop.f32.mrf.mxu0  ;;  %v1492_v43 = vadd.f32 %v1408_v37, %v944_v8  ;;  %v5762_v37 = vld [vmem:[%s9671_s0 + $0x81] sm:$0xff] }
 0x2ba   :  { %9811 = vst [vmem:[#allocation84_spill] sm:$0xff] %v7951_v14 }
 0x2bb   :  { %9810 = vst [vmem:[#allocation18_spill] sm:$0xff] %v7947_v39 }
 0x2bc   :  { %5574 = vmatmul.msk.f32.gmra.mxu1 %vm170_vm0, %v7956_v47  ;;  %5951 = vmatmul.msk.f32.gmra.mxu0 %vm170_vm0, %v7832_v5  ;;  %v7981_v5 = vld [vmem:[%s9671_s0 + $0xaa] sm:$0xff] }
 0x2bd   :  { %5698 = vmatmul.msk.f32.gmra.mxu2 %vm170_vm0, %v5634_v24  ;;  %5825 = vmatmul.msk.f32.gmra.mxu3 %vm170_vm0, %v5761_v20  ;;  %v9815_v24 = vld [vmem:[#allocation22_spill] sm:$0xff] }
 0x2be   :  { %v947_v20 = vadd.f32 %v7849_v29, %v9815_v24  ;;  %v5636_v29 = vld [vmem:[%s9671_s0 + $0x98] sm:$0xff] }
 0x2c0   :  { %v1411_v1 = vpop.f32.mrf.mxu2  ;;  %v1938_v28 = vpop.f32.mrf.mxu3 }
 0x2c1   :  { %v7972_v56 = vadd.f32 %v1938_v28, %v1492_v43  ;;  %v7974_v39 = vpop.f32.mrf.mxu1  ;;  %v7976_v14 = vpop.f32.mrf.mxu0  ;;  %v1493_v18 = vadd.f32 %v1411_v1, %v947_v20  ;;  %v5763_v1 = vld [vmem:[%s9671_s0 + $0x91] sm:$0xff] }
 0x2c2   :  { %9814 = vst [vmem:[#allocation85_spill] sm:$0xff] %v7976_v14 }
 0x2c3   :  { %9813 = vst [vmem:[#allocation20_spill] sm:$0xff] %v7972_v56 }
 0x2c4   :  { %5575 = vmatmul.msk.f32.gmra.mxu1 %vm170_vm0, %v7981_v5  ;;  %5952 = vmatmul.msk.f32.gmra.mxu0 %vm170_vm0, %v7856_v51  ;;  %v8006_v51 = vld [vmem:[%s9671_s0 + $0xb2] sm:$0xff] }
 0x2c5   :  { %5699 = vmatmul.msk.f32.gmra.mxu2 %vm170_vm0, %v5635_v48  ;;  %5826 = vmatmul.msk.f32.gmra.mxu3 %vm170_vm0, %v5762_v37  ;;  %v9818_v48 = vld [vmem:[#allocation24_spill] sm:$0xff] }
 0x2c6   :  { %v950_v37 = vadd.f32 %v7874_v61, %v9818_v48  ;;  %v5637_v61 = vld [vmem:[%s9671_s0 + $0xa8] sm:$0xff] }
 0x2c8   :  { %v1414_v8 = vpop.f32.mrf.mxu2  ;;  %v1941_v43 = vpop.f32.mrf.mxu3 }
 0x2c9   :  { %v7997_v28 = vadd.f32 %v1941_v43, %v1493_v18  ;;  %v7999_v56 = vpop.f32.mrf.mxu1  ;;  %v8001_v14 = vpop.f32.mrf.mxu0  ;;  %v1494_v24 = vadd.f32 %v1414_v8, %v950_v37  ;;  %v5764_v8 = vld [vmem:[%s9671_s0 + $0x99] sm:$0xff] }
 0x2ca   :  { %9817 = vst [vmem:[#allocation86_spill] sm:$0xff] %v8001_v14 }
 0x2cb   :  { %9816 = vst [vmem:[#allocation22_spill] sm:$0xff] %v7997_v28 }
 0x2cc   :  { %5576 = vmatmul.msk.f32.gmra.mxu1 %vm170_vm0, %v8006_v51  ;;  %5953 = vmatmul.msk.f32.gmra.mxu0 %vm170_vm0, %v7881_v52  ;;  %v8031_v52 = vld [vmem:[%s9671_s0 + $0xc2] sm:$0xff] }
 0x2cd   :  { %5700 = vmatmul.msk.f32.gmra.mxu2 %vm170_vm0, %v5636_v29  ;;  %5827 = vmatmul.msk.f32.gmra.mxu3 %vm170_vm0, %v5763_v1  ;;  %v9821_v29 = vld [vmem:[#allocation26_spill] sm:$0xff] }
 0x2ce   :  { %v953_v1 = vadd.f32 %v7899_v58, %v9821_v29  ;;  %v5638_v58 = vld [vmem:[%s9671_s0 + $0xb0] sm:$0xff] }
 0x2d0   :  { %v1417_v20 = vpop.f32.mrf.mxu2  ;;  %v1944_v18 = vpop.f32.mrf.mxu3 }
 0x2d1   :  { %v8022_v43 = vadd.f32 %v1944_v18, %v1494_v24  ;;  %v8024_v28 = vpop.f32.mrf.mxu1  ;;  %v8026_v14 = vpop.f32.mrf.mxu0  ;;  %v1495_v48 = vadd.f32 %v1417_v20, %v953_v1  ;;  %v5765_v20 = vld [vmem:[%s9671_s0 + $0xa9] sm:$0xff] }
 0x2d2   :  { %9820 = vst [vmem:[#allocation87_spill] sm:$0xff] %v8026_v14 }
 0x2d3   :  { %9819 = vst [vmem:[#allocation24_spill] sm:$0xff] %v8022_v43 }
 0x2d4   :  { %5577 = vmatmul.msk.f32.gmra.mxu1 %vm170_vm0, %v8031_v52  ;;  %5954 = vmatmul.msk.f32.gmra.mxu0 %vm170_vm0, %v7906_v44  ;;  %v8056_v44 = vld [vmem:[%s9671_s0 + $0xca] sm:$0xff] }
 0x2d5   :  { %5701 = vmatmul.msk.f32.gmra.mxu2 %vm170_vm0, %v5637_v61  ;;  %5828 = vmatmul.msk.f32.gmra.mxu3 %vm170_vm0, %v5764_v8  ;;  %v9824_v61 = vld [vmem:[#allocation29_spill] sm:$0xff] }
 0x2d6   :  { %v956_v8 = vadd.f32 %v7924_v15, %v9824_v61  ;;  %v5639_v15 = vld [vmem:[%s9671_s0 + $0xc0] sm:$0xff] }
 0x2d8   :  { %v1420_v37 = vpop.f32.mrf.mxu2  ;;  %v1947_v24 = vpop.f32.mrf.mxu3 }
 0x2d9   :  { %v8047_v18 = vadd.f32 %v1947_v24, %v1495_v48  ;;  %v8049_v43 = vpop.f32.mrf.mxu1  ;;  %v8051_v14 = vpop.f32.mrf.mxu0  ;;  %v1496_v29 = vadd.f32 %v1420_v37, %v956_v8  ;;  %v5766_v37 = vld [vmem:[%s9671_s0 + $0xb1] sm:$0xff] }
 0x2da   :  { %9823 = vst [vmem:[#allocation88_spill] sm:$0xff] %v8051_v14 }
 0x2db   :  { %9822 = vst [vmem:[#allocation26_spill] sm:$0xff] %v8047_v18 }
 0x2dc   :  { %5578 = vmatmul.msk.f32.gmra.mxu1 %vm170_vm0, %v8056_v44  ;;  %5955 = vmatmul.msk.f32.gmra.mxu0 %vm170_vm0, %v7931_v17  ;;  %v8081_v17 = vld [vmem:[%s9671_s0 + $0xda] sm:$0xff] }
 0x2dd   :  { %5702 = vmatmul.msk.f32.gmra.mxu2 %vm170_vm0, %v5638_v58  ;;  %5829 = vmatmul.msk.f32.gmra.mxu3 %vm170_vm0, %v5765_v20  ;;  %v9827_v58 = vld [vmem:[#allocation31_spill] sm:$0xff] }
 0x2de   :  { %v959_v20 = vadd.f32 %v7949_v32, %v9827_v58  ;;  %v5640_v32 = vld [vmem:[%s9671_s0 + $0xc8] sm:$0xff] }
 0x2e0   :  { %v1423_v1 = vpop.f32.mrf.mxu2  ;;  %v1950_v48 = vpop.f32.mrf.mxu3 }
 0x2e1   :  { %v8072_v24 = vadd.f32 %v1950_v48, %v1496_v29  ;;  %v8074_v18 = vpop.f32.mrf.mxu0  ;;  %v8076_v14 = vpop.f32.mrf.mxu1  ;;  %v1497_v61 = vadd.f32 %v1423_v1, %v959_v20  ;;  %v5767_v1 = vld [vmem:[%s9671_s0 + $0xc1] sm:$0xff] }
 0x2e2   :  { %9826 = vst [vmem:[#allocation89_spill] sm:$0xff] %v8074_v18 }
 0x2e3   :  { %9825 = vst [vmem:[#allocation29_spill] sm:$0xff] %v8072_v24 }
 0x2e4   :  { %5579 = vmatmul.msk.f32.gmra.mxu1 %vm170_vm0, %v8081_v17  ;;  %5956 = vmatmul.msk.f32.gmra.mxu0 %vm170_vm0, %v7956_v47  ;;  %v8106_v47 = vld [vmem:[%s9671_s0 + $0xe2] sm:$0xff] }
 0x2e5   :  { %5703 = vmatmul.msk.f32.gmra.mxu2 %vm170_vm0, %v5639_v15  ;;  %5830 = vmatmul.msk.f32.gmra.mxu3 %vm170_vm0, %v5766_v37  ;;  %v9830_v15 = vld [vmem:[#allocation33_spill] sm:$0xff] }
 0x2e6   :  { %v962_v37 = vadd.f32 %v7974_v39, %v9830_v15  ;;  %v5641_v39 = vld [vmem:[%s9671_s0 + $0xd8] sm:$0xff] }
 0x2e8   :  { %v1426_v8 = vpop.f32.mrf.mxu2  ;;  %v1953_v29 = vpop.f32.mrf.mxu3 }
 0x2e9   :  { %v8097_v48 = vadd.f32 %v1953_v29, %v1497_v61  ;;  %v8099_v18 = vpop.f32.mrf.mxu0  ;;  %v8101_v24 = vpop.f32.mrf.mxu1  ;;  %v1498_v58 = vadd.f32 %v1426_v8, %v962_v37  ;;  %v5768_v8 = vld [vmem:[%s9671_s0 + $0xc9] sm:$0xff] }
 0x2ea   :  { %9829 = vst [vmem:[#allocation90_spill] sm:$0xff] %v8099_v18 }
 0x2eb   :  { %9828 = vst [vmem:[#allocation31_spill] sm:$0xff] %v8097_v48 }
 0x2ec   :  { %5580 = vmatmul.msk.f32.gmra.mxu1 %vm170_vm0, %v8106_v47  ;;  %5957 = vmatmul.msk.f32.gmra.mxu0 %vm170_vm0, %v7981_v5  ;;  %v8131_v5 = vld [vmem:[%s9671_s0 + $0xf2] sm:$0xff] }
 0x2ed   :  { %5704 = vmatmul.msk.f32.gmra.mxu2 %vm170_vm0, %v5640_v32  ;;  %5831 = vmatmul.msk.f32.gmra.mxu3 %vm170_vm0, %v5767_v1  ;;  %v9833_v32 = vld [vmem:[#allocation35_spill] sm:$0xff] }
 0x2ee   :  { %v965_v1 = vadd.f32 %v7999_v56, %v9833_v32  ;;  %v5642_v56 = vld [vmem:[%s9671_s0 + $0xe0] sm:$0xff] }
 0x2f0   :  { %v1429_v20 = vpop.f32.mrf.mxu2  ;;  %v1956_v61 = vpop.f32.mrf.mxu3 }
 0x2f1   :  { %v8122_v29 = vadd.f32 %v1956_v61, %v1498_v58  ;;  %v8124_v18 = vpop.f32.mrf.mxu0  ;;  %v8126_v48 = vpop.f32.mrf.mxu1  ;;  %v1499_v15 = vadd.f32 %v1429_v20, %v965_v1  ;;  %v5769_v20 = vld [vmem:[%s9671_s0 + $0xd9] sm:$0xff] }
 0x2f2   :  { %9832 = vst [vmem:[#allocation91_spill] sm:$0xff] %v8124_v18 }
 0x2f3   :  { %9831 = vst [vmem:[#allocation33_spill] sm:$0xff] %v8122_v29 }
 0x2f4   :  { %5581 = vmatmul.msk.f32.gmra.mxu1 %vm170_vm0, %v8131_v5  ;;  %5958 = vmatmul.msk.f32.gmra.mxu0 %vm170_vm0, %v8006_v51  ;;  %v8156_v51 = vld [vmem:[%s9671_s0 + $0xfa] sm:$0xff] }
 0x2f5   :  { %5705 = vmatmul.msk.f32.gmra.mxu2 %vm170_vm0, %v5641_v39  ;;  %5832 = vmatmul.msk.f32.gmra.mxu3 %vm170_vm0, %v5768_v8  ;;  %v9836_v39 = vld [vmem:[#allocation37_spill] sm:$0xff] }
 0x2f6   :  { %v968_v8 = vadd.f32 %v8024_v28, %v9836_v39  ;;  %v5643_v28 = vld [vmem:[%s9671_s0 + $0xf0] sm:$0xff] }
 0x2f8   :  { %v1432_v37 = vpop.f32.mrf.mxu2  ;;  %v1959_v58 = vpop.f32.mrf.mxu3 }
 0x2f9   :  { %v8147_v61 = vadd.f32 %v1959_v58, %v1499_v15  ;;  %v8149_v18 = vpop.f32.mrf.mxu0  ;;  %v8151_v29 = vpop.f32.mrf.mxu1  ;;  %v1500_v32 = vadd.f32 %v1432_v37, %v968_v8  ;;  %v5770_v37 = vld [vmem:[%s9671_s0 + $0xe1] sm:$0xff] }
 0x2fa   :  { %9835 = vst [vmem:[#allocation92_spill] sm:$0xff] %v8149_v18 }
 0x2fb   :  { %9834 = vst [vmem:[#allocation35_spill] sm:$0xff] %v8147_v61 }
 0x2fc   :  { %5582 = vmatmul.msk.f32.gmra.mxu1 %vm170_vm0, %v8156_v51  ;;  %5959 = vmatmul.msk.f32.gmra.mxu0 %vm170_vm0, %v8031_v52  ;;  %v8181_v52 = vld [vmem:[%s9671_s0 + $0x10a] sm:$0xff] }
 0x2fd   :  { %5706 = vmatmul.msk.f32.gmra.mxu2 %vm170_vm0, %v5642_v56  ;;  %5833 = vmatmul.msk.f32.gmra.mxu3 %vm170_vm0, %v5769_v20  ;;  %v2497_v56 = vadd.f32 %v6825_v0, %v6803_v45  ;;  %v9839_v20 = vld [vmem:[#allocation38_spill] sm:$0xff] }
 0x2fe   :  { %v971_v39 = vadd.f32 %v8049_v43, %v9839_v20  ;;  %v8209_v45 = vld [vmem:[%s9671_s0 + $0x112] sm:$0xff]  ;;  %v2498_v43 = vadd.f32 %v6843_v54, %v6821_v3  ;;  %v5645_v3 = vld [vmem:[%s9671_s0 + $0x108] sm:$0xff] }
 0x2ff   :  { %v3026_v8 = vadd.f32 %v8076_v14, %v2497_v56  ;;  %v5644_v0 = vld [vmem:[%s9671_s0 + $0xf8] sm:$0xff] }
 0x300   :  { %v1435_v1 = vpop.f32.mrf.mxu2  ;;  %v1962_v15 = vpop.f32.mrf.mxu3  ;;  %v5771_v14 = vld [vmem:[%s9671_s0 + $0xf1] sm:$0xff]  ;;  %v5772_v54 = vld [vmem:[%s9671_s0 + $0xf9] sm:$0xff] }
 0x301   :  { %v8172_v58 = vadd.f32 %v1962_v15, %v1500_v32  ;;  %v8174_v18 = vpop.f32.mrf.mxu0  ;;  %v8176_v61 = vpop.f32.mrf.mxu1  ;;  %v1501_v32 = vadd.f32 %v1435_v1, %v971_v39 }
 0x302   :  { %9838 = vst [vmem:[#allocation93_spill] sm:$0xff] %v8174_v18 }
 0x303   :  { %9837 = vst [vmem:[#allocation37_spill] sm:$0xff] %v8172_v58 }
 0x304   :  { %5583 = vmatmul.msk.f32.gmra.mxu1 %vm170_vm0, %v8181_v52  ;;  %5960 = vmatmul.msk.f32.gmra.mxu0 %vm170_vm0, %v8056_v44 }
 0x305   :  { %5707 = vmatmul.msk.f32.gmra.mxu2 %vm170_vm0, %v5643_v28  ;;  %5834 = vmatmul.msk.f32.gmra.mxu3 %vm170_vm0, %v5770_v37 }
 0x308   :  { %v1965_v15 = vpop.f32.mrf.mxu3  ;;  %v3364_v18 = vpop.f32.mrf.mxu2 }
 0x309   :  { %v8200_v58 = vadd.f32 %v1965_v15, %v1501_v32  ;;  %v3556_v59 = vadd.f32 %v3364_v18, %v3026_v8  ;;  %v8202_v27 = vpop.f32.mrf.mxu0  ;;  %v8204_v44 = vpop.f32.mrf.mxu1  ;;  %v3027_v18 = vadd.f32 %v8101_v24, %v2498_v43 }
 0x30a   :  { %9841 = vst [vmem:[#allocation94_spill] sm:$0xff] %v8202_v27 }
 0x30b   :  { %9840 = vst [vmem:[#allocation38_spill] sm:$0xff] %v8200_v58  ;;  %v5655_v58 = vld [vmem:[%s9671_s0 + $0x180] sm:$0xff] }
 0x30c   :  { %5584 = vmatmul.msk.f32.gmra.mxu1 %vm170_vm0, %v8209_v45  ;;  %5961 = vmatmul.msk.f32.gmra.mxu0 %vm170_vm0, %v8081_v17  ;;  %v8235_v17 = vld [vmem:[%s9671_s0 + $0x122] sm:$0xff] }
 0x30d   :  { %5708 = vmatmul.msk.f32.gmra.mxu2 %vm170_vm0, %v5644_v0  ;;  %5835 = vmatmul.msk.f32.gmra.mxu3 %vm170_vm0, %v5771_v14 }
 0x310   :  { %v3367_v1 = vpop.f32.mrf.mxu2  ;;  %v3893_v28 = vpop.f32.mrf.mxu3 }
 0x311   :  { %v3557_v37 = vadd.f32 %v3367_v1, %v3027_v18  ;;  %v8226_v56 = vadd.f32 %v3893_v28, %v3556_v59  ;;  %v8228_v20 = vpop.f32.mrf.mxu0  ;;  %v8230_v39 = vpop.f32.mrf.mxu1  ;;  %v2499_v59 = vadd.f32 %v6862_v34, %v6839_v7  ;;  %v5646_v7 = vld [vmem:[%s9671_s0 + $0x110] sm:$0xff] }
 0x312   :  { %9843 = vst [vmem:[#allocation96_spill] sm:$0xff] %v8228_v20  ;;  %v5773_v34 = vld [vmem:[%s9671_s0 + $0x109] sm:$0xff] }
 0x313   :  { %9842 = vst [vmem:[#allocation95_spill] sm:$0xff] %v8226_v56  ;;  %v3028_v24 = vadd.f32 %v8126_v48, %v2499_v59  ;;  %v2500_v48 = vadd.f32 %v6881_v4, %v6858_v23  ;;  %v5647_v23 = vld [vmem:[%s9671_s0 + $0x120] sm:$0xff]  ;;  %v5774_v4 = vld [vmem:[%s9671_s0 + $0x111] sm:$0xff] }
 0x314   :  { %5585 = vmatmul.msk.f32.gmra.mxu1 %vm170_vm0, %v8235_v17  ;;  %5962 = vmatmul.msk.f32.gmra.mxu0 %vm170_vm0, %v8106_v47  ;;  %v8261_v47 = vld [vmem:[%s9671_s0 + $0x12a] sm:$0xff]  ;;  %v5532_v56 = vld [vmem:[%s9671_s0 + $0x1d2] sm:$0xff] }
 0x315   :  { %5709 = vmatmul.msk.f32.gmra.mxu2 %vm170_vm0, %v5645_v3  ;;  %5836 = vmatmul.msk.f32.gmra.mxu3 %vm170_vm0, %v5772_v54  ;;  %v3029_v18 = vadd.f32 %v8151_v29, %v2500_v48  ;;  %v2501_v29 = vadd.f32 %v6900_v62, %v6877_v36  ;;  %v5648_v36 = vld [vmem:[%s9671_s0 + $0x128] sm:$0xff] }
 0x316   :  { %v5775_v62 = vld [vmem:[%s9671_s0 + $0x121] sm:$0xff]  ;;  %v5531_v20 = vld [vmem:[%s9671_s0 + $0x1ca] sm:$0xff] }
 0x318   :  { %v3370_v8 = vpop.f32.mrf.mxu2  ;;  %v3896_v32 = vpop.f32.mrf.mxu3 }
 0x319   :  { %v3558_v15 = vadd.f32 %v3370_v8, %v3028_v24  ;;  %v8252_v0 = vadd.f32 %v3896_v32, %v3557_v37  ;;  %v8254_v14 = vpop.f32.mrf.mxu1  ;;  %v8256_v43 = vpop.f32.mrf.mxu0  ;;  %v3030_v24 = vadd.f32 %v8176_v61, %v2501_v29  ;;  %v2502_v61 = vadd.f32 %v6919_v50, %v6896_v49  ;;  %v5649_v49 = vld [vmem:[%s9671_s0 + $0x138] sm:$0xff]  ;;  %v5776_v50 = vld [vmem:[%s9671_s0 + $0x129] sm:$0xff] }
 0x31a   :  { %9845 = vst [vmem:[#allocation98_spill] sm:$0xff] %v8256_v43 }
 0x31b   :  { %9844 = vst [vmem:[#allocation97_spill] sm:$0xff] %v8252_v0  ;;  %v8525_v0 = vld [vmem:[%s9671_s0 + $0x1e2] sm:$0xff] }
 0x31c   :  { %5586 = vmatmul.msk.f32.gmra.mxu1 %vm170_vm0, %v8261_v47  ;;  %5963 = vmatmul.msk.f32.gmra.mxu0 %vm170_vm0, %v8131_v5  ;;  %v8287_v5 = vld [vmem:[%s9671_s0 + $0x13a] sm:$0xff] }
 0x31d   :  { %5710 = vmatmul.msk.f32.gmra.mxu2 %vm170_vm0, %v5646_v7  ;;  %5837 = vmatmul.msk.f32.gmra.mxu3 %vm170_vm0, %v5773_v34 }
 0x320   :  { %v3373_v1 = vpop.f32.mrf.mxu2  ;;  %v3899_v28 = vpop.f32.mrf.mxu3 }
 0x321   :  { %v3559_v37 = vadd.f32 %v3373_v1, %v3029_v18  ;;  %v8278_v3 = vadd.f32 %v3899_v28, %v3558_v15  ;;  %v8280_v54 = vpop.f32.mrf.mxu1  ;;  %v8282_v59 = vpop.f32.mrf.mxu0  ;;  %v3031_v18 = vadd.f32 %v8204_v44, %v2502_v61  ;;  %v2503_v44 = vadd.f32 %v6938_v53, %v6915_v57  ;;  %v5650_v57 = vld [vmem:[%s9671_s0 + $0x140] sm:$0xff] }
 0x322   :  { %9847 = vst [vmem:[#allocation100_spill] sm:$0xff] %v8282_v59  ;;  %v5777_v53 = vld [vmem:[%s9671_s0 + $0x139] sm:$0xff] }
 0x323   :  { %9846 = vst [vmem:[#allocation99_spill] sm:$0xff] %v8278_v3 }
 0x324   :  { %5587 = vmatmul.msk.f32.gmra.mxu1 %vm170_vm0, %v8287_v5  ;;  %5964 = vmatmul.msk.f32.gmra.mxu0 %vm170_vm0, %v8156_v51  ;;  %v8313_v51 = vld [vmem:[%s9671_s0 + $0x142] sm:$0xff] }
 0x325   :  { %5711 = vmatmul.msk.f32.gmra.mxu2 %vm170_vm0, %v5647_v23  ;;  %5838 = vmatmul.msk.f32.gmra.mxu3 %vm170_vm0, %v5774_v4 }
 0x328   :  { %v3376_v8 = vpop.f32.mrf.mxu2  ;;  %v3902_v32 = vpop.f32.mrf.mxu3 }
 0x329   :  { %v3560_v15 = vadd.f32 %v3376_v8, %v3030_v24  ;;  %v8304_v7 = vadd.f32 %v3902_v32, %v3559_v37  ;;  %v8306_v34 = vpop.f32.mrf.mxu1  ;;  %v8308_v48 = vpop.f32.mrf.mxu0  ;;  %v3032_v24 = vadd.f32 %v8230_v39, %v2503_v44  ;;  %v2504_v39 = vadd.f32 %v6957_v42, %v6934_v63  ;;  %v5651_v63 = vld [vmem:[%s9671_s0 + $0x150] sm:$0xff]  ;;  %v5778_v42 = vld [vmem:[%s9671_s0 + $0x141] sm:$0xff] }
 0x32a   :  { %9849 = vst [vmem:[#allocation102_spill] sm:$0xff] %v8308_v48 }
 0x32b   :  { %9848 = vst [vmem:[#allocation101_spill] sm:$0xff] %v8304_v7 }
 0x32c   :  { %5588 = vmatmul.msk.f32.gmra.mxu1 %vm170_vm0, %v8313_v51  ;;  %5965 = vmatmul.msk.f32.gmra.mxu0 %vm170_vm0, %v8181_v52  ;;  %v8339_v52 = vld [vmem:[%s9671_s0 + $0x152] sm:$0xff] }
 0x32d   :  { %5712 = vmatmul.msk.f32.gmra.mxu2 %vm170_vm0, %v5648_v36  ;;  %5839 = vmatmul.msk.f32.gmra.mxu3 %vm170_vm0, %v5775_v62 }
 0x330   :  { %v3379_v1 = vpop.f32.mrf.mxu2  ;;  %v3905_v28 = vpop.f32.mrf.mxu3 }
 0x331   :  { %v3561_v37 = vadd.f32 %v3379_v1, %v3031_v18  ;;  %v8330_v23 = vadd.f32 %v3905_v28, %v3560_v15  ;;  %v8332_v4 = vpop.f32.mrf.mxu1  ;;  %v8334_v29 = vpop.f32.mrf.mxu0  ;;  %v3033_v18 = vadd.f32 %v8254_v14, %v2504_v39  ;;  %v2505_v14 = vadd.f32 %v6976_v2, %v6953_v19  ;;  %v5652_v19 = vld [vmem:[%s9671_s0 + $0x158] sm:$0xff] }
 0x332   :  { %9851 = vst [vmem:[#allocation104_spill] sm:$0xff] %v8334_v29  ;;  %v5779_v2 = vld [vmem:[%s9671_s0 + $0x151] sm:$0xff] }
 0x333   :  { %9850 = vst [vmem:[#allocation103_spill] sm:$0xff] %v8330_v23  ;;  %v8547_v29 = vld [vmem:[%s9671_s0 + $0x1ea] sm:$0xff] }
 0x334   :  { %5589 = vmatmul.msk.f32.gmra.mxu1 %vm170_vm0, %v8339_v52  ;;  %5966 = vmatmul.msk.f32.gmra.mxu0 %vm170_vm0, %v8209_v45  ;;  %v8365_v45 = vld [vmem:[%s9671_s0 + $0x15a] sm:$0xff]  ;;  %9858 = vst [vmem:[#allocation111_spill] sm:$0xff] %v8547_v29 }
 0x335   :  { %5713 = vmatmul.msk.f32.gmra.mxu2 %vm170_vm0, %v5649_v49  ;;  %5840 = vmatmul.msk.f32.gmra.mxu3 %vm170_vm0, %v5776_v50 }
 0x338   :  { %v3382_v8 = vpop.f32.mrf.mxu2  ;;  %v3908_v32 = vpop.f32.mrf.mxu3 }
 0x339   :  { %v3562_v15 = vadd.f32 %v3382_v8, %v3032_v24  ;;  %v8356_v36 = vadd.f32 %v3908_v32, %v3561_v37  ;;  %v8358_v62 = vpop.f32.mrf.mxu1  ;;  %v8360_v61 = vpop.f32.mrf.mxu0  ;;  %v3034_v24 = vadd.f32 %v8280_v54, %v2505_v14 }
 0x33a   :  { %9853 = vst [vmem:[#allocation106_spill] sm:$0xff] %v8360_v61 }
 0x33b   :  { %9852 = vst [vmem:[#allocation105_spill] sm:$0xff] %v8356_v36 }
 0x33c   :  { %5590 = vmatmul.msk.f32.gmra.mxu1 %vm170_vm0, %v8365_v45  ;;  %5967 = vmatmul.msk.f32.gmra.mxu0 %vm170_vm0, %v8235_v17  ;;  %v8391_v17 = vld [vmem:[%s9671_s0 + $0x16a] sm:$0xff] }
 0x33d   :  { %5714 = vmatmul.msk.f32.gmra.mxu2 %vm170_vm0, %v5650_v57  ;;  %5841 = vmatmul.msk.f32.gmra.mxu3 %vm170_vm0, %v5777_v53 }
 0x340   :  { %v3385_v1 = vpop.f32.mrf.mxu2  ;;  %v3911_v28 = vpop.f32.mrf.mxu3 }
 0x341   :  { %v3563_v37 = vadd.f32 %v3385_v1, %v3033_v18  ;;  %v8382_v49 = vadd.f32 %v3911_v28, %v3562_v15  ;;  %v8384_v50 = vpop.f32.mrf.mxu1  ;;  %v8386_v44 = vpop.f32.mrf.mxu0 }
 0x342   :  { %9855 = vst [vmem:[#allocation108_spill] sm:$0xff] %v8386_v44 }
 0x343   :  { %9854 = vst [vmem:[#allocation107_spill] sm:$0xff] %v8382_v49 }
 0x344   :  { %5591 = vmatmul.msk.f32.gmra.mxu1 %vm170_vm0, %v8391_v17  ;;  %5968 = vmatmul.msk.f32.gmra.mxu0 %vm170_vm0, %v8261_v47  ;;  %v5528_v47 = vld [vmem:[%s9671_s0 + $0x172] sm:$0xff] }
 0x345   :  { %5715 = vmatmul.msk.f32.gmra.mxu2 %vm170_vm0, %v5651_v63  ;;  %5842 = vmatmul.msk.f32.gmra.mxu3 %vm170_vm0, %v5778_v42  ;;  %v5529_v63 = vld [vmem:[%s9671_s0 + $0x182] sm:$0xff]  ;;  %v5780_v42 = vld [vmem:[%s9671_s0 + $0x159] sm:$0xff] }
 0x348   :  { %v3388_v8 = vpop.f32.mrf.mxu2  ;;  %v3914_v32 = vpop.f32.mrf.mxu3 }
 0x349   :  { %v3564_v15 = vadd.f32 %v3388_v8, %v3034_v24  ;;  %v8408_v57 = vadd.f32 %v3914_v32, %v3563_v37  ;;  %v8410_v53 = vpop.f32.mrf.mxu1  ;;  %v8412_v39 = vpop.f32.mrf.mxu0 }
 0x34a   :  { %9856 = vst [vmem:[#allocation109_spill] sm:$0xff] %v8412_v39 }
 0x34c   :  { %5592 = vmatmul.msk.f32.gmra.mxu1 %vm170_vm0, %v5528_v47  ;;  %5969 = vmatmul.msk.f32.gmra.mxu0 %vm170_vm0, %v8287_v5  ;;  %v5653_v5 = vld [vmem:[%s9671_s0 + $0x168] sm:$0xff] }
 0x34d   :  { %5716 = vmatmul.msk.f32.gmra.mxu2 %vm170_vm0, %v5652_v19  ;;  %5843 = vmatmul.msk.f32.gmra.mxu3 %vm170_vm0, %v5779_v2  ;;  %v5781_v19 = vld [vmem:[%s9671_s0 + $0x169] sm:$0xff] }
 0x350   :  { %v8428_v54 = vpop.f32.mrf.mxu2  ;;  %v3917_v18 = vpop.f32.mrf.mxu3 }
 0x351   :  { %v8430_v1 = vadd.f32 %v3917_v18, %v3564_v15  ;;  %v8432_v28 = vpop.f32.mrf.mxu1  ;;  %v8434_v37 = vpop.f32.mrf.mxu0  ;;  %v5530_v15 = vld [vmem:[%s9671_s0 + $0x18a] sm:$0xff] }
 0x352   :  { %9857 = vst [vmem:[#allocation110_spill] sm:$0xff] %v8434_v37 }
 0x354   :  { %5593 = vmatmul.msk.f32.gmra.mxu1 %vm170_vm0, %v5529_v63  ;;  %5970 = vmatmul.msk.f32.gmra.mxu0 %vm170_vm0, %v8313_v51  ;;  %v5654_v51 = vld [vmem:[%s9671_s0 + $0x170] sm:$0xff] }
 0x355   :  { %5717 = vmatmul.msk.f32.gmra.mxu2 %vm170_vm0, %v5653_v5  ;;  %5844 = vmatmul.msk.f32.gmra.mxu3 %vm170_vm0, %v5780_v42 }
 0x358   :  { %v8450_v14 = vpop.f32.mrf.mxu2  ;;  %v8452_v24 = vpop.f32.mrf.mxu3 }
 0x359   :  { %v8454_v8 = vpop.f32.mrf.mxu1  ;;  %v8456_v32 = vpop.f32.mrf.mxu0 }
 0x35c   :  { %5594 = vmatmul.msk.f32.gmra.mxu1 %vm170_vm0, %v5530_v15  ;;  %5971 = vmatmul.msk.f32.gmra.mxu0 %vm170_vm0, %v8339_v52  ;;  %v5782_v52 = vld [vmem:[%s9671_s0 + $0x171] sm:$0xff] }
 0x35d   :  { %5718 = vmatmul.msk.f32.gmra.mxu2 %vm170_vm0, %v5654_v51  ;;  %5845 = vmatmul.msk.f32.gmra.mxu3 %vm170_vm0, %v5781_v19 }
 0x360   :  { %v8472_v2 = vpop.f32.mrf.mxu2  ;;  %v8474_v18 = vpop.f32.mrf.mxu3 }
 0x361   :  { %v2882_v5 = vpop.f32.mrf.mxu1  ;;  %v8476_v42 = vpop.f32.mrf.mxu0 }
 0x364   :  { %5595 = vmatmul.msk.f32.gmra.mxu1 %vm170_vm0, %v5531_v20  ;;  %5972 = vmatmul.msk.f32.gmra.mxu0 %vm170_vm0, %v8365_v45  ;;  %v5656_v20 = vld [vmem:[%s9671_s0 + $0x188] sm:$0xff] }
 0x365   :  { %5719 = vmatmul.msk.f32.gmra.mxu2 %vm170_vm0, %v5655_v58  ;;  %5846 = vmatmul.msk.f32.gmra.mxu3 %vm170_vm0, %v5782_v52  ;;  %v5783_v58 = vld [vmem:[%s9671_s0 + $0x181] sm:$0xff] }
 0x368   :  { %v8492_v51 = vpop.f32.mrf.mxu2  ;;  %v8494_v19 = vpop.f32.mrf.mxu3 }
 0x369   :  { %v8496_v27 = vpop.f32.mrf.mxu1  ;;  %v8498_v43 = vpop.f32.mrf.mxu0 }
 0x36c   :  { %5596 = vmatmul.msk.f32.gmra.mxu1 %vm170_vm0, %v5532_v56  ;;  %5973 = vmatmul.msk.f32.gmra.mxu0 %vm170_vm0, %v8391_v17  ;;  %v5657_v56 = vld [vmem:[%s9671_s0 + $0x198] sm:$0xff]  ;;  %v5784_v17 = vld [vmem:[%s9671_s0 + $0x189] sm:$0xff] }
 0x36d   :  { %5720 = vmatmul.msk.f32.gmra.mxu2 %vm170_vm0, %v5656_v20  ;;  %5847 = vmatmul.msk.f32.gmra.mxu3 %vm170_vm0, %v5783_v58 }
 0x370   :  { %v8514_v45 = vpop.f32.mrf.mxu2  ;;  %v8516_v52 = vpop.f32.mrf.mxu3 }
 0x371   :  { %v8518_v11 = vpop.f32.mrf.mxu1  ;;  %v8520_v59 = vpop.f32.mrf.mxu0 }
 0x374   :  { %5597 = vmatmul.msk.f32.gmra.mxu1 %vm170_vm0, %v8525_v0  ;;  %5974 = vmatmul.msk.f32.gmra.mxu0 %vm170_vm0, %v5528_v47  ;;  %v5658_v47 = vld [vmem:[%s9671_s0 + $0x1a0] sm:$0xff] }
 0x375   :  { %5721 = vmatmul.msk.f32.gmra.mxu2 %vm170_vm0, %v5657_v56  ;;  %5848 = vmatmul.msk.f32.gmra.mxu3 %vm170_vm0, %v5784_v17  ;;  %v5785_v56 = vld [vmem:[%s9671_s0 + $0x199] sm:$0xff] }
 0x378   :  { %v3406_v20 = vpop.f32.mrf.mxu2  ;;  %v8538_v58 = vpop.f32.mrf.mxu3 }
 0x379   :  { %v8540_v48 = vpop.f32.mrf.mxu1  ;;  %v8542_v3 = vpop.f32.mrf.mxu0 }
 0x37c   :  { %5598 = vmatmul.msk.f32.gmra.mxu1 %vm170_vm0, %v8547_v29  ;;  %5975 = vmatmul.msk.f32.gmra.mxu0 %vm170_vm0, %v5529_v63  ;;  %v5659_v29 = vld [vmem:[%s9671_s0 + $0x1e0] sm:$0xff] }
 0x37d   :  { %5722 = vmatmul.msk.f32.gmra.mxu2 %vm170_vm0, %v5658_v47  ;;  %5849 = vmatmul.msk.f32.gmra.mxu3 %vm170_vm0, %v5785_v56  ;;  %v5786_v63 = vld [vmem:[%s9671_s0 + $0x1a1] sm:$0xff]  ;;  %v2513_v47 = vadd.f32 %v7140_v41, %v7115_v31  ;;  %v2512_v31 = vadd.f32 %v7119_v6, %v7094_v26  ;;  %v2509_v6 = vadd.f32 %v7052_v25, %v7029_v30  ;;  %v9860_v30 = vld [vmem:[#allocation41_spill] sm:$0xff] }
 0x37e   :  { %v5913_v41 = vld [vmem:[%s9671_s0 + $0x19a] sm:$0xff]  ;;  %v2514_v26 = vadd.f32 %v7161_v10, %v7136_v12  ;;  %v2507_v25 = vadd.f32 %v9860_v30, %v6991_v13  ;;  %v8630_v13 = vld [vmem:[%s9671_s0 + $0x212] sm:$0xff] }
 0x37f   :  { %v3042_v56 = vadd.f32 %v2882_v5, %v2513_v47  ;;  %v3041_v5 = vadd.f32 %v8454_v8, %v2512_v31  ;;  %v3038_v8 = vadd.f32 %v8384_v50, %v2509_v6  ;;  %v9864_v6 = vld [vmem:[#allocation42_spill] sm:$0xff] }
 0x380   :  { %v3409_v17 = vpop.f32.mrf.mxu2  ;;  %v3935_v7 = vpop.f32.mrf.mxu3 }
 0x381   :  { %v8560_v61 = vpop.f32.mrf.mxu1  ;;  %v4461_v23 = vpop.f32.mrf.mxu0 }
 0x382   :  { %9859 = vst [vmem:[#allocation112_spill] sm:$0xff] %v8560_v61  ;;  %v2511_v61 = vadd.f32 %v7098_v46, %v7070_v60  ;;  %v5660_v46 = vld [vmem:[%s9671_s0 + $0x1e8] sm:$0xff] }
 0x384   :  { %5599 = vmatmul.msk.f32.gmra.mxu1 %vm170_vm0, %v8565_v55  ;;  %5976 = vmatmul.msk.f32.gmra.mxu0 %vm170_vm0, %v5530_v15  ;;  %v8587_v15 = vld [vmem:[%s9671_s0 + $0x202] sm:$0xff]  ;;  %v3040_v60 = vadd.f32 %v8432_v28, %v2511_v61  ;;  %v2508_v28 = vadd.f32 %v7033_v40, %v7010_v9 }
 0x385   :  { %5723 = vmatmul.msk.f32.gmra.mxu2 %vm170_vm0, %v5659_v29  ;;  %5850 = vmatmul.msk.f32.gmra.mxu3 %vm170_vm0, %v5786_v63  ;;  %v5787_v29 = vld [vmem:[%s9671_s0 + $0x1e1] sm:$0xff] }
 0x386   :  { %v3570_v63 = vadd.f32 %v3406_v20, %v3040_v60  ;;  %v3043_v20 = vadd.f32 %v8496_v27, %v2514_v26  ;;  %v5914_v27 = vld [vmem:[%s9671_s0 + $0x1a2] sm:$0xff]  ;;  %v2515_v26 = vadd.f32 %v7182_v38, %v9864_v6 }
 0x388   :  { %v3412_v44 = vpop.f32.mrf.mxu2  ;;  %v3938_v36 = vpop.f32.mrf.mxu3  ;;  %v4099_v61 = vadd.f32 %v3935_v7, %v3570_v63  ;;  %v3568_v7 = vadd.f32 %v8492_v51, %v3038_v8  ;;  %v9862_v51 = vld [vmem:[#allocation39_spill] sm:$0xff] }
 0x389   :  { %v3572_v39 = vadd.f32 %v3412_v44, %v3042_v56  ;;  %v8582_v49 = vpop.f32.mrf.mxu1  ;;  %v4464_v37 = vpop.f32.mrf.mxu0  ;;  %v2510_v44 = vadd.f32 %v7074_v33, %v7048_v16  ;;  %v3571_v33 = vadd.f32 %v3409_v17, %v3041_v5 }
 0x38a   :  { %v4628_v47 = vadd.f32 %v4464_v37, %v4099_v61  ;;  %v5788_v37 = vld [vmem:[%s9671_s0 + $0x1e9] sm:$0xff]  ;;  %v3044_v61 = vadd.f32 %v8518_v11, %v2515_v26  ;;  %v8679_v11 = vld [vmem:[%s9671_s0 + $0x21a] sm:$0xff] }
 0x38b   :  { %v3039_v16 = vadd.f32 %v8410_v53, %v2510_v44  ;;  %v4100_v12 = vadd.f32 %v3938_v36, %v3571_v33  ;;  %v3037_v53 = vadd.f32 %v8358_v62, %v2508_v28  ;;  %v8638_v36 = vld [vmem:[%s9673_s2] ss:$0 sm:$0xff]  ;;  %v4097_v44 = vadd.f32 %v8516_v52, %v3568_v7 }
 0x38c   :  { %5600 = vmatmul.msk.f32.gmra.mxu1 %vm170_vm0, %v8587_v15  ;;  %5977 = vmatmul.msk.f32.gmra.mxu0 %vm170_vm0, %v5913_v41  ;;  %v9875_v26 = vld [vmem:[#allocation111_spill] sm:$0xff] }
 0x38d   :  { %5724 = vmatmul.msk.f32.gmra.mxu2 %vm170_vm0, %v5660_v46  ;;  %5851 = vmatmul.msk.f32.gmra.mxu3 %vm170_vm0, %v5787_v29  ;;  %v3569_v10 = vadd.f32 %v8514_v45, %v3039_v16  ;;  %v9863_v45 = vld [vmem:[#allocation40_spill] sm:$0xff]  ;;  %v3036_v46 = vadd.f32 %v8332_v4, %v2507_v25  ;;  %v3567_v29 = vadd.f32 %v8472_v2, %v3037_v53 }
 0x38e   :  { %v2506_v60 = vadd.f32 %v9863_v45, %v9862_v51  ;;  %v4626_v2 = vadd.f32 %v8542_v3, %v4097_v44  ;;  %v4622_v53 = vadd.f32 %v8456_v32, %v8430_v1  ;;  %v9871_v45 = vld [vmem:[#allocation107_spill] sm:$0xff] }
 0x38f   :  { %v4098_v62 = vadd.f32 %v8538_v58, %v3569_v10  ;;  %v4696_v58 = vadd.f32 %v8638_v36, %v4628_v47  ;;  %v4096_v4 = vadd.f32 %v8494_v19, %v3567_v29  ;;  %v5662_v10 = vld [vmem:[%s9671_s0 + $0x200] sm:$0xff]  ;;  %v5663_v29 = vld [vmem:[%s9671_s0 + $0x210] sm:$0xff] }
 0x390   :  { %v3415_v56 = vpop.f32.mrf.mxu2  ;;  %v3941_v41 = vpop.f32.mrf.mxu3  ;;  %v3035_v16 = vadd.f32 %v8306_v34, %v2506_v60  ;;  %v5790_v44 = vld [vmem:[%s9671_s0 + $0x201] sm:$0xff] }
 0x391   :  { %v3573_v17 = vadd.f32 %v3415_v56, %v3043_v20  ;;  %v8623_v31 = vadd.f32 %v3941_v41, %v3572_v39  ;;  %v8625_v9 = vpop.f32.mrf.mxu1  ;;  %v4467_v40 = vpop.f32.mrf.mxu0  ;;  %v5661_v39 = vld [vmem:[%s9671_s0 + $0x1f8] sm:$0xff]  ;;  %v4627_v5 = vadd.f32 %v4461_v23, %v4098_v62  ;;  %v3566_v23 = vadd.f32 %v8450_v14, %v3036_v46  ;;  %v8721_v46 = vld [vmem:[%s9671_s0 + $0x22a] sm:$0xff] }
 0x392   :  { %v4629_v50 = vadd.f32 %v4467_v40, %v4100_v12  ;;  %v3565_v33 = vadd.f32 %v8428_v54, %v3035_v16  ;;  %v4625_v38 = vadd.f32 %v8520_v59, %v4096_v4  ;;  %v4760_v30 = vmax.f32 %v4696_v58, 0.0  ;;  %v5789_v12 = vld [vmem:[%s9671_s0 + $0x1f9] sm:$0xff]  ;;  %v9874_v58 = vld [vmem:[#allocation108_spill] sm:$0xff] }
 0x393   :  { %9861 = vst [vmem:[#allocation41_spill] sm:$0xff] %v8623_v31  ;;  %v4095_v28 = vadd.f32 %v8474_v18, %v3566_v23  ;;  %v4695_v34 = vadd.f32 %v8638_v36, %v4627_v5  ;;  %v4694_v18 = vadd.f32 %v8638_v36, %v4626_v2  ;;  %v9868_v40 = vld [vmem:[#allocation110_spill] sm:$0xff]  ;;  %v9873_v5 = vld [vmem:[#allocation105_spill] sm:$0xff]  ;;  %v9876_v23 = vld [vmem:[#allocation44_spill] sm:$0xff] }
 0x394   :  { %v4697_v63 = vadd.f32 %v8638_v36, %v4629_v50  ;;  %5601 = vmatmul.msk.f32.gmra.mxu1 %vm170_vm0, %v8630_v13  ;;  %5978 = vmatmul.msk.f32.gmra.mxu0 %vm170_vm0, %v5914_v27  ;;  %v4094_v59 = vadd.f32 %v8452_v24, %v3565_v33  ;;  %v4693_v56 = vadd.f32 %v8638_v36, %v4625_v38  ;;  %v9867_v24 = vld [vmem:[#allocation43_spill] sm:$0xff]  ;;  %v9877_v4 = vld [vmem:[#allocation46_spill] sm:$0xff] }
 0x395   :  { %5725 = vmatmul.msk.f32.gmra.mxu2 %vm170_vm0, %v5661_v39  ;;  %5852 = vmatmul.msk.f32.gmra.mxu3 %vm170_vm0, %v5788_v37  ;;  %v4624_v54 = vadd.f32 %v8498_v43, %v4095_v28  ;;  %v4759_v43 = vmax.f32 %v4695_v34, 0.0  ;;  %v2516_v41 = vadd.f32 %v7203_v22, %v9867_v24  ;;  %v4758_v7 = vmax.f32 %v4694_v18, 0.0  ;;  %v9879_v33 = vld [vmem:[#allocation106_spill] sm:$0xff]  ;;  %v9880_v34 = vld [vmem:[#allocation112_spill] sm:$0xff]  ;;  %v9884_v24 = vld [vmem:[#allocation99_spill] sm:$0xff] }
 0x396   :  { %v4761_v52 = vmax.f32 %v4697_v63, 0.0  ;;  %v4623_v47 = vadd.f32 %v8476_v42, %v4094_v59  ;;  %v4621_v27 = vadd.f32 %v9868_v40, %v8408_v57  ;;  %v4757_v39 = vmax.f32 %v4693_v56, 0.0  ;;  %v5791_v40 = vld [vmem:[%s9671_s0 + $0x211] sm:$0xff] }
 0x397   :  { %v4692_v42 = vadd.f32 %v8638_v36, %v4624_v54  ;;  %v4619_v63 = vadd.f32 %v9874_v58, %v9873_v5  ;;  %v2517_v2 = vadd.f32 %v9877_v4, %v9876_v23 }
 0x398   :  { %v3418_v8 = vpop.f32.mrf.mxu2  ;;  %v3944_v20 = vpop.f32.mrf.mxu3  ;;  %4821 = vmatpush.msrb.mxu1 %v4761_v52  ;;  %v4691_v22 = vadd.f32 %v8638_v36, %v4623_v47  ;;  %v4689_v6 = vadd.f32 %v8638_v36, %v4621_v27  ;;  %v9878_v52 = vld [vmem:[#allocation103_spill] sm:$0xff]  ;;  %v9886_v27 = vld [vmem:[#allocation97_spill] sm:$0xff] }
 0x399   :  { %v3574_v14 = vadd.f32 %v3418_v8, %v3044_v61  ;;  %v8670_v25 = vadd.f32 %v3944_v20, %v3573_v17  ;;  %v8672_v19 = vpop.f32.mrf.mxu1  ;;  %v8674_v3 = vpop.f32.mrf.mxu0  ;;  %v3045_v17 = vadd.f32 %v8540_v48, %v2516_v41  ;;  %v9872_v48 = vld [vmem:[#allocation109_spill] sm:$0xff]  ;;  %v4756_v57 = vmax.f32 %v4692_v42, 0.0  ;;  %v9885_v41 = vld [vmem:[#allocation102_spill] sm:$0xff] }
 0x39a   :  { %9866 = vst [vmem:[#allocation40_spill] sm:$0xff] %v8674_v3  ;;  %4822 = vmatpush.msrb.mxu1 %v4760_v30  ;;  %v4620_v60 = vadd.f32 %v9872_v48, %v9871_v45  ;;  %v4755_v16 = vmax.f32 %v4691_v22, 0.0  ;;  %v4618_v61 = vadd.f32 %v9879_v33, %v9878_v52  ;;  %v3046_v8 = vadd.f32 %v9880_v34, %v2517_v2  ;;  %v9881_v20 = vld [vmem:[#allocation101_spill] sm:$0xff]  ;;  %v9882_v30 = vld [vmem:[#allocation104_spill] sm:$0xff]  ;;  %v9890_v48 = vld [vmem:[#allocation95_spill] sm:$0xff] }
 0x39b   :  { %9865 = vst [vmem:[#allocation39_spill] sm:$0xff] %v8670_v25  ;;  %v4687_v59 = vadd.f32 %v8638_v36, %v4619_v63  ;;  %v9887_v22 = vld [vmem:[#allocation100_spill] sm:$0xff]  ;;  %v5792_v33 = vld [vmem:[%s9671_s0 + $0x219] sm:$0xff] }
 0x39c   :  { %5602 = vmatmul.msk.f32.gmra.mxu1 %vm170_vm0, %v8679_v11  ;;  %5979 = vmatmul.msk.f32.gmra.mxu0 %vm170_vm0, %v8525_v0  ;;  %v2521_v0 = vadd.f32 %v7308_v21, %v7283_v35  ;;  %v4690_v21 = vadd.f32 %v8638_v36, %v4622_v53  ;;  %v4688_v28 = vadd.f32 %v8638_v36, %v4620_v60  ;;  %v9891_v60 = vld [vmem:[#allocation98_spill] sm:$0xff]  ;;  %v5665_v52 = vld [vmem:[%s9671_s0 + $0x228] sm:$0xff]  ;;  %v9903_v25 = vld [vmem:[#allocation59_spill] sm:$0xff] }
 0x39d   :  { %5726 = vmatmul.msk.f32.gmra.mxu2 %vm170_vm0, %v5662_v10  ;;  %5853 = vmatmul.msk.f32.gmra.mxu3 %vm170_vm0, %v5789_v12  ;;  %v4753_v10 = vmax.f32 %v4689_v6, 0.0  ;;  %v4616_v53 = vadd.f32 %v9885_v41, %v9884_v24  ;;  %v4686_v42 = vadd.f32 %v8638_v36, %v4618_v61  ;;  %v9894_v24 = vld [vmem:[#allocation49_spill] sm:$0xff]  ;;  %v9895_v41 = vld [vmem:[#allocation51_spill] sm:$0xff] }
 0x39e   :  { %4823 = vmatpush.msrb.mxu1 %v4759_v43  ;;  %v4754_v38 = vmax.f32 %v4690_v21, 0.0  ;;  %v4614_v21 = vadd.f32 %v9891_v60, %v9890_v48 }
 0x3a0   :  { %4824 = vmatpush.msrb.mxu1 %v4758_v7  ;;  %v3421_v62 = vpop.f32.mrf.mxu2  ;;  %v3947_v50 = vpop.f32.mrf.mxu3  ;;  %v4752_v7 = vmax.f32 %v4688_v28, 0.0  ;;  %v4682_v4 = vadd.f32 %v8638_v36, %v4614_v21  ;;  %v9892_v28 = vld [vmem:[#allocation47_spill] sm:$0xff]  ;;  %v5668_v21 = vld [vmem:[%s9671_s0 + $0x248] sm:$0xff] }
 0x3a1   :  { %v3575_v37 = vadd.f32 %v3421_v62, %v3045_v17  ;;  %v8709_v1 = vadd.f32 %v3947_v50, %v3574_v14  ;;  %v2906_v32 = vpop.f32.mrf.mxu1  ;;  %v8711_v51 = vpop.f32.mrf.mxu0  ;;  %v4617_v14 = vadd.f32 %v9882_v30, %v9881_v20  ;;  %v8759_v17 = vld [vmem:[%s9671_s0 + $0x232] sm:$0xff]  ;;  %v4615_v62 = vadd.f32 %v9887_v22, %v9886_v27 }
 0x3a2   :  { %9870 = vst [vmem:[#allocation43_spill] sm:$0xff] %v8711_v51  ;;  %4825 = vmatpush.msrb.mxu1 %v4757_v39  ;;  %v8716_v35 = vadd.f32 %v2906_v32, %v2521_v0  ;;  %v5664_v0 = vld [vmem:[%s9671_s0 + $0x218] sm:$0xff]  ;;  %v4751_v39 = vmax.f32 %v4687_v59, 0.0  ;;  %v9889_v32 = vld [vmem:[#allocation48_spill] sm:$0xff] }
 0x3a3   :  { %9869 = vst [vmem:[#allocation42_spill] sm:$0xff] %v8709_v1  ;;  %v4685_v50 = vadd.f32 %v8638_v36, %v4617_v14  ;;  %v9906_v1 = vld [vmem:[#allocation63_spill] sm:$0xff] }
 0x3a4   :  { %4826 = vmatpush.msrb.mxu1 %v4756_v57  ;;  %5980 = vmatmul.msk.f32.gmra.mxu0 %vm170_vm0, %v9875_v26  ;;  %v4684_v57 = vadd.f32 %v8638_v36, %v4616_v53  ;;  %v2520_v53 = vadd.f32 %v9895_v41, %v9894_v24  ;;  %v8953_v41 = vld [vmem:[%s9671_s0 + $0x292] sm:$0xff] }
 0x3a5   :  { %5603 = vmatmul.msk.f32.gmra.mxu1 %vm170_vm0, %v8721_v46  ;;  %5727 = vmatmul.msk.f32.gmra.mxu2 %vm170_vm0, %v5663_v29  ;;  %v4750_v29 = vmax.f32 %v4686_v42, 0.0  ;;  %v4749_v63 = vmax.f32 %v4685_v50, 0.0  ;;  %v5667_v50 = vld [vmem:[%s9671_s0 + $0x240] sm:$0xff] }
 0x3a6   :  { %5854 = vmatmul.msk.f32.gmra.mxu3 %vm170_vm0, %v5790_v44  ;;  %4827 = vmatpush.msrb.mxu1 %v4755_v16  ;;  %v4683_v44 = vadd.f32 %v8638_v36, %v4615_v62  ;;  %v4748_v2 = vmax.f32 %v4684_v57, 0.0  ;;  %v3049_v42 = vadd.f32 %v8672_v19, %v2520_v53  ;;  %v5543_v62 = vld [vmem:[%s9671_s0 + $0x25a] sm:$0xff]  ;;  %v5794_v19 = vld [vmem:[%s9671_s0 + $0x231] sm:$0xff] }
 0x3a7   :  { %v5795_v57 = vld [vmem:[%s9671_s0 + $0x241] sm:$0xff]  ;;  %v5799_v53 = vld [vmem:[%s9671_s0 + $0x271] sm:$0xff] }
 0x3a8   :  { %4828 = vmatpush.msrb.mxu1 %v4754_v38  ;;  %v3424_v54 = vpop.f32.mrf.mxu2  ;;  %v3950_v18 = vpop.f32.mrf.mxu3  ;;  %v4747_v61 = vmax.f32 %v4683_v44, 0.0  ;;  %v9893_v38 = vld [vmem:[#allocation50_spill] sm:$0xff] }
 0x3a9   :  { %v3576_v12 = vadd.f32 %v3424_v54, %v3046_v8  ;;  %v8747_v47 = vadd.f32 %v3950_v18, %v3575_v37  ;;  %v8749_v56 = vpop.f32.mrf.mxu1  ;;  %v8751_v43 = vpop.f32.mrf.mxu0  ;;  %v9888_v37 = vld [vmem:[#allocation45_spill] sm:$0xff]  ;;  %v2519_v34 = vadd.f32 %v9893_v38, %v9892_v28  ;;  %v4746_v8 = vmax.f32 %v4682_v4, 0.0  ;;  %v5797_v28 = vld [vmem:[%s9671_s0 + $0x259] sm:$0xff] }
 0x3aa   :  { %9883 = vst [vmem:[#allocation110_spill] sm:$0xff] %v8751_v43  ;;  %4829 = vmatpush.msrb.mxu1 %v4753_v10  ;;  %v2518_v45 = vadd.f32 %v9889_v32, %v9888_v37  ;;  %v8819_v10 = vld [vmem:[%s9671_s0 + $0x24a] sm:$0xff] }
 0x3ab   :  { %v3048_v20 = vadd.f32 %v8625_v9, %v2519_v34  ;;  %v5793_v9 = vld [vmem:[%s9671_s0 + $0x229] sm:$0xff] }
 0x3ac   :  { %4830 = vmatpush.msrb.mxu1 %v4752_v7  ;;  %5981 = vmatmul.msk.f32.gmra.mxu0 %vm170_vm0, %v8565_v55  ;;  %v3047_v55 = vadd.f32 %v8582_v49, %v2518_v45  ;;  %v8793_v49 = vld [vmem:[%s9671_s0 + $0x242] sm:$0xff]  ;;  %v9904_v43 = vld [vmem:[#allocation61_spill] sm:$0xff] }
 0x3ad   :  { %5604 = vmatmul.msk.f32.gmra.mxu1 %vm170_vm0, %v8759_v17  ;;  %5728 = vmatmul.msk.f32.gmra.mxu2 %vm170_vm0, %v5664_v0 }
 0x3ae   :  { %5855 = vmatmul.msk.f32.gmra.mxu3 %vm170_vm0, %v5791_v40  ;;  %4831 = vmatpush.msrb.mxu1 %v4751_v39 }
 0x3b0   :  { %4832 = vmatpush.msrb.mxu1 %v4750_v29  ;;  %v3427_v5 = vpop.f32.mrf.mxu2  ;;  %v3953_v58 = vpop.f32.mrf.mxu3 }
 0x3b1   :  { %v3577_v6 = vadd.f32 %v3427_v5, %v3047_v55  ;;  %v8783_v26 = vadd.f32 %v3953_v58, %v3576_v12  ;;  %v8785_v16 = vpop.f32.mrf.mxu1  ;;  %v8787_v23 = vpop.f32.mrf.mxu0  ;;  %v5666_v12 = vld [vmem:[%s9671_s0 + $0x230] sm:$0xff] }
 0x3b2   :  { %4833 = vmatpush.msrb.mxu1 %v4749_v63  ;;  %v5545_v58 = vld [vmem:[%s9671_s0 + $0x272] sm:$0xff]  ;;  %v5796_v63 = vld [vmem:[%s9671_s0 + $0x249] sm:$0xff] }
 0x3b4   :  { %4834 = vmatpush.msrb.mxu1 %v4748_v2  ;;  %5982 = vmatmul.msk.f32.gmra.mxu0 %vm170_vm0, %v8587_v15 }
 0x3b5   :  { %5605 = vmatmul.msk.f32.gmra.mxu1 %vm170_vm0, %v8793_v49  ;;  %5729 = vmatmul.msk.f32.gmra.mxu2 %vm170_vm0, %v5665_v52 }
 0x3b6   :  { %5856 = vmatmul.msk.f32.gmra.mxu3 %vm170_vm0, %v5792_v33  ;;  %4835 = vmatpush.msrb.mxu1 %v4747_v61  ;;  %v5546_v61 = vld [vmem:[%s9671_s0 + $0x27a] sm:$0xff] }
 0x3b8   :  { %4836 = vmatpush.msrb.mxu1 %v4746_v8  ;;  %v3430_v30 = vpop.f32.mrf.mxu2  ;;  %v3956_v14 = vpop.f32.mrf.mxu3 }
 0x3b9   :  { %v3578_v59 = vadd.f32 %v3430_v30, %v3048_v20  ;;  %v8810_v15 = vadd.f32 %v3956_v14, %v3577_v6  ;;  %v8812_v54 = vpop.f32.mrf.mxu1  ;;  %v8814_v18 = vpop.f32.mrf.mxu0  ;;  %v8928_v30 = vld [vmem:[%s9671_s0 + $0x28a] sm:$0xff]  ;;  %v5798_v14 = vld [vmem:[%s9671_s0 + $0x261] sm:$0xff] }
 0x3bc   :  { %5983 = vmatmul.msk.f32.gmra.mxu0 %vm170_vm0, %v8630_v13 }
 0x3bd   :  { %5606 = vmatmul.msk.f32.gmra.mxu1 %vm170_vm0, %v8819_v10  ;;  %5730 = vmatmul.msk.f32.gmra.mxu2 %vm170_vm0, %v5666_v12 }
 0x3be   :  { %5857 = vmatmul.msk.f32.gmra.mxu3 %vm170_vm0, %v5793_v9 }
 0x3c0   :  { %v3433_v7 = vpop.f32.mrf.mxu2  ;;  %v3959_v0 = vpop.f32.mrf.mxu3 }
 0x3c1   :  { %v3579_v40 = vadd.f32 %v3433_v7, %v3049_v42  ;;  %v8836_v27 = vadd.f32 %v3959_v0, %v3578_v59  ;;  %v8838_v22 = vpop.f32.mrf.mxu1  ;;  %v8840_v13 = vpop.f32.mrf.mxu0 }
 0x3c4   :  { %5984 = vmatmul.msk.f32.gmra.mxu0 %vm170_vm0, %v8679_v11  ;;  %v5544_v11 = vld [vmem:[%s9671_s0 + $0x262] sm:$0xff] }
 0x3c5   :  { %5607 = vmatmul.msk.f32.gmra.mxu1 %vm170_vm0, %v5543_v62  ;;  %5731 = vmatmul.msk.f32.gmra.mxu2 %vm170_vm0, %v5667_v50  ;;  %v8975_v50 = vld [vmem:[%s9671_s0 + $0x2a2] sm:$0xff] }
 0x3c6   :  { %5858 = vmatmul.msk.f32.gmra.mxu3 %vm170_vm0, %v5794_v19  ;;  %v5800_v19 = vld [vmem:[%s9671_s0 + $0x279] sm:$0xff] }
 0x3c8   :  { %v3436_v39 = vpop.f32.mrf.mxu2  ;;  %v3962_v37 = vpop.f32.mrf.mxu3 }
 0x3c9   :  { %v3580_v32 = vadd.f32 %v3436_v39, %v8716_v35  ;;  %v8857_v45 = vadd.f32 %v3962_v37, %v3579_v40  ;;  %v8859_v48 = vpop.f32.mrf.mxu1  ;;  %v8861_v60 = vpop.f32.mrf.mxu0 }
 0x3cc   :  { %5985 = vmatmul.msk.f32.gmra.mxu0 %vm170_vm0, %v8721_v46  ;;  %v5669_v46 = vld [vmem:[%s9671_s0 + $0x258] sm:$0xff] }
 0x3cd   :  { %5608 = vmatmul.msk.f32.gmra.mxu1 %vm170_vm0, %v5544_v11  ;;  %5732 = vmatmul.msk.f32.gmra.mxu2 %vm170_vm0, %v5668_v21 }
 0x3ce   :  { %5859 = vmatmul.msk.f32.gmra.mxu3 %vm170_vm0, %v5795_v57  ;;  %v8995_v57 = vld [vmem:[%s9671_s0 + $0x2aa] sm:$0xff] }
 0x3d0   :  { %v8877_v35 = vpop.f32.mrf.mxu2  ;;  %v3965_v29 = vpop.f32.mrf.mxu3 }
 0x3d1   :  { %v4109_v55 = vadd.f32 %v3965_v29, %v3580_v32  ;;  %v8879_v44 = vpop.f32.mrf.mxu1  ;;  %v8881_v5 = vpop.f32.mrf.mxu0  ;;  %v5801_v29 = vld [vmem:[%s9671_s0 + $0x289] sm:$0xff] }
 0x3d4   :  { %5986 = vmatmul.msk.f32.gmra.mxu0 %vm170_vm0, %v8759_v17  ;;  %v5670_v17 = vld [vmem:[%s9671_s0 + $0x260] sm:$0xff] }
 0x3d5   :  { %5609 = vmatmul.msk.f32.gmra.mxu1 %vm170_vm0, %v5545_v58  ;;  %5733 = vmatmul.msk.f32.gmra.mxu2 %vm170_vm0, %v5669_v46 }
 0x3d6   :  { %5860 = vmatmul.msk.f32.gmra.mxu3 %vm170_vm0, %v5796_v63 }
 0x3d8   :  { %v8897_v6 = vpop.f32.mrf.mxu2  ;;  %v8899_v4 = vpop.f32.mrf.mxu3 }
 0x3d9   :  { %v8901_v2 = vpop.f32.mrf.mxu1  ;;  %v4494_v52 = vpop.f32.mrf.mxu0 }
 0x3da   :  { %v8903_v33 = vadd.f32 %v4494_v52, %v4109_v55 }
 0x3dc   :  { %5987 = vmatmul.msk.f32.gmra.mxu0 %vm170_vm0, %v8793_v49  ;;  %v5671_v49 = vld [vmem:[%s9671_s0 + $0x270] sm:$0xff] }
 0x3dd   :  { %5610 = vmatmul.msk.f32.gmra.mxu1 %vm170_vm0, %v5546_v61  ;;  %5734 = vmatmul.msk.f32.gmra.mxu2 %vm170_vm0, %v5670_v17  ;;  %v9013_v17 = vld [vmem:[%s9671_s0 + $0x2ba] sm:$0xff] }
 0x3de   :  { %5861 = vmatmul.msk.f32.gmra.mxu3 %vm170_vm0, %v5797_v28  ;;  %9897 = vst [vmem:[#allocation109_spill] sm:$0xff] %v9013_v17  ;;  %v5802_v28 = vld [vmem:[%s9671_s0 + $0x291] sm:$0xff] }
 0x3e0   :  { %v8919_v38 = vpop.f32.mrf.mxu2  ;;  %v8921_v34 = vpop.f32.mrf.mxu3 }
 0x3e1   :  { %v2930_v8 = vpop.f32.mrf.mxu1  ;;  %v8923_v20 = vpop.f32.mrf.mxu0 }
 0x3e4   :  { %5988 = vmatmul.msk.f32.gmra.mxu0 %vm170_vm0, %v8819_v10  ;;  %v5672_v10 = vld [vmem:[%s9671_s0 + $0x278] sm:$0xff] }
 0x3e5   :  { %5611 = vmatmul.msk.f32.gmra.mxu1 %vm170_vm0, %v8928_v30  ;;  %5735 = vmatmul.msk.f32.gmra.mxu2 %vm170_vm0, %v5671_v49  ;;  %v9898_v49 = vld [vmem:[#allocation7_spill] sm:$0xff] }
 0x3e6   :  { %5862 = vmatmul.msk.f32.gmra.mxu3 %vm170_vm0, %v5798_v14  ;;  %v9899_v14 = vld [vmem:[#allocation64_spill] sm:$0xff] }
 0x3e8   :  { %v8942_v59 = vpop.f32.mrf.mxu2  ;;  %v8944_v12 = vpop.f32.mrf.mxu3 }
 0x3e9   :  { %v8946_v9 = vpop.f32.mrf.mxu1  ;;  %v8948_v24 = vpop.f32.mrf.mxu0 }
 0x3ec   :  { %5989 = vmatmul.msk.f32.gmra.mxu0 %vm170_vm0, %v5543_v62  ;;  %v5673_v62 = vld [vmem:[%s9671_s0 + $0x288] sm:$0xff] }
 0x3ed   :  { %5612 = vmatmul.msk.f32.gmra.mxu1 %vm170_vm0, %v8953_v41  ;;  %5736 = vmatmul.msk.f32.gmra.mxu2 %vm170_vm0, %v5672_v10  ;;  %v2529_v10 = vadd.f32 %v9899_v14, %v9898_v49  ;;  %v2526_v49 = vadd.f32 %v9904_v43, %v9903_v25  ;;  %v9905_v14 = vld [vmem:[#allocation5_spill] sm:$0xff]  ;;  %v9909_v25 = vld [vmem:[#allocation60_spill] sm:$0xff] }
 0x3ee   :  { %5863 = vmatmul.msk.f32.gmra.mxu3 %vm170_vm0, %v5799_v53 }
 0x3ef   :  { %v3058_v53 = vadd.f32 %v2930_v8, %v2529_v10  ;;  %v9040_v8 = vld [vmem:[%s9671_s0 + $0x2c2] sm:$0xff] }
 0x3f0   :  { %v3451_v42 = vpop.f32.mrf.mxu2  ;;  %v8966_v7 = vpop.f32.mrf.mxu3  ;;  %9907 = vst [vmem:[#allocation108_spill] sm:$0xff] %v9040_v8  ;;  %v5803_v10 = vld [vmem:[%s9671_s0 + $0x2a1] sm:$0xff] }
 0x3f1   :  { %v8968_v0 = vpop.f32.mrf.mxu1  ;;  %v8970_v40 = vpop.f32.mrf.mxu0 }
 0x3f4   :  { %5990 = vmatmul.msk.f32.gmra.mxu0 %vm170_vm0, %v5544_v11  ;;  %v5674_v11 = vld [vmem:[%s9671_s0 + $0x290] sm:$0xff] }
 0x3f5   :  { %5613 = vmatmul.msk.f32.gmra.mxu1 %vm170_vm0, %v8975_v50  ;;  %5737 = vmatmul.msk.f32.gmra.mxu2 %vm170_vm0, %v5673_v62  ;;  %v9900_v62 = vld [vmem:[#allocation27_spill] sm:$0xff] }
 0x3f6   :  { %5864 = vmatmul.msk.f32.gmra.mxu3 %vm170_vm0, %v5800_v19  ;;  %v9901_v19 = vld [vmem:[#allocation62_spill] sm:$0xff] }
 0x3f8   :  { %v3454_v39 = vpop.f32.mrf.mxu2  ;;  %v3980_v37 = vpop.f32.mrf.mxu3 }
 0x3f9   :  { %v8988_v32 = vpop.f32.mrf.mxu1  ;;  %v8990_v21 = vpop.f32.mrf.mxu0 }
 0x3fc   :  { %5991 = vmatmul.msk.f32.gmra.mxu0 %vm170_vm0, %v5545_v58  ;;  %v5675_v58 = vld [vmem:[%s9671_s0 + $0x2a0] sm:$0xff] }
 0x3fd   :  { %5614 = vmatmul.msk.f32.gmra.mxu1 %vm170_vm0, %v8995_v57  ;;  %5738 = vmatmul.msk.f32.gmra.mxu2 %vm170_vm0, %v5674_v11  ;;  %v2527_v11 = vadd.f32 %v9901_v19, %v9900_v62  ;;  %v9910_v19 = vld [vmem:[#allocation55_spill] sm:$0xff] }
 0x3fe   :  { %5865 = vmatmul.msk.f32.gmra.mxu3 %vm170_vm0, %v5801_v29 }
 0x400   :  { %v3457_v55 = vpop.f32.mrf.mxu2  ;;  %v3983_v46 = vpop.f32.mrf.mxu3 }
 0x401   :  { %v9008_v63 = vpop.f32.mrf.mxu1  ;;  %v4509_v52 = vpop.f32.mrf.mxu0 }
 0x402   :  { %9896 = vst [vmem:[#allocation107_spill] sm:$0xff] %v9008_v63 }
 0x404   :  { %5992 = vmatmul.msk.f32.gmra.mxu0 %vm170_vm0, %v5546_v61 }
 0x405   :  { %5615 = vmatmul.msk.f32.gmra.mxu1 %vm170_vm0, %v9013_v17  ;;  %5739 = vmatmul.msk.f32.gmra.mxu2 %vm170_vm0, %v5675_v58  ;;  %v2528_v17 = vadd.f32 %v9906_v1, %v9905_v14  ;;  %v3056_v58 = vadd.f32 %v8879_v44, %v2527_v11  ;;  %v3055_v1 = vadd.f32 %v8859_v48, %v2526_v49  ;;  %v9911_v11 = vld [vmem:[#allocation58_spill] sm:$0xff]  ;;  %v9912_v14 = vld [vmem:[#allocation9_spill] sm:$0xff] }
 0x406   :  { %5866 = vmatmul.msk.f32.gmra.mxu3 %vm170_vm0, %v5802_v28  ;;  %v5676_v28 = vld [vmem:[%s9671_s0 + $0x2a8] sm:$0xff] }
 0x407   :  { %v3057_v44 = vadd.f32 %v8901_v2, %v2528_v17  ;;  %v3586_v62 = vadd.f32 %v3454_v39, %v3056_v58  ;;  %v3585_v48 = vadd.f32 %v3451_v42, %v3055_v1  ;;  %v9914_v39 = vld [vmem:[#allocation53_spill] sm:$0xff]  ;;  %v9917_v42 = vld [vmem:[#allocation54_spill] sm:$0xff] }
 0x408   :  { %v3460_v29 = vpop.f32.mrf.mxu2  ;;  %v3986_v3 = vpop.f32.mrf.mxu3 }
 0x409   :  { %v3588_v31 = vadd.f32 %v3460_v29, %v3058_v53  ;;  %v9030_v51 = vpop.f32.mrf.mxu1  ;;  %v4512_v61 = vpop.f32.mrf.mxu0  ;;  %v9908_v53 = vld [vmem:[#allocation57_spill] sm:$0xff]  ;;  %v2524_v29 = vadd.f32 %v9911_v11, %v9910_v19  ;;  %v3587_v49 = vadd.f32 %v3457_v55, %v3057_v44  ;;  %v4115_v2 = vadd.f32 %v3983_v46, %v3586_v62  ;;  %v9919_v62 = vld [vmem:[#allocation11_spill] sm:$0xff] }
 0x40a   :  { %9902 = vst [vmem:[#allocation105_spill] sm:$0xff] %v9030_v51  ;;  %v2525_v43 = vadd.f32 %v9909_v25, %v9908_v53  ;;  %v9913_v51 = vld [vmem:[#allocation65_spill] sm:$0xff]  ;;  %v4114_v19 = vadd.f32 %v3980_v37, %v3585_v48 }
 0x40b   :  { %v2530_v63 = vadd.f32 %v9913_v51, %v9912_v14  ;;  %v3053_v58 = vadd.f32 %v8812_v54, %v2524_v29  ;;  %v4116_v11 = vadd.f32 %v3986_v3, %v3587_v49  ;;  %v4644_v14 = vadd.f32 %v4512_v61, %v4115_v2  ;;  %v9920_v29 = vld [vmem:[#allocation66_spill] sm:$0xff] }
 0x40c   :  { %5993 = vmatmul.msk.f32.gmra.mxu0 %vm170_vm0, %v8928_v30  ;;  %v3054_v53 = vadd.f32 %v8838_v22, %v2525_v43  ;;  %v9915_v30 = vld [vmem:[#allocation56_spill] sm:$0xff]  ;;  %v4643_v37 = vadd.f32 %v4509_v52, %v4114_v19 }
 0x40d   :  { %5616 = vmatmul.msk.f32.gmra.mxu1 %vm170_vm0, %v9040_v8  ;;  %5740 = vmatmul.msk.f32.gmra.mxu2 %vm170_vm0, %v5676_v28  ;;  %v2523_v17 = vadd.f32 %v9915_v30, %v9914_v39  ;;  %v3059_v25 = vadd.f32 %v8946_v9, %v2530_v63  ;;  %v9916_v22 = vld [vmem:[#allocation52_spill] sm:$0xff]  ;;  %v3583_v9 = vadd.f32 %v8919_v38, %v3053_v58  ;;  %v9080_v63 = vld [vmem:[%s9671_s0 + $0x2d2] sm:$0xff] }
 0x40e   :  { %5867 = vmatmul.msk.f32.gmra.mxu3 %vm170_vm0, %v5803_v10  ;;  %v3584_v51 = vadd.f32 %v8942_v59, %v3054_v53  ;;  %v2522_v55 = vadd.f32 %v9917_v42, %v9916_v22  ;;  %v5804_v38 = vld [vmem:[%s9671_s0 + $0x2a9] sm:$0xff]  ;;  %v4711_v53 = vadd.f32 %v8638_v36, %v4643_v37  ;;  %v9924_v22 = vld [vmem:[#allocation67_spill] sm:$0xff] }
 0x40f   :  { %v3052_v46 = vadd.f32 %v8785_v16, %v2523_v17  ;;  %v5677_v16 = vld [vmem:[%s9671_s0 + $0x2b8] sm:$0xff] }
 0x410   :  { %v3463_v28 = vpop.f32.mrf.mxu2  ;;  %v3989_v8 = vpop.f32.mrf.mxu3  ;;  %v4113_v59 = vadd.f32 %v8966_v7, %v3584_v51  ;;  %v4112_v7 = vadd.f32 %v8944_v12, %v3583_v9  ;;  %v4775_v19 = vmax.f32 %v4711_v53, 0.0  ;;  %v4706_v9 = vadd.f32 %v8638_v36, %v8903_v33 }
 0x411   :  { %v3589_v10 = vadd.f32 %v3463_v28, %v3059_v25  ;;  %v9071_v43 = vadd.f32 %v3989_v8, %v3588_v31  ;;  %v9073_v1 = vpop.f32.mrf.mxu1  ;;  %v4515_v54 = vpop.f32.mrf.mxu0  ;;  %v3051_v31 = vadd.f32 %v8749_v56, %v2522_v55  ;;  %v3582_v61 = vadd.f32 %v8897_v6, %v3052_v46  ;;  %v9923_v28 = vld [vmem:[#allocation13_spill] sm:$0xff] }
 0x412   :  { %v4645_v3 = vadd.f32 %v4515_v54, %v4116_v11  ;;  %v4642_v52 = vadd.f32 %v8990_v21, %v4113_v59  ;;  %v4712_v8 = vadd.f32 %v8638_v36, %v4644_v14  ;;  %v2531_v56 = vadd.f32 %v9920_v29, %v9919_v62  ;;  %v5805_v11 = vld [vmem:[%s9671_s0 + $0x2b9] sm:$0xff] }
 0x413   :  { %9918 = vst [vmem:[#allocation111_spill] sm:$0xff] %v9071_v43  ;;  %v3581_v6 = vadd.f32 %v8877_v35, %v3051_v31  ;;  %v4111_v12 = vadd.f32 %v8921_v34, %v3582_v61  ;;  %v4641_v21 = vadd.f32 %v8970_v40, %v4112_v7  ;;  %v2532_v42 = vadd.f32 %v9924_v22, %v9923_v28  ;;  %v9935_v28 = vld [vmem:[#allocation109_spill] sm:$0xff]  ;;  %v9966_v43 = vld [vmem:[#allocation32_spill] sm:$0xff] }
 0x414   :  { %v4713_v44 = vadd.f32 %v8638_v36, %v4645_v3  ;;  %5994 = vmatmul.msk.f32.gmra.mxu0 %vm170_vm0, %v8953_v41  ;;  %v3060_v41 = vadd.f32 %v8968_v0, %v2531_v56  ;;  %v4710_v2 = vadd.f32 %v8638_v36, %v4642_v52  ;;  %v4776_v17 = vmax.f32 %v4712_v8, 0.0  ;;  %v9926_v52 = vld [vmem:[#allocation15_spill] sm:$0xff]  ;;  %v9927_v8 = vld [vmem:[#allocation68_spill] sm:$0xff]  ;;  %v9929_v56 = vld [vmem:[#allocation42_spill] sm:$0xff] }
 0x415   :  { %5617 = vmatmul.msk.f32.gmra.mxu1 %vm170_vm0, %v9080_v63  ;;  %5741 = vmatmul.msk.f32.gmra.mxu2 %vm170_vm0, %v5677_v16  ;;  %v4110_v49 = vadd.f32 %v8899_v4, %v3581_v6  ;;  %v4640_v35 = vadd.f32 %v8948_v24, %v4111_v12  ;;  %v4709_v0 = vadd.f32 %v8638_v36, %v4641_v21  ;;  %v9121_v4 = vld [vmem:[%s9671_s0 + $0x2da] sm:$0xff]  ;;  %v4770_v7 = vmax.f32 %v4706_v9, 0.0  ;;  %v9930_v6 = vld [vmem:[#allocation110_spill] sm:$0xff] }
 0x416   :  { %v4777_v48 = vmax.f32 %v4713_v44, 0.0  ;;  %5868 = vmatmul.msk.f32.gmra.mxu3 %vm170_vm0, %v5804_v38  ;;  %v5678_v24 = vld [vmem:[%s9671_s0 + $0x2c0] sm:$0xff]  ;;  %v4637_v55 = vadd.f32 %v8881_v5, %v8857_v45  ;;  %v4636_v54 = vadd.f32 %v8861_v60, %v8836_v27  ;;  %v4635_v31 = vadd.f32 %v8840_v13, %v8810_v15  ;;  %v9158_v27 = vld [vmem:[%s9671_s0 + $0x2ea] sm:$0xff] }
 0x417   :  { %v4639_v51 = vadd.f32 %v8923_v20, %v4110_v49  ;;  %v4708_v14 = vadd.f32 %v8638_v36, %v4640_v35  ;;  %v4774_v20 = vmax.f32 %v4710_v2, 0.0  ;;  %v5679_v60 = vld [vmem:[%s9671_s0 + $0x2d0] sm:$0xff]  ;;  %v5806_v38 = vld [vmem:[%s9671_s0 + $0x2c1] sm:$0xff]  ;;  %v4634_v15 = vadd.f32 %v8814_v18, %v8783_v26 }
 0x418   :  { %v3466_v39 = vpop.f32.mrf.mxu2  ;;  %v3992_v30 = vpop.f32.mrf.mxu3  ;;  %4841 = vmatpush.msrb.mxu2 %v4777_v48  ;;  %v4704_v13 = vadd.f32 %v8638_v36, %v4636_v54  ;;  %v2533_v44 = vadd.f32 %v9927_v8, %v9926_v52  ;;  %v4633_v62 = vadd.f32 %v8787_v23, %v8747_v47  ;;  %v4703_v26 = vadd.f32 %v8638_v36, %v4635_v31  ;;  %v9931_v47 = vld [vmem:[#allocation39_spill] sm:$0xff]  ;;  %v9938_v54 = vld [vmem:[#allocation105_spill] sm:$0xff] }
 0x419   :  { %v3590_v34 = vadd.f32 %v3466_v39, %v3060_v41  ;;  %v9110_v58 = vadd.f32 %v3992_v30, %v3589_v10  ;;  %v9112_v40 = vpop.f32.mrf.mxu1  ;;  %v9114_v25 = vpop.f32.mrf.mxu0  ;;  %v4707_v46 = vadd.f32 %v8638_v36, %v4639_v51  ;;  %v4773_v10 = vmax.f32 %v4709_v0, 0.0  ;;  %v9932_v23 = vld [vmem:[#allocation43_spill] sm:$0xff] }
 0x41a   :  { %9922 = vst [vmem:[#allocation46_spill] sm:$0xff] %v9114_v25  ;;  %4842 = vmatpush.msrb.mxu2 %v4776_v17  ;;  %v4772_v3 = vmax.f32 %v4708_v14, 0.0  ;;  %v4632_v12 = vadd.f32 %v9930_v6, %v9929_v56  ;;  %v4702_v21 = vadd.f32 %v8638_v36, %v4634_v15  ;;  %v4768_v48 = vmax.f32 %v4704_v13, 0.0  ;;  %v5680_v51 = vld [vmem:[%s9671_s0 + $0x2d8] sm:$0xff] }
 0x41b   :  { %9921 = vst [vmem:[#allocation44_spill] sm:$0xff] %v9110_v58  ;;  %v4771_v33 = vmax.f32 %v4707_v46, 0.0  ;;  %v4631_v2 = vadd.f32 %v9932_v23, %v9931_v47  ;;  %v4701_v39 = vadd.f32 %v8638_v36, %v4633_v62  ;;  %v4767_v0 = vmax.f32 %v4703_v26, 0.0  ;;  %v5808_v13 = vld [vmem:[%s9671_s0 + $0x2d9] sm:$0xff]  ;;  %v9972_v58 = vld [vmem:[#allocation28_spill] sm:$0xff] }
 0x41c   :  { %5995 = vmatmul.msk.f32.gmra.mxu0 %vm170_vm0, %v8975_v50  ;;  %4843 = vmatpush.msrb.mxu2 %v4775_v19  ;;  %v3061_v50 = vadd.f32 %v8988_v32, %v2532_v42  ;;  %v4705_v32 = vadd.f32 %v8638_v36, %v4637_v55  ;;  %v9933_v19 = vld [vmem:[#allocation41_spill] sm:$0xff]  ;;  %v4766_v22 = vmax.f32 %v4702_v21, 0.0  ;;  %v9940_v8 = vld [vmem:[#allocation19_spill] sm:$0xff] }
 0x41d   :  { %5618 = vmatmul.msk.f32.gmra.mxu1 %vm170_vm0, %v9121_v4  ;;  %5742 = vmatmul.msk.f32.gmra.mxu2 %vm170_vm0, %v5678_v24  ;;  %v5807_v24 = vld [vmem:[%s9671_s0 + $0x2d1] sm:$0xff] }
 0x41e   :  { %5869 = vmatmul.msk.f32.gmra.mxu3 %vm170_vm0, %v5805_v11  ;;  %4844 = vmatpush.msrb.mxu2 %v4774_v20  ;;  %v4769_v18 = vmax.f32 %v4705_v32, 0.0  ;;  %v9934_v11 = vld [vmem:[#allocation40_spill] sm:$0xff]  ;;  %v4700_v20 = vadd.f32 %v8638_v36, %v4632_v12  ;;  %v9936_v42 = vld [vmem:[#allocation17_spill] sm:$0xff] }
 0x41f   :  { %v4630_v14 = vadd.f32 %v9934_v11, %v9933_v19  ;;  %v9937_v55 = vld [vmem:[#allocation69_spill] sm:$0xff]  ;;  %v5683_v19 = vld [vmem:[%s9671_s0 + $0x300] sm:$0xff] }
 0x420   :  { %v3469_v59 = vpop.f32.mrf.mxu2  ;;  %v3995_v37 = vpop.f32.mrf.mxu3  ;;  %4845 = vmatpush.msrb.mxu2 %v4773_v10  ;;  %v2534_v46 = vadd.f32 %v9937_v55, %v9936_v42  ;;  %v4699_v10 = vadd.f32 %v8638_v36, %v4631_v2  ;;  %v9253_v21 = vld [vmem:[%s9671_s0 + $0x30a] sm:$0xff]  ;;  %v9302_v42 = vld [vmem:[%s9671_s0 + $0x322] sm:$0xff] }
 0x421   :  { %v3591_v16 = vadd.f32 %v3469_v59, %v3061_v50  ;;  %v9146_v45 = vadd.f32 %v3995_v37, %v3590_v34  ;;  %v9148_v5 = vpop.f32.mrf.mxu0  ;;  %v9196_v34 = vld [vmem:[%s9671_s0 + $0x2f2] sm:$0xff]  ;;  %v4765_v50 = vmax.f32 %v4701_v39, 0.0  ;;  %v4698_v59 = vadd.f32 %v8638_v36, %v4630_v14  ;;  %v5681_v36 = vld [vmem:[%s9671_s0 + $0x2e8] sm:$0xff] }
 0x422   :  { %9925 = vst [vmem:[#allocation103_spill] sm:$0xff] %v9148_v5  ;;  %v9153_v61 = vpop.f32.mrf.mxu1  ;;  %4846 = vmatpush.msrb.mxu2 %v4772_v3  ;;  %v3063_v9 = vadd.f32 %v9938_v54, %v2534_v46  ;;  %v4764_v3 = vmax.f32 %v4700_v20, 0.0  ;;  %v4763_v15 = vmax.f32 %v4699_v10, 0.0  ;;  %v5811_v55 = vld [vmem:[%s9671_s0 + $0x301] sm:$0xff]  ;;  %v9968_v5 = vld [vmem:[#allocation30_spill] sm:$0xff] }
 0x423   :  { %v4762_v52 = vmax.f32 %v4698_v59, 0.0  ;;  %v9944_v54 = vld [vmem:[#allocation23_spill] sm:$0xff] }
 0x424   :  { %5996 = vmatmul.msk.f32.gmra.mxu0 %vm170_vm0, %v8995_v57  ;;  %4847 = vmatpush.msrb.mxu2 %v4771_v33  ;;  %v9928_v57 = vld [vmem:[#allocation107_spill] sm:$0xff] }
 0x425   :  { %5619 = vmatmul.msk.f32.gmra.mxu1 %vm170_vm0, %v9158_v27  ;;  %5743 = vmatmul.msk.f32.gmra.mxu2 %vm170_vm0, %v5679_v60  ;;  %v3062_v29 = vadd.f32 %v9928_v57, %v2533_v44  ;;  %v9941_v44 = vld [vmem:[#allocation70_spill] sm:$0xff] }
 0x426   :  { %5870 = vmatmul.msk.f32.gmra.mxu3 %vm170_vm0, %v5806_v38  ;;  %4848 = vmatpush.msrb.mxu2 %v4770_v7  ;;  %v9227_v38 = vld [vmem:[%s9671_s0 + $0x302] sm:$0xff]  ;;  %v2535_v62 = vadd.f32 %v9941_v44, %v9940_v8 }
 0x427   :  { %v9939_v7 = vld [vmem:[#allocation108_spill] sm:$0xff] }
 0x428   :  { %v3472_v53 = vpop.f32.mrf.mxu2  ;;  %4849 = vmatpush.msrb.mxu2 %v4769_v18  ;;  %v3064_v26 = vadd.f32 %v9073_v1, %v2535_v62  ;;  %v5809_v1 = vld [vmem:[%s9671_s0 + $0x2e9] sm:$0xff]  ;;  %v5686_v44 = vld [vmem:[%s9671_s0 + $0x320] sm:$0xff] }
 0x429   :  { %v3592_v41 = vadd.f32 %v3472_v53, %v3062_v29  ;;  %v3998_v49 = vpop.f32.mrf.mxu3  ;;  %v9184_v35 = vpop.f32.mrf.mxu0  ;;  %v5682_v53 = vld [vmem:[%s9671_s0 + $0x2f0] sm:$0xff]  ;;  %v5813_v62 = vld [vmem:[%s9671_s0 + $0x319] sm:$0xff] }
 0x42a   :  { %v9189_v30 = vadd.f32 %v3998_v49, %v3591_v16  ;;  %v9191_v17 = vpop.f32.mrf.mxu1  ;;  %4850 = vmatpush.msrb.mxu2 %v4768_v48  ;;  %v9942_v48 = vld [vmem:[#allocation21_spill] sm:$0xff] }
 0x42c   :  { %5997 = vmatmul.msk.f32.gmra.mxu0 %vm170_vm0, %v9935_v28  ;;  %4851 = vmatpush.msrb.mxu2 %v4767_v0 }
 0x42d   :  { %5620 = vmatmul.msk.f32.gmra.mxu1 %vm170_vm0, %v9196_v34  ;;  %5744 = vmatmul.msk.f32.gmra.mxu2 %vm170_vm0, %v5680_v51 }
 0x42e   :  { %5871 = vmatmul.msk.f32.gmra.mxu3 %vm170_vm0, %v5807_v24  ;;  %4852 = vmatpush.msrb.mxu2 %v4766_v22  ;;  %v9279_v24 = vld [vmem:[%s9671_s0 + $0x31a] sm:$0xff] }
 0x430   :  { %v3475_v37 = vpop.f32.mrf.mxu2  ;;  %4853 = vmatpush.msrb.mxu2 %v4765_v50 }
 0x431   :  { %v3593_v16 = vadd.f32 %v3475_v37, %v3063_v9  ;;  %v4001_v31 = vpop.f32.mrf.mxu3  ;;  %v9218_v32 = vpop.f32.mrf.mxu0  ;;  %v9945_v9 = vld [vmem:[#allocation72_spill] sm:$0xff] }
 0x432   :  { %v9220_v60 = vadd.f32 %v4001_v31, %v3592_v41  ;;  %v9222_v33 = vpop.f32.mrf.mxu1  ;;  %4854 = vmatpush.msrb.mxu2 %v4764_v3  ;;  %v9943_v41 = vld [vmem:[#allocation71_spill] sm:$0xff]  ;;  %v2537_v59 = vadd.f32 %v9945_v9, %v9944_v54  ;;  %v9951_v54 = vld [vmem:[#allocation82_spill] sm:$0xff] }
 0x433   :  { %v2536_v49 = vadd.f32 %v9943_v41, %v9942_v48  ;;  %v5685_v3 = vld [vmem:[%s9671_s0 + $0x318] sm:$0xff] }
 0x434   :  { %5998 = vmatmul.msk.f32.gmra.mxu0 %vm170_vm0, %v9939_v7  ;;  %4855 = vmatpush.msrb.mxu2 %v4763_v15  ;;  %v3066_v31 = vadd.f32 %v9153_v61, %v2537_v59 }
 0x435   :  { %5621 = vmatmul.msk.f32.gmra.mxu1 %vm170_vm0, %v9227_v38  ;;  %5745 = vmatmul.msk.f32.gmra.mxu2 %vm170_vm0, %v5681_v36  ;;  %v3065_v47 = vadd.f32 %v9112_v40, %v2536_v49  ;;  %v5810_v40 = vld [vmem:[%s9671_s0 + $0x2f1] sm:$0xff]  ;;  %v5814_v49 = vld [vmem:[%s9671_s0 + $0x321] sm:$0xff] }
 0x436   :  { %5872 = vmatmul.msk.f32.gmra.mxu3 %vm170_vm0, %v5808_v13  ;;  %4856 = vmatpush.msrb.mxu2 %v4762_v52 }
 0x438   :  { %v3478_v18 = vpop.f32.mrf.mxu2 }
 0x439   :  { %v3594_v57 = vadd.f32 %v3478_v18, %v3064_v26  ;;  %v4004_v29 = vpop.f32.mrf.mxu3  ;;  %v9244_v56 = vpop.f32.mrf.mxu0  ;;  %v9946_v18 = vld [vmem:[#allocation8_spill] sm:$0xff] }
 0x43a   :  { %v9246_v6 = vadd.f32 %v4004_v29, %v3593_v16  ;;  %v9248_v12 = vpop.f32.mrf.mxu1  ;;  %v5812_v16 = vld [vmem:[%s9671_s0 + $0x309] sm:$0xff] }
 0x43c   :  { %5999 = vmatmul.msk.f32.gmra.mxu0 %vm170_vm0, %v9080_v63 }
 0x43d   :  { %5622 = vmatmul.msk.f32.gmra.mxu1 %vm170_vm0, %v9253_v21  ;;  %5746 = vmatmul.msk.f32.gmra.mxu2 %vm170_vm0, %v5682_v53 }
 0x43e   :  { %5873 = vmatmul.msk.f32.gmra.mxu3 %vm170_vm0, %v5809_v1 }
 0x440   :  { %v3481_v23 = vpop.f32.mrf.mxu2 }
 0x441   :  { %v3595_v2 = vadd.f32 %v3481_v23, %v3065_v47  ;;  %v4007_v39 = vpop.f32.mrf.mxu3  ;;  %v9270_v51 = vpop.f32.mrf.mxu0  ;;  %v9948_v23 = vld [vmem:[#allocation10_spill] sm:$0xff] }
 0x442   :  { %v9272_v0 = vadd.f32 %v4007_v39, %v3594_v57  ;;  %v9274_v63 = vpop.f32.mrf.mxu1  ;;  %v9947_v57 = vld [vmem:[#allocation80_spill] sm:$0xff] }
 0x443   :  { %v2545_v29 = vadd.f32 %v9947_v57, %v9946_v18 }
 0x444   :  { %6000 = vmatmul.msk.f32.gmra.mxu0 %vm170_vm0, %v9121_v4  ;;  %v5684_v4 = vld [vmem:[%s9671_s0 + $0x308] sm:$0xff] }
 0x445   :  { %5623 = vmatmul.msk.f32.gmra.mxu1 %vm170_vm0, %v9279_v24  ;;  %5747 = vmatmul.msk.f32.gmra.mxu2 %vm170_vm0, %v5683_v19 }
 0x446   :  { %5874 = vmatmul.msk.f32.gmra.mxu3 %vm170_vm0, %v5810_v40 }
 0x448   :  { %v3484_v11 = vpop.f32.mrf.mxu2 }
 0x449   :  { %v4010_v14 = vpop.f32.mrf.mxu3  ;;  %v9293_v20 = vpop.f32.mrf.mxu0  ;;  %v3596_v36 = vadd.f32 %v3484_v11, %v3066_v31  ;;  %v5689_v31 = vld [vmem:[%s9671_s0 + $0x348] sm:$0xff] }
 0x44a   :  { %v9295_v28 = vadd.f32 %v4010_v14, %v3595_v2  ;;  %v9297_v22 = vpop.f32.mrf.mxu1  ;;  %v9949_v2 = vld [vmem:[#allocation81_spill] sm:$0xff]  ;;  %v5688_v14 = vld [vmem:[%s9671_s0 + $0x338] sm:$0xff] }
 0x44b   :  { %v2546_v39 = vadd.f32 %v9949_v2, %v9948_v23  ;;  %v9954_v23 = vld [vmem:[#allocation16_spill] sm:$0xff] }
 0x44c   :  { %6001 = vmatmul.msk.f32.gmra.mxu0 %vm170_vm0, %v9158_v27  ;;  %v9327_v27 = vld [vmem:[%s9671_s0 + $0x332] sm:$0xff]  ;;  %v9955_v2 = vld [vmem:[#allocation84_spill] sm:$0xff] }
 0x44d   :  { %5624 = vmatmul.msk.f32.gmra.mxu1 %vm170_vm0, %v9302_v42  ;;  %5748 = vmatmul.msk.f32.gmra.mxu2 %vm170_vm0, %v5684_v4 }
 0x44e   :  { %5875 = vmatmul.msk.f32.gmra.mxu3 %vm170_vm0, %v5811_v55 }
 0x450   :  { %v9316_v46 = vpop.f32.mrf.mxu2 }
 0x451   :  { %v4013_v10 = vpop.f32.mrf.mxu3  ;;  %v9318_v50 = vpop.f32.mrf.mxu0 }
 0x452   :  { %v9322_v37 = vpop.f32.mrf.mxu1  ;;  %v4125_v15 = vadd.f32 %v4013_v10, %v3596_v36  ;;  %v9950_v10 = vld [vmem:[#allocation12_spill] sm:$0xff] }
 0x453   :  { %v2547_v9 = vadd.f32 %v9951_v54, %v9950_v10  ;;  %v5818_v54 = vld [vmem:[%s9671_s0 + $0x351] sm:$0xff] }
 0x454   :  { %6002 = vmatmul.msk.f32.gmra.mxu0 %vm170_vm0, %v9196_v34  ;;  %v5562_v34 = vld [vmem:[%s9671_s0 + $0x33a] sm:$0xff] }
 0x455   :  { %5625 = vmatmul.msk.f32.gmra.mxu1 %vm170_vm0, %v9327_v27  ;;  %5749 = vmatmul.msk.f32.gmra.mxu2 %vm170_vm0, %v5685_v3 }
 0x456   :  { %5876 = vmatmul.msk.f32.gmra.mxu3 %vm170_vm0, %v5812_v16 }
 0x458   :  { %v9342_v13 = vpop.f32.mrf.mxu2 }
 0x459   :  { %v9344_v7 = vpop.f32.mrf.mxu3  ;;  %v4542_v52 = vpop.f32.mrf.mxu0 }
 0x45a   :  { %v9346_v8 = vpop.f32.mrf.mxu1  ;;  %v9348_v61 = vadd.f32 %v4542_v52, %v4125_v15  ;;  %v9952_v52 = vld [vmem:[#allocation14_spill] sm:$0xff] }
 0x45c   :  { %6003 = vmatmul.msk.f32.gmra.mxu0 %vm170_vm0, %v9227_v38  ;;  %v5687_v38 = vld [vmem:[%s9671_s0 + $0x330] sm:$0xff] }
 0x45d   :  { %5626 = vmatmul.msk.f32.gmra.mxu1 %vm170_vm0, %v5562_v34  ;;  %5750 = vmatmul.msk.f32.gmra.mxu2 %vm170_vm0, %v5686_v44  ;;  %v9953_v44 = vld [vmem:[#allocation83_spill] sm:$0xff] }
 0x45e   :  { %5877 = vmatmul.msk.f32.gmra.mxu3 %vm170_vm0, %v5813_v62  ;;  %v2548_v62 = vadd.f32 %v9953_v44, %v9952_v52  ;;  %v9960_v52 = vld [vmem:[#allocation85_spill] sm:$0xff] }
 0x460   :  { %v9364_v26 = vpop.f32.mrf.mxu2 }
 0x461   :  { %v9368_v53 = vpop.f32.mrf.mxu3  ;;  %v9370_v1 = vpop.f32.mrf.mxu0 }
 0x462   :  { %v2978_v48 = vpop.f32.mrf.mxu1 }
 0x463   :  { %v3074_v41 = vadd.f32 %v2978_v48, %v2545_v29  ;;  %v5690_v48 = vld [vmem:[%s9671_s0 + $0x350] sm:$0xff] }
 0x464   :  { %6004 = vmatmul.msk.f32.gmra.mxu0 %vm170_vm0, %v9253_v21  ;;  %v5815_v21 = vld [vmem:[%s9671_s0 + $0x331] sm:$0xff] }
 0x465   :  { %5751 = vmatmul.msk.f32.gmra.mxu2 %vm170_vm0, %v5687_v38 }
 0x466   :  { %5878 = vmatmul.msk.f32.gmra.mxu3 %vm170_vm0, %v5814_v49 }
 0x468   :  { %v9382_v47 = vpop.f32.mrf.mxu2 }
 0x469   :  { %v9386_v19 = vpop.f32.mrf.mxu3  ;;  %v9388_v40 = vpop.f32.mrf.mxu0 }
 0x46a   :  { %v2981_v11 = vpop.f32.mrf.mxu1 }
 0x46b   :  { %v9393_v4 = vadd.f32 %v2981_v11, %v2546_v39  ;;  %v2549_v39 = vadd.f32 %v9955_v2, %v9954_v23  ;;  %v9961_v23 = vld [vmem:[#allocation34_spill] sm:$0xff]  ;;  %v9962_v2 = vld [vmem:[#allocation77_spill] sm:$0xff] }
 0x46c   :  { %6005 = vmatmul.msk.f32.gmra.mxu0 %vm170_vm0, %v9279_v24  ;;  %v5816_v24 = vld [vmem:[%s9671_s0 + $0x339] sm:$0xff] }
 0x46d   :  { %5752 = vmatmul.msk.f32.gmra.mxu2 %vm170_vm0, %v5688_v14 }
 0x46e   :  { %5879 = vmatmul.msk.f32.gmra.mxu3 %vm170_vm0, %v5815_v21 }
 0x470   :  { %v3499_v55 = vpop.f32.mrf.mxu2 }
 0x471   :  { %v9404_v59 = vpop.f32.mrf.mxu3  ;;  %v9406_v3 = vpop.f32.mrf.mxu0 }
 0x472   :  { %v2984_v16 = vpop.f32.mrf.mxu1 }
 0x473   :  { %v9411_v36 = vadd.f32 %v2984_v16, %v2547_v9  ;;  %v9958_v9 = vld [vmem:[#allocation78_spill] sm:$0xff] }
 0x474   :  { %6006 = vmatmul.msk.f32.gmra.mxu0 %vm170_vm0, %v9302_v42  ;;  %v5817_v42 = vld [vmem:[%s9671_s0 + $0x349] sm:$0xff] }
 0x475   :  { %5753 = vmatmul.msk.f32.gmra.mxu2 %vm170_vm0, %v5689_v31 }
 0x476   :  { %5880 = vmatmul.msk.f32.gmra.mxu3 %vm170_vm0, %v5816_v24  ;;  %v9959_v24 = vld [vmem:[#allocation18_spill] sm:$0xff] }
 0x477   :  { %v2550_v44 = vadd.f32 %v9960_v52, %v9959_v24  ;;  %v9967_v24 = vld [vmem:[#allocation76_spill] sm:$0xff] }
 0x478   :  { %v3502_v15 = vpop.f32.mrf.mxu2 }
 0x479   :  { %v4028_v18 = vpop.f32.mrf.mxu3  ;;  %v9422_v57 = vpop.f32.mrf.mxu0 }
 0x47a   :  { %v2987_v29 = vpop.f32.mrf.mxu1 }
 0x47b   :  { %v9427_v38 = vadd.f32 %v2987_v29, %v2548_v62 }
 0x47c   :  { %6007 = vmatmul.msk.f32.gmra.mxu0 %vm170_vm0, %v9327_v27  ;;  %v9957_v27 = vld [vmem:[#allocation36_spill] sm:$0xff] }
 0x47d   :  { %5754 = vmatmul.msk.f32.gmra.mxu2 %vm170_vm0, %v5690_v48  ;;  %v2543_v16 = vadd.f32 %v9958_v9, %v9957_v27 }
 0x47e   :  { %5881 = vmatmul.msk.f32.gmra.mxu3 %vm170_vm0, %v5817_v42  ;;  %v5945_v42 = vld [vmem:[%s9671_s0 + $0x34a] sm:$0xff] }
 0x47f   :  { %v3072_v25 = vadd.f32 %v9322_v37, %v2543_v16 }
 0x480   :  { %v3505_v49 = vpop.f32.mrf.mxu2 }
 0x481   :  { %v4031_v11 = vpop.f32.mrf.mxu3  ;;  %v4557_v14 = vpop.f32.mrf.mxu0 }
 0x482   :  { %v2990_v21 = vpop.f32.mrf.mxu1 }
 0x483   :  { %v9438_v10 = vadd.f32 %v2990_v21, %v2549_v39  ;;  %v2542_v39 = vadd.f32 %v9962_v2, %v9961_v23  ;;  %v9964_v21 = vld [vmem:[#allocation79_spill] sm:$0xff] }
 0x484   :  { %6008 = vmatmul.msk.f32.gmra.mxu0 %vm170_vm0, %v5562_v34  ;;  %v9963_v34 = vld [vmem:[#allocation6_spill] sm:$0xff]  ;;  %v9969_v23 = vld [vmem:[#allocation75_spill] sm:$0xff] }
 0x485   :  { %9956 = vst [vmem:[#allocation106_spill] sm:$0xff] %v9438_v10  ;;  %v3602_v10 = vadd.f32 %v3502_v15, %v3072_v25  ;;  %v2540_v2 = vadd.f32 %v9969_v23, %v9968_v5  ;;  %v9974_v5 = vld [vmem:[#allocation20_spill] sm:$0xff]  ;;  %v9491_v23 = vld [vmem:[%s9673_s2] ss:$0 sm:$0xff] }
 0x486   :  { %5882 = vmatmul.msk.f32.gmra.mxu3 %vm170_vm0, %v5818_v54  ;;  %v2544_v54 = vadd.f32 %v9964_v21, %v9963_v34 }
 0x487   :  { %v4131_v16 = vadd.f32 %v4031_v11, %v3602_v10 }
 0x488   :  { %v3508_v31 = vpop.f32.mrf.mxu2  ;;  %v3073_v52 = vadd.f32 %v9346_v8, %v2544_v54  ;;  %v9975_v54 = vld [vmem:[#allocation86_spill] sm:$0xff] }
 0x489   :  { %v3604_v62 = vadd.f32 %v3508_v31, %v3074_v41  ;;  %v4034_v29 = vpop.f32.mrf.mxu3  ;;  %v4560_v48 = vpop.f32.mrf.mxu0  ;;  %v2541_v41 = vadd.f32 %v9967_v24, %v9966_v43  ;;  %v3071_v31 = vadd.f32 %v9297_v22, %v2542_v39  ;;  %v9973_v43 = vld [vmem:[#allocation74_spill] sm:$0xff]  ;;  %v3069_v22 = vadd.f32 %v9248_v12, %v2540_v2 }
 0x48a   :  { %v2993_v27 = vpop.f32.mrf.mxu1  ;;  %v3603_v37 = vadd.f32 %v3505_v49, %v3073_v52  ;;  %v2539_v24 = vadd.f32 %v9973_v43, %v9972_v58  ;;  %v5946_v58 = vld [vmem:[%s9671_s0 + $0x352] sm:$0xff] }
 0x48b   :  { %v9457_v9 = vadd.f32 %v2993_v27, %v2550_v44  ;;  %v3070_v34 = vadd.f32 %v9274_v63, %v2541_v41  ;;  %v3601_v21 = vadd.f32 %v3499_v55, %v3071_v31  ;;  %v9970_v44 = vld [vmem:[#allocation25_spill] sm:$0xff]  ;;  %v2551_v63 = vadd.f32 %v9975_v54, %v9974_v5 }
 0x48c   :  { %6009 = vmatmul.msk.f32.gmra.mxu0 %vm170_vm0, %v5945_v42  ;;  %v9971_v27 = vld [vmem:[#allocation73_spill] sm:$0xff]  ;;  %v4132_v15 = vadd.f32 %v4034_v29, %v3603_v37  ;;  %v4660_v42 = vadd.f32 %v4560_v48, %v4131_v16  ;;  %v3068_v55 = vadd.f32 %v9222_v33, %v2539_v24  ;;  %v3599_v49 = vadd.f32 %v9364_v26, %v3069_v22  ;;  %v9976_v16 = vld [vmem:[#allocation22_spill] sm:$0xff] }
 0x48d   :  { %9965 = vst [vmem:[#allocation112_spill] sm:$0xff] %v9457_v9  ;;  %v2538_v9 = vadd.f32 %v9971_v27, %v9970_v44  ;;  %v3600_v25 = vadd.f32 %v9382_v47, %v3070_v34  ;;  %v4130_v8 = vadd.f32 %v4028_v18, %v3601_v21  ;;  %v9977_v44 = vld [vmem:[#allocation87_spill] sm:$0xff]  ;;  %v4652_v5 = vadd.f32 %v9293_v20, %v9272_v0 }
 0x48e   :  { %v3598_v33 = vadd.f32 %v9342_v13, %v3068_v55  ;;  %v4128_v26 = vadd.f32 %v9386_v19, %v3599_v49  ;;  %v2552_v27 = vadd.f32 %v9977_v44, %v9976_v16  ;;  %v4722_v54 = vadd.f32 %v9491_v23, %v9348_v61  ;;  %v9978_v49 = vld [vmem:[#allocation24_spill] sm:$0xff] }
 0x48f   :  { %v4129_v12 = vadd.f32 %v9404_v59, %v3600_v25  ;;  %v4659_v47 = vadd.f32 %v4557_v14, %v4130_v8  ;;  %v3067_v31 = vadd.f32 %v9191_v17, %v2538_v9  ;;  %v4728_v59 = vadd.f32 %v9491_v23, %v4660_v42 }
 0x490   :  { %v3511_v39 = vpop.f32.mrf.mxu2  ;;  %v4127_v13 = vadd.f32 %v9368_v53, %v3598_v33  ;;  %v4648_v33 = vadd.f32 %v9184_v35, %v9146_v45  ;;  %v9983_v45 = vld [vmem:[#allocation111_spill] sm:$0xff]  ;;  %v9984_v35 = vld [vmem:[#allocation46_spill] sm:$0xff] }
 0x491   :  { %v3605_v11 = vadd.f32 %v3511_v39, %v9393_v4  ;;  %v4037_v10 = vpop.f32.mrf.mxu3  ;;  %v4563_v41 = vpop.f32.mrf.mxu0  ;;  %v4658_v4 = vadd.f32 %v9422_v57, %v4129_v12  ;;  %v3597_v17 = vadd.f32 %v9316_v46, %v3067_v31  ;;  %v4727_v19 = vadd.f32 %v9491_v23, %v4659_v47 }
 0x492   :  { %v4133_v18 = vadd.f32 %v4037_v10, %v3604_v62  ;;  %v2996_v29 = vpop.f32.mrf.mxu1  ;;  %v4661_v48 = vadd.f32 %v4563_v41, %v4132_v15  ;;  %v4657_v62 = vadd.f32 %v9406_v3, %v4128_v26  ;;  %v4656_v2 = vadd.f32 %v9388_v40, %v4127_v13 }
 0x493   :  { %v9484_v52 = vadd.f32 %v2996_v29, %v2551_v63  ;;  %v4126_v9 = vadd.f32 %v9344_v7, %v3597_v17  ;;  %v4726_v34 = vadd.f32 %v9491_v23, %v4658_v4  ;;  %v4792_v21 = vmax.f32 %v4728_v59, 0.0  ;;  %v9982_v17 = vld [vmem:[#allocation106_spill] sm:$0xff] }
 0x494   :  { %v4729_v14 = vadd.f32 %v9491_v23, %v4661_v48  ;;  %6010 = vmatmul.msk.f32.gmra.mxu0 %vm170_vm0, %v5946_v58  ;;  %v4725_v24 = vadd.f32 %v9491_v23, %v4657_v62  ;;  %v4791_v22 = vmax.f32 %v4727_v19, 0.0  ;;  %v4724_v15 = vadd.f32 %v9491_v23, %v4656_v2 }
 0x495   :  { %v4655_v46 = vadd.f32 %v9370_v1, %v4126_v9  ;;  %v4790_v42 = vmax.f32 %v4726_v34, 0.0  ;;  %v4653_v1 = vadd.f32 %v9318_v50, %v9295_v28  ;;  %v4651_v41 = vadd.f32 %v9270_v51, %v9246_v6 }
 0x496   :  { %v4793_v57 = vmax.f32 %v4729_v14, 0.0  ;;  %v4789_v39 = vmax.f32 %v4725_v24, 0.0  ;;  %v4788_v63 = vmax.f32 %v4724_v15, 0.0  ;;  %v4650_v29 = vadd.f32 %v9244_v56, %v9220_v60  ;;  %v9980_v60 = vld [vmem:[#allocation44_spill] sm:$0xff]  ;;  %v9981_v56 = vld [vmem:[#allocation103_spill] sm:$0xff] }
 0x497   :  { %v4721_v12 = vadd.f32 %v9491_v23, %v4653_v1  ;;  %v4720_v48 = vadd.f32 %v9491_v23, %v4652_v5  ;;  %v4786_v31 = vmax.f32 %v4722_v54, 0.0  ;;  %v4649_v6 = vadd.f32 %v9218_v32, %v9189_v30 }
 0x498   :  { %v3514_v37 = vpop.f32.mrf.mxu2  ;;  %4861 = vmatpush.msrb.mxu3 %v4793_v57  ;;  %v4719_v51 = vadd.f32 %v9491_v23, %v4651_v41  ;;  %v4718_v26 = vadd.f32 %v9491_v23, %v4650_v29  ;;  %v4647_v14 = vadd.f32 %v9981_v56, %v9980_v60  ;;  %v4646_v2 = vadd.f32 %v9984_v35, %v9983_v45 }
 0x499   :  { %v3606_v53 = vadd.f32 %v3514_v37, %v9411_v36  ;;  %v4040_v3 = vpop.f32.mrf.mxu3  ;;  %v4566_v43 = vpop.f32.mrf.mxu0  ;;  %v4723_v36 = vadd.f32 %v9491_v23, %v4655_v46  ;;  %v4784_v59 = vmax.f32 %v4720_v48, 0.0  ;;  %v4717_v30 = vadd.f32 %v9491_v23, %v4649_v6 }
 0x49a   :  { %v4134_v7 = vadd.f32 %v4040_v3, %v3605_v11  ;;  %v2999_v25 = vpop.f32.mrf.mxu1  ;;  %v9508_v40 = vadd.f32 %v4566_v43, %v4133_v18  ;;  %4862 = vmatpush.msrb.mxu3 %v4792_v21  ;;  %v9979_v11 = vld [vmem:[#allocation88_spill] sm:$0xff]  ;;  %v4783_v9 = vmax.f32 %v4719_v51, 0.0  ;;  %v4716_v34 = vadd.f32 %v9491_v23, %v4648_v33 }
 0x49b   :  { %v9510_v8 = vadd.f32 %v2999_v25, %v2552_v27  ;;  %v2553_v10 = vadd.f32 %v9979_v11, %v9978_v49  ;;  %v4787_v47 = vmax.f32 %v4723_v36, 0.0  ;;  %v4782_v21 = vmax.f32 %v4718_v26, 0.0 }
 0x49c   :  { %4863 = vmatpush.msrb.mxu3 %v4791_v22  ;;  %v4715_v37 = vadd.f32 %v9491_v23, %v4647_v14  ;;  %v4781_v16 = vmax.f32 %v4717_v30, 0.0  ;;  %v4714_v44 = vadd.f32 %v9491_v23, %v4646_v2  ;;  %v4780_v46 = vmax.f32 %v4716_v34, 0.0 }
 0x49e   :  { %4864 = vmatpush.msrb.mxu3 %v4790_v42  ;;  %v4779_v25 = vmax.f32 %v4715_v37, 0.0  ;;  %v4778_v15 = vmax.f32 %v4714_v44, 0.0  ;;  %v9987_v44 = vld [vmem:[#allocation94_spill] sm:$0xff] }
 0x4a0   :  { %v3517_v55 = vpop.f32.mrf.mxu2  ;;  %4865 = vmatpush.msrb.mxu3 %v4789_v39 }
 0x4a1   :  { %v3607_v28 = vadd.f32 %v3517_v55, %v9427_v38  ;;  %v4043_v50 = vpop.f32.mrf.mxu3  ;;  %v4569_v58 = vpop.f32.mrf.mxu0  ;;  %v4785_v38 = vmax.f32 %v4721_v12, 0.0 }
 0x4a2   :  { %v4135_v0 = vadd.f32 %v4043_v50, %v3606_v53  ;;  %v3002_v20 = vpop.f32.mrf.mxu1  ;;  %v9526_v18 = vadd.f32 %v4569_v58, %v4134_v7  ;;  %4866 = vmatpush.msrb.mxu3 %v4788_v63  ;;  %v9985_v53 = vld [vmem:[#allocation112_spill] sm:$0xff] }
 0x4a3   :  { %v3082_v61 = vadd.f32 %v3002_v20, %v2553_v10 }
 0x4a4   :  { %4867 = vmatpush.msrb.mxu3 %v4787_v47 }
 0x4a6   :  { %4868 = vmatpush.msrb.mxu3 %v4786_v31 }
 0x4a8   :  { %v3520_v4 = vpop.f32.mrf.mxu2  ;;  %4869 = vmatpush.msrb.mxu3 %v4785_v38 }
 0x4a9   :  { %v3608_v13 = vadd.f32 %v3520_v4, %v9982_v17  ;;  %v4046_v62 = vpop.f32.mrf.mxu3  ;;  %v4572_v19 = vpop.f32.mrf.mxu0 }
 0x4aa   :  { %v4136_v32 = vadd.f32 %v4046_v62, %v3607_v28  ;;  %v9541_v57 = vadd.f32 %v4572_v19, %v4135_v0  ;;  %4870 = vmatpush.msrb.mxu3 %v4784_v59 }
 0x4ac   :  { %4871 = vmatpush.msrb.mxu3 %v4783_v9 }
 0x4ae   :  { %4872 = vmatpush.msrb.mxu3 %v4782_v21  ;;  %v4810_v21 = vld [vmem:[%s9679_s8] sm:$0xff] }
 0x4af   :  { %4812 = vst [vmem:[#allocation1] ss:$4 sm:$0xff] %v4810_v21  ;;  %v9997_v21 = vld [vmem:[#allocation90_spill] sm:$0xff] }
 0x4b0   :  { %v3523_v27 = vpop.f32.mrf.mxu2  ;;  %4873 = vmatpush.msrb.mxu3 %v4781_v16  ;;  %v9986_v16 = vld [vmem:[#allocation37_spill] sm:$0xff] }
 0x4b1   :  { %v3609_v3 = vadd.f32 %v3523_v27, %v9985_v53  ;;  %v4049_v43 = vpop.f32.mrf.mxu3  ;;  %v4575_v24 = vpop.f32.mrf.mxu0  ;;  %v2559_v27 = vadd.f32 %v9987_v44, %v9986_v16 }
 0x4b2   :  { %v4137_v22 = vadd.f32 %v4049_v43, %v3608_v13  ;;  %v9549_v7 = vadd.f32 %v4575_v24, %v4136_v32  ;;  %4874 = vmatpush.msrb.mxu3 %v4780_v46  ;;  %v9989_v43 = vld [vmem:[#allocation93_spill] sm:$0xff] }
 0x4b4   :  { %4875 = vmatpush.msrb.mxu3 %v4779_v25  ;;  %v9991_v25 = vld [vmem:[#allocation96_spill] sm:$0xff] }
 0x4b6   :  { %4876 = vmatpush.msrb.mxu3 %v4778_v15 }
 0x4b8   :  { %v3526_v42 = vpop.f32.mrf.mxu2 }
 0x4b9   :  { %v3610_v1 = vadd.f32 %v3526_v42, %v9484_v52  ;;  %v4052_v36 = vpop.f32.mrf.mxu3  ;;  %v4578_v39 = vpop.f32.mrf.mxu0 }
 0x4ba   :  { %v4138_v5 = vadd.f32 %v4052_v36, %v3609_v3  ;;  %v9552_v54 = vadd.f32 %v4578_v39, %v4137_v22  ;;  %v9559_v52 = vpop.f32.mrf.mxu1  ;;  %v9988_v3 = vld [vmem:[#allocation35_spill] sm:$0xff]  ;;  %v9990_v22 = vld [vmem:[#allocation38_spill] sm:$0xff]  ;;  %v9992_v39 = vld [vmem:[#allocation33_spill] sm:$0xff] }
 0x4bb   :  { %v2558_v24 = vadd.f32 %v9989_v43, %v9988_v3  ;;  %v2560_v15 = vadd.f32 %v9991_v25, %v9990_v22  ;;  %v9998_v3 = vld [vmem:[#allocation26_spill] sm:$0xff]  ;;  %v9999_v43 = vld [vmem:[#allocation89_spill] sm:$0xff] }
 0x4c0   :  { %v3529_v63 = vpop.f32.mrf.mxu2 }
 0x4c1   :  { %v3611_v55 = vadd.f32 %v3529_v63, %v9510_v8  ;;  %v4055_v49 = vpop.f32.mrf.mxu3  ;;  %v4581_v11 = vpop.f32.mrf.mxu0 }
 0x4c2   :  { %v4139_v10 = vadd.f32 %v4055_v49, %v3610_v1  ;;  %v9555_v41 = vadd.f32 %v4581_v11, %v4138_v5  ;;  %v3008_v6 = vpop.f32.mrf.mxu1  ;;  %v4814_v1 = vld.sshfl [vmem:[#allocation1 + $0x8] sm:$0xff pattern:$0x73625140] }
 0x4c3   :  { %4857 = vmatmul.f32.vlgmr.msrb.gmra.mxu2 %v4814_v1  ;;  %v9993_v5 = vld [vmem:[#allocation92_spill] sm:$0xff] }
 0x4c4   :  { %v2557_v63 = vadd.f32 %v9993_v5, %v9992_v39 }
 0x4c8   :  { %v3532_v28 = vpop.f32.mrf.mxu2 }
 0x4c9   :  { %v3612_v50 = vadd.f32 %v3532_v28, %v3082_v61  ;;  %v4058_v58 = vpop.f32.mrf.mxu3  ;;  %v4584_v12 = vpop.f32.mrf.mxu0  ;;  %v9994_v28 = vld [vmem:[#allocation31_spill] sm:$0xff] }
 0x4ca   :  { %v4140_v47 = vadd.f32 %v4058_v58, %v3611_v55  ;;  %v9557_v0 = vadd.f32 %v4584_v12, %v4139_v10  ;;  %v3011_v26 = vpop.f32.mrf.mxu1  ;;  %v4815_v10 = vld.sshfl [vmem:[#allocation1 + $0x10] sm:$0xff pattern:$0x73625140] }
 0x4cb   :  { %4877 = vmatmul.f32.vlgmr.msrb.gmra.mxu3 %v4815_v10 }
 0x4d0   :  { %v9561_v20 = vpop.f32.mrf.mxu2 }
 0x4d1   :  { %v4061_v29 = vpop.f32.mrf.mxu3  ;;  %v4587_v48 = vpop.f32.mrf.mxu0 }
 0x4d2   :  { %v4141_v31 = vadd.f32 %v4061_v29, %v3612_v50  ;;  %v9563_v8 = vadd.f32 %v4587_v48, %v4140_v47  ;;  %v3014_v17 = vpop.f32.mrf.mxu1  ;;  %v9995_v50 = vld [vmem:[#allocation91_spill] sm:$0xff] }
 0x4d3   :  { %v2556_v58 = vadd.f32 %v9995_v50, %v9994_v28  ;;  %v3086_v47 = vadd.f32 %v3014_v17, %v2557_v63  ;;  %v4735_v28 = vadd.f32 %v9491_v23, %v9555_v41  ;;  %v4731_v41 = vadd.f32 %v9491_v23, %v9526_v18  ;;  %v4903_v18 = vld [vmem:[%s9674_s3 + $0x10] sm:$0xff] }
 0x4d5   :  { %v3085_v44 = vadd.f32 %v3011_v26, %v2556_v58 }
 0x4d8   :  { %v3538_v51 = vpop.f32.mrf.mxu2 }
 0x4d9   :  { %v9565_v38 = vpop.f32.mrf.mxu3  ;;  %v4590_v33 = vpop.f32.mrf.mxu0 }
 0x4da   :  { %v9567_v61 = vadd.f32 %v4590_v33, %v4141_v31  ;;  %v3017_v30 = vpop.f32.mrf.mxu1  ;;  %v4813_v33 = vld.sshfl [vmem:[#allocation1] sm:$0xff pattern:$0x73625140] }
 0x4db   :  { %v3087_v55 = vadd.f32 %v3017_v30, %v2558_v24  ;;  %4837 = vmatmul.f32.vlgmr.msrb.gmra.mxu1 %v4813_v33  ;;  %v2554_v24 = vadd.f32 %v9999_v43, %v9998_v3  ;;  %v4816_v33 = vld.sshfl [vmem:[#allocation1 + $0x18] sm:$0xff pattern:$0x73625140]  ;;  %v4956_v3 = vld [vmem:[%s9677_s6 + $0x10] sm:$0xff]  ;;  %v4955_v43 = vld [vmem:[%s9677_s6 + $0x8] sm:$0xff] }
 0x4e0   :  { %v3541_v60 = vpop.f32.mrf.mxu2 }
 0x4e1   :  { %v4067_v4 = vpop.f32.mrf.mxu3  ;;  %v9569_v59 = vpop.f32.mrf.mxu0 }
 0x4e2   :  { %v3020_v35 = vpop.f32.mrf.mxu1 }
 0x4e3   :  { %v3088_v42 = vadd.f32 %v3020_v35, %v2559_v27  ;;  %v9996_v35 = vld [vmem:[#allocation29_spill] sm:$0xff] }
 0x4e4   :  { %v2555_v16 = vadd.f32 %v9997_v21, %v9996_v35 }
 0x4e6   :  { %v3084_v22 = vadd.f32 %v3008_v6, %v2555_v16 }
 0x4e8   :  { %v3544_v13 = vpop.f32.mrf.mxu2  ;;  %v3614_v1 = vadd.f32 %v3538_v51, %v3084_v22  ;;  %v6019_v22 = vld [vmem:[%s9675_s4] ss:$0 sm:$0xff] }
 0x4e9   :  { %v4070_v56 = vpop.f32.mrf.mxu3  ;;  %v9571_v14 = vpop.f32.mrf.mxu0  ;;  %v3616_v27 = vadd.f32 %v3544_v13, %v3086_v47 }
 0x4ea   :  { %v3023_v46 = vpop.f32.mrf.mxu1 }
 0x4eb   :  { %v3089_v49 = vadd.f32 %v3023_v46, %v2560_v15  ;;  %v3615_v15 = vadd.f32 %v3541_v60, %v3085_v44 }
 0x4f0   :  { %v3547_v32 = vpop.f32.mrf.mxu2 }
 0x4f1   :  { %v4073_v62 = vpop.f32.mrf.mxu3  ;;  %v4599_v19 = vpop.f32.mrf.mxu0  ;;  %v3617_v29 = vadd.f32 %v3547_v32, %v3087_v55 }
 0x4f2   :  { %v4145_v17 = vadd.f32 %v4073_v62, %v3616_v27 }
 0x4f8   :  { %v3550_v2 = vpop.f32.mrf.mxu2 }
 0x4f9   :  { %v4076_v9 = vpop.f32.mrf.mxu3  ;;  %v4602_v45 = vpop.f32.mrf.mxu0  ;;  %v3618_v11 = vadd.f32 %v3550_v2, %v3088_v42 }
 0x4fa   :  { %v4146_v30 = vadd.f32 %v4076_v9, %v3617_v29  ;;  %v4674_v39 = vadd.f32 %v4602_v45, %v4145_v17 }
 0x500   :  { %v3553_v36 = vpop.f32.mrf.mxu2 }
 0x501   :  { %v4605_v34 = vpop.f32.mrf.mxu0  ;;  %v4079_v37 = vpop.f32.mrf.mxu3  ;;  %v3619_v48 = vadd.f32 %v3553_v36, %v3089_v49  ;;  %v4144_v36 = vadd.f32 %v4070_v56, %v3615_v15 }
 0x502   :  { %v4147_v31 = vadd.f32 %v4079_v37, %v3618_v11  ;;  %v4675_v32 = vadd.f32 %v4605_v34, %v4146_v30  ;;  %v3083_v37 = vadd.f32 %v9559_v52, %v2554_v24  ;;  %v4742_v52 = vadd.f32 %v9491_v23, %v4674_v39  ;;  %v4954_v24 = vld [vmem:[%s9677_s6] sm:$0xff] }
 0x503   :  { %v4673_v5 = vadd.f32 %v4599_v19, %v4144_v36  ;;  %v4736_v11 = vadd.f32 %v9491_v23, %v9557_v0  ;;  %v4732_v0 = vadd.f32 %v9491_v23, %v9541_v57  ;;  %v4904_v57 = vld [vmem:[%s9674_s3 + $0x18] sm:$0xff]  ;;  %v4950_v36 = vld [vmem:[%s9676_s5] sm:$0xff] }
 0x504   :  { %v3613_v9 = vadd.f32 %v9561_v20, %v3083_v37  ;;  %v4743_v6 = vadd.f32 %v9491_v23, %v4675_v32  ;;  %4925 = vmatpush.msra.mxu2 %v4904_v57  ;;  %v4952_v37 = vld [vmem:[%s9676_s5 + $0x10] sm:$0xff] }
 0x505   :  { %v4741_v45 = vadd.f32 %v9491_v23, %v4673_v5  ;;  %v4800_v58 = vmax.f32 %v4736_v11, 0.0 }
 0x506   :  { %v4142_v60 = vadd.f32 %v9565_v38, %v3613_v9  ;;  %v4807_v34 = vmax.f32 %v4743_v6, 0.0  ;;  %v4738_v38 = vadd.f32 %v9491_v23, %v9567_v61  ;;  %v4734_v61 = vadd.f32 %v9491_v23, %v9552_v54  ;;  %4926 = vmatpush.msra.mxu2 %v4903_v18 }
 0x507   :  { %v4805_v55 = vmax.f32 %v4741_v45, 0.0  ;;  %v4730_v54 = vadd.f32 %v9491_v23, %v9508_v40  ;;  %v4901_v40 = vld [vmem:[%s9674_s3] sm:$0xff] }
 0x508   :  { %v4671_v56 = vadd.f32 %v9569_v59, %v4142_v60  ;;  %v4737_v59 = vadd.f32 %v9491_v23, %v9563_v8  ;;  %v4802_v10 = vmax.f32 %v4738_v38, 0.0  ;;  %v4733_v8 = vadd.f32 %v9491_v23, %v9549_v7 }
 0x509   :  { %v4608_v53 = vpop.f32.mrf.mxu0  ;;  %v4082_v12 = vpop.f32.mrf.mxu3  ;;  %v4798_v47 = vmax.f32 %v4734_v61, 0.0  ;;  %v4794_v7 = vmax.f32 %v4730_v54, 0.0 }
 0x50a   :  { %v4148_v46 = vadd.f32 %v4082_v12, %v3619_v48  ;;  %v4676_v2 = vadd.f32 %v4608_v53, %v4147_v31  ;;  %v4143_v53 = vadd.f32 %v4067_v4, %v3614_v1  ;;  %v4806_v4 = vmax.f32 %v4742_v52, 0.0  ;;  %v4951_v1 = vld [vmem:[%s9676_s5 + $0x8] sm:$0xff]  ;;  %v6020_v52 = vld [vmem:[%s9678_s7] ss:$0 sm:$0xff]  ;;  %s6054_s7 = smov [#allocation2]  }
 0x50b   :  { %v4739_v19 = vadd.f32 %v9491_v23, %v4671_v56  ;;  %v4801_v50 = vmax.f32 %v4737_v59, 0.0  ;;  %v4799_v12 = vmax.f32 %v4735_v28, 0.0  ;;  %v4797_v29 = vmax.f32 %v4733_v8, 0.0  ;;  %s5040_s2 = sshll.u32 %s6054_s7, 4  ;;  %s5041_s2 = int_to_ptr.vmem [resolvable:$true] %s5040_s2 }
 0x50c   :  { %v4744_v26 = vadd.f32 %v9491_v23, %v4676_v2  ;;  %v4672_v62 = vadd.f32 %v9571_v14, %v4143_v53  ;;  %v4796_v48 = vmax.f32 %v4732_v0, 0.0  ;;  %v4795_v31 = vmax.f32 %v4731_v41, 0.0  ;;  %v4957_v2 = vld [vmem:[%s9677_s6 + $0x18] sm:$0xff] }
 0x50d   :  { %v4803_v49 = vmax.f32 %v4739_v19, 0.0  ;;  %4977 = vmatpush.msra.mxu3 %v4957_v2 }
 0x50e   :  { %v4808_v51 = vmax.f32 %v4744_v26, 0.0  ;;  %v4740_v20 = vadd.f32 %v9491_v23, %v4672_v62 }
 0x50f   :  { %4978 = vmatpush.msra.mxu3 %v4956_v3 }
 0x510   :  { %v4804_v14 = vmax.f32 %v4740_v20, 0.0 }
 0x511   :  { %v4611_v25 = vpop.f32.mrf.mxu0  ;;  %4979 = vmatpush.msra.mxu3 %v4955_v43 }
 0x512   :  { %v4677_v42 = vadd.f32 %v4611_v25, %v4148_v46 }
 0x513   :  { %4980 = vmatpush.msra.mxu3 %v4954_v24 }
 0x514   :  { %v4745_v13 = vadd.f32 %v9491_v23, %v4677_v42  ;;  %v4902_v23 = vld [vmem:[%s9674_s3 + $0x8] sm:$0xff]  ;;  %v4953_v42 = vld [vmem:[%s9676_s5 + $0x18] sm:$0xff] }
 0x515   :  { %4927 = vmatpush.msra.mxu2 %v4902_v23 }
 0x516   :  { %v4809_v63 = vmax.f32 %v4745_v13, 0.0 }
 0x517   :  { %4928 = vmatpush.msra.mxu2 %v4901_v40 }
 0x518   :  { %4881 = vmatpush.msra.mxu1 %v4809_v63 }
 0x519   :  { %5000 = vmatpush.msrb.mxu2 %v4953_v42 }
 0x51a   :  { %4882 = vmatpush.msra.mxu1 %v4808_v51 }
 0x51b   :  { %5001 = vmatpush.msrb.mxu2 %v4952_v37 }
 0x51c   :  { %4883 = vmatpush.msra.mxu1 %v4807_v34 }
 0x51d   :  { %5002 = vmatpush.msrb.mxu2 %v4951_v1 }
 0x51e   :  { %4884 = vmatpush.msra.mxu1 %v4806_v4 }
 0x51f   :  { %5003 = vmatpush.msrb.mxu2 %v4950_v36 }
 0x520   :  { %4885 = vmatpush.msra.mxu1 %v4805_v55 }
 0x522   :  { %4886 = vmatpush.msra.mxu1 %v4804_v14 }
 0x524   :  { %4887 = vmatpush.msra.mxu1 %v4803_v49 }
 0x526   :  { %4888 = vmatpush.msra.mxu1 %v4802_v10 }
 0x528   :  { %4889 = vmatpush.msra.mxu1 %v4801_v50 }
 0x52a   :  { %4890 = vmatpush.msra.mxu1 %v4800_v58 }
 0x52c   :  { %4891 = vmatpush.msra.mxu1 %v4799_v12 }
 0x52e   :  { %4892 = vmatpush.msra.mxu1 %v4798_v47 }
 0x530   :  { %4893 = vmatpush.msra.mxu1 %v4797_v29 }
 0x532   :  { %4894 = vmatpush.msra.mxu1 %v4796_v48 }
 0x534   :  { %4895 = vmatpush.msra.mxu1 %v4795_v31 }
 0x536   :  { %4896 = vmatpush.msra.mxu1 %v4794_v7 }
 0x537   :  { %4897 = vmatmul.f32.vlgmr.msra.gmra.mxu1 %v4816_v33 }
 0x546   :  { %v4858_v21 = vpop.f32.mrf.mxu2 }
 0x54e   :  { %v4878_v44 = vpop.f32.mrf.mxu3 }
 0x558   :  { %v4838_v35 = vpop.f32.mrf.mxu1 }
 0x559   :  { %v4859_v16 = vadd.f32 %v4858_v21, %v4838_v35 }
 0x55b   :  { %v4879_v27 = vadd.f32 %v4878_v44, %v4859_v16 }
 0x5b4   :  { %v4898_v30 = vpop.f32.mrf.mxu1 }
 0x5b5   :  { %v4899_v46 = vadd.f32 %v4898_v30, %v4879_v27 }
 0x5b7   :  { %6011 = vmatmul.msk.f32.vlgmr.msra.gmra.mxu2 %vm4909_vm1, %v4899_v46 }
 0x63a   :  { %v4930_v25 = vpop.f32.mrf.mxu2 }
 0x63b   :  { %v4931_v15 = vadd.f32 %v6019_v22, %v4930_v25 }
 0x63d   :  { %v4933_v17 = vmul.f32 %v4931_v15, %v4931_v15  ;;  %6012 = vmatmul.msk.f32.vlgmr.msra.gmra.mxu3 %vm4909_vm1, %v4931_v15 }
 0x63f   :  { %v4935_v32 = vsel %vm4934_vm2, %v4933_v17, 0.0 }
 0x640   :  { %4936 = vadd.xlane.f32.xlu0 %v4935_v32 }
 0x6b3   :  { %v4937_v39 = vpop.xlane.xlu0 %4936 }
 0x6b4   :  { %v4938_v26 = vadd.f32 1e-12, %v4937_v39 }
 0x6b6   :  { %6021 = vrsqrt.f32 %v4938_v26  ;;  %vm4945_vm4 = vweird.f32 %v4938_v26 }
 0x6bc   :  { %v6022_v13 = vpop.eup %6021 }
 0x6bd   :  { %v4940_v9 = vmul.f32 %v6022_v13, %v4938_v26  ;;  %vm4946_vm3 = vweird.f32 %v6022_v13 }
 0x6be   :  { %vm4947_vm5 = vmor %vm4945_vm4, %vm4946_vm3 }
 0x6bf   :  { %v4941_v53 = vmul.f32 %v6022_v13, %v4940_v9 }
 0x6c0   :  { %v4982_v51 = vpop.f32.mrf.mxu3 }
 0x6c1   :  { %v4942_v5 = vmul.f32 0.5, %v4941_v53  ;;  %v4983_v56 = vadd.f32 %v6020_v52, %v4982_v51 }
 0x6c3   :  { %v4943_v6 = vsub.f32 1.5, %v4942_v5 }
 0x6c5   :  { %v4944_v63 = vmul.f32 %v6022_v13, %v4943_v6 }
 0x6c7   :  { %v4948_v60 = vsel %vm4947_vm5, %v6022_v13, %v4944_v63 }
 0x6c8   :  { %v4949_v62 = vmul.f32 %v4948_v60, %v4931_v15 }
 0x6ca   :  { %6013 = vmatmul.msk.f32.vlgmr.msrb.gmra.mxu2 %vm4909_vm1, %v4949_v62 }
 0x74d   :  { %v5005_v45 = vpop.f32.mrf.mxu2 }
 0x74e   :  { %v5006_v34 = vadd.f32 %v5005_v45, %v4983_v56 }
 0x750   :  { %v5008_v20 = vmul.f32 0.5, %v5006_v34 }
 0x752   :  { %v5010_v4 = vsel %vm5009_vm6, %v5008_v20, -inf }
 0x753   :  { %5011 = vmax.xlane.f32.xlu0 %v5010_v4 }
 0x7c6   :  { %v5012_v19 = vpop.xlane.xlu0 %5011 }
 0x7c7   :  { %v5013_v55 = vsub.f32 %v5008_v20, %v5012_v19 }
 0x7c9   :  { %v5014_v38 = vmul.f32 1.442695, %v5013_v55 }
 0x7cb   :  { %6023 = vpow2.f32 %v5014_v38 }
 0x7d1   :  { %v6024_v14 = vpop.eup %6023 }
 0x7d2   :  { %v5016_v59 = vsel %vm5009_vm6, %v6024_v14, 0.0 }
 0x7d3   :  { %5017 = vadd.xlane.f32.xlu1 %v5016_v59 }
 0x846   :  { %v5018_v49 = vpop.xlane.xlu1 %5017 }
 0x847   :  { %6025 = vrcp.f32 %v5018_v49  ;;  %v5030_v50 = vand.u32 2147483648, %v5018_v49  ;;  %v5028_v58 = vand.u32 2147483647, %v5018_v49  ;;  %vm5024_vm8 = vweird.f32 %v5018_v49 }
 0x849   :  { %v5031_v12 = vor.u32 1.1754944e-38, %v5030_v50  ;;  %vm5029_vm10 = vcmp.eq.f32.partialorder %v5028_v58, 8.507059e+37 }
 0x84d   :  { %v6026_v11 = vpop.eup %6025 }
 0x84e   :  { %v5020_v10 = vmul.f32 %v6026_v11, %v5018_v49  ;;  %vm5025_vm7 = vweird.f32 %v6026_v11 }
 0x84f   :  { %vm5026_vm9 = vmor %vm5024_vm8, %vm5025_vm7 }
 0x850   :  { %v5021_v28 = vsub.f32 1.0, %v5020_v10 }
 0x852   :  { %v5022_v61 = vmul.f32 %v6026_v11, %v5021_v28 }
 0x854   :  { %v5023_v8 = vadd.f32 %v6026_v11, %v5022_v61 }
 0x856   :  { %v5027_v0 = vsel %vm5026_vm9, %v6026_v11, %v5023_v8 }
 0x857   :  { %v5032_v47 = vsel %vm5029_vm10, %v5031_v12, %v5027_v0 }
 0x858   :  { %v5033_v41 = vmul.f32 %v6024_v14, %v5032_v47 }
 0x85a   :  { %5034 = vst.msk [vmem:[#allocation2] sm:$0x3] %vm5009_vm6, %v5033_v41 }
 0x85b   :  { %5045 = dma.vmem_to_hbm [thread:$0]  %s5041_s2, 32, %s5043_s22, [#allocation3]  }
 0x85c   :  { %6052 = dma.done.wait [#allocation3], 32  }
 0x85d   :  { %6053 = vsyncadd [#allocation3], 4294967264 }
 0x85e   :  { %5050 = vsyncpa [#allocation3], 1 }

</bundles_post_ra>
